<compile_context>
chip_gen: v5e
topology: v5e:2x2
jax: 0.10.0
libtpu: 0.0.40
codegen_flags: <defaults>
</compile_context>

<pallas_src>
import math
from functools import partial

import jax
import jax.numpy as jnp
from jax.experimental import pallas as pl
from jax.experimental.pallas import tpu as pltpu

EPS_LN = 1e-5
EPS_BN = 1e-5

_VMEM_LIMIT = 60 * 1024 * 1024   # <= physical VMEM on v5e/v6e/v7x, > default scoped limits


def _cparams(*sem):
    return pltpu.CompilerParams(dimension_semantics=tuple(sem),
                                vmem_limit_bytes=_VMEM_LIMIT)


def _row_tile(M, cap=512, min_steps=4):
    """Row tile: multiple of 8, divides M, <= cap, and aims for >= min_steps grid steps."""
    if M % 8 != 0:
        return M
    target = max(8, min(cap, M // min_steps))
    t = max(8, (target // 8) * 8)
    while t >= 8:
        if M % t == 0:
            return t
        t -= 8
    return M


def _col_tile(N, cap=1024):
    """Column (Dff) tile: multiple of 128 dividing N, <= cap (else N)."""
    if N <= cap:
        return N
    t = (min(cap, N) // 128) * 128
    while t >= 128:
        if N % t == 0:
            return t
        t -= 128
    return N


# -------- probe pipeline_mode=pl.Buffered(1) support once (single-buffer invariant operands) ----

def _probe_buffered1():
    try:
        spec = pl.BlockSpec((8, 128), lambda i: (0, 0), pipeline_mode=pl.Buffered(1))

        def _k(x_ref, o_ref):
            o_ref[...] = x_ref[...] + 1.0

        x = jnp.arange(8 * 128, dtype=jnp.float32).reshape(8, 128)
        out = pl.pallas_call(
            _k,
            out_shape=jax.ShapeDtypeStruct((16, 128), jnp.float32),
            grid=(2,),
            in_specs=[spec],
            out_specs=pl.BlockSpec((8, 128), lambda i: (i, 0)),
        )(x)
        out = jax.block_until_ready(out)
        return bool(jnp.allclose(out[:8], x + 1.0)) and bool(jnp.allclose(out[8:], x + 1.0))
    except Exception:
        return False


_BUFFERED1_OK = _probe_buffered1()


def _const_spec(block_shape, index_map):
    """BlockSpec for grid-invariant operands: single pipeline buffer when supported."""
    if _BUFFERED1_OK:
        return pl.BlockSpec(block_shape, index_map, pipeline_mode=pl.Buffered(1))
    return pl.BlockSpec(block_shape, index_map)


# ----------------------------- fused row-tiled kernels -----------------------------

def _ln(x, g, b):
    mu = jnp.mean(x, axis=-1, keepdims=True)
    xc = x - mu
    var = jnp.mean(xc * xc, axis=-1, keepdims=True)
    return xc * jax.lax.rsqrt(var + EPS_LN) * g + b


def _ffn_kernel(x_ref, g_ref, b_ref, w1_ref, b1_ref, w2_ref, b2_ref, *rest,
                res_scale, final_ln):
    if final_ln:
        og_ref, ob_ref, o_ref, ln_scr, acc_scr = rest
    else:
        o_ref, ln_scr, acc_scr = rest

    j = pl.program_id(1)

    @pl.when(j == 0)
    def _():
        ln_scr[...] = _ln(x_ref[...], g_ref[...], b_ref[...]).astype(jnp.bfloat16)
        acc_scr[...] = jnp.zeros_like(acc_scr)

    h = jnp.dot(ln_scr[...], w1_ref[...], preferred_element_type=jnp.float32) + b1_ref[...]
    h = h * jax.nn.sigmoid(h)                                            # SiLU (f32)
    acc_scr[...] += jnp.dot(h.astype(jnp.bfloat16), w2_ref[...],
                            preferred_element_type=jnp.float32)

    @pl.when(j == pl.num_programs(1) - 1)
    def _():
        y = x_ref[...] + res_scale * (acc_scr[...] + b2_ref[...])        # fused residual
        if final_ln:
            y = _ln(y, og_ref[...], ob_ref[...])                         # fused per-layer LN
        o_ref[...] = y


def ffn_block(x, g, b, w1, b1, w2, b2, res_scale, out_ln_g=None, out_ln_b=None):
    M, D = x.shape
    Dff = w1.shape[1]
    tm = _row_tile(M)
    tf = _col_tile(Dff)
    final_ln = out_ln_g is not None

    args = [x, g.reshape(1, D), b.reshape(1, D), w1, b1.reshape(1, Dff), w2, b2.reshape(1, D)]
    in_specs = [
        pl.BlockSpec((tm, D), lambda i, j: (i, 0)),
        _const_spec((1, D), lambda i, j: (0, 0)),
        _const_spec((1, D), lambda i, j: (0, 0)),
        pl.BlockSpec((D, tf), lambda i, j: (0, j)),
        pl.BlockSpec((1, tf), lambda i, j: (0, j)),
        pl.BlockSpec((tf, D), lambda i, j: (j, 0)),
        _const_spec((1, D), lambda i, j: (0, 0)),
    ]
    if final_ln:
        args += [out_ln_g.reshape(1, D), out_ln_b.reshape(1, D)]
        in_specs += [_const_spec((1, D), lambda i, j: (0, 0)),
                     _const_spec((1, D), lambda i, j: (0, 0))]

    return pl.pallas_call(
        partial(_ffn_kernel, res_scale=res_scale, final_ln=final_ln),
        out_shape=jax.ShapeDtypeStruct((M, D), jnp.float32),
        grid=(M // tm, Dff // tf),
        in_specs=in_specs,
        out_specs=pl.BlockSpec((tm, D), lambda i, j: (i, 0)),
        scratch_shapes=[pltpu.VMEM((tm, D), jnp.bfloat16),
                        pltpu.VMEM((tm, D), jnp.float32)],
        compiler_params=_cparams("parallel", "arbitrary"),
    )(*args)


def _ln_matmul_kernel(x_ref, g_ref, b_ref, w_ref, bias_ref, o_ref):
    h = _ln(x_ref[...], g_ref[...], b_ref[...])
    y = jnp.dot(h.astype(jnp.bfloat16), w_ref[...],
                preferred_element_type=jnp.float32) + bias_ref[...]
    o_ref[...] = y.astype(o_ref.dtype)


def ln_matmul(x, g, b, w, bias, out_dtype=jnp.float32):
    M, D = x.shape
    N = w.shape[1]
    tm = _row_tile(M)
    return pl.pallas_call(
        _ln_matmul_kernel,
        out_shape=jax.ShapeDtypeStruct((M, N), out_dtype),
        grid=(M // tm,),
        in_specs=[
            pl.BlockSpec((tm, D), lambda i: (i, 0)),
            _const_spec((1, D), lambda i: (0, 0)),
            _const_spec((1, D), lambda i: (0, 0)),
            _const_spec((D, N), lambda i: (0, 0)),
            _const_spec((1, N), lambda i: (0, 0)),
        ],
        out_specs=pl.BlockSpec((tm, N), lambda i: (i, 0)),
        compiler_params=_cparams("parallel"),
    )(x, g.reshape(1, D), b.reshape(1, D), w, bias.reshape(1, N))


def _ln_matmul_glu_kernel(x_ref, g_ref, b_ref, wa_ref, ba_ref, wb_ref, bb_ref, o_ref):
    hln = _ln(x_ref[...], g_ref[...], b_ref[...]).astype(jnp.bfloat16)
    a = jnp.dot(hln, wa_ref[...], preferred_element_type=jnp.float32) + ba_ref[...]
    gate = jnp.dot(hln, wb_ref[...], preferred_element_type=jnp.float32) + bb_ref[...]
    o_ref[...] = a * jax.nn.sigmoid(gate)     # GLU via two lane-aligned matmuls


def ln_matmul_glu(x, g, b, wa, ba, wb, bb):
    M, D = x.shape
    N = wa.shape[1]
    tm = _row_tile(M)
    return pl.pallas_call(
        _ln_matmul_glu_kernel,
        out_shape=jax.ShapeDtypeStruct((M, N), jnp.float32),
        grid=(M // tm,),
        in_specs=[
            pl.BlockSpec((tm, D), lambda i: (i, 0)),
            _const_spec((1, D), lambda i: (0, 0)),
            _const_spec((1, D), lambda i: (0, 0)),
            _const_spec((D, N), lambda i: (0, 0)),
            _const_spec((1, N), lambda i: (0, 0)),
            _const_spec((D, N), lambda i: (0, 0)),
            _const_spec((1, N), lambda i: (0, 0)),
        ],
        out_specs=pl.BlockSpec((tm, N), lambda i: (i, 0)),
        compiler_params=_cparams("parallel"),
    )(x, g.reshape(1, D), b.reshape(1, D), wa, ba.reshape(1, N), wb, bb.reshape(1, N))


def _bn_swish_proj_kernel(res_ref, h_ref, s_ref, t_ref, w_ref, b_ref, o_ref):
    h = h_ref[...] * s_ref[...] + t_ref[...]          # folded BatchNorm affine
    h = h * jax.nn.sigmoid(h)                         # swish
    y = jnp.dot(h.astype(jnp.bfloat16), w_ref[...], preferred_element_type=jnp.float32)
    o_ref[...] = res_ref[...] + y + b_ref[...]


def bn_swish_proj_residual(res, h, scale, shift, w, b):
    M, D = res.shape
    N = w.shape[1]
    tm = _row_tile(M)
    return pl.pallas_call(
        _bn_swish_proj_kernel,
        out_shape=jax.ShapeDtypeStruct((M, N), jnp.float32),
        grid=(M // tm,),
        in_specs=[
            pl.BlockSpec((tm, D), lambda i: (i, 0)),
            pl.BlockSpec((tm, D), lambda i: (i, 0)),
            _const_spec((1, D), lambda i: (0, 0)),
            _const_spec((1, D), lambda i: (0, 0)),
            _const_spec((D, N), lambda i: (0, 0)),
            _const_spec((1, N), lambda i: (0, 0)),
        ],
        out_specs=pl.BlockSpec((tm, N), lambda i: (i, 0)),
        compiler_params=_cparams("parallel"),
    )(res, h, scale.reshape(1, D), shift.reshape(1, D), w, b.reshape(1, N))


def _layernorm_kernel(x_ref, g_ref, b_ref, o_ref):
    o_ref[...] = _ln(x_ref[...], g_ref[...], b_ref[...])


def layernorm(x, g, b):
    M, D = x.shape
    tm = _row_tile(M)
    return pl.pallas_call(
        _layernorm_kernel,
        out_shape=jax.ShapeDtypeStruct((M, D), jnp.float32),
        grid=(M // tm,),
        in_specs=[
            pl.BlockSpec((tm, D), lambda i: (i, 0)),
            _const_spec((1, D), lambda i: (0, 0)),
            _const_spec((1, D), lambda i: (0, 0)),
        ],
        out_specs=pl.BlockSpec((tm, D), lambda i: (i, 0)),
        compiler_params=_cparams("parallel"),
    )(x, g.reshape(1, D), b.reshape(1, D))


def _linear_kernel(x_ref, w_ref, b_ref, o_ref):
    o_ref[...] = jnp.dot(x_ref[...].astype(jnp.bfloat16), w_ref[...],
                         preferred_element_type=jnp.float32) + b_ref[...]


def linear(x, w, b):
    M, K = x.shape
    N = w.shape[1]
    tm = _row_tile(M)
    return pl.pallas_call(
        _linear_kernel,
        out_shape=jax.ShapeDtypeStruct((M, N), jnp.float32),
        grid=(M // tm,),
        in_specs=[
            pl.BlockSpec((tm, K), lambda i: (i, 0)),
            _const_spec((K, N), lambda i: (0, 0)),
            _const_spec((1, N), lambda i: (0, 0)),
        ],
        out_specs=pl.BlockSpec((tm, N), lambda i: (i, 0)),
        compiler_params=_cparams("parallel"),
    )(x, w, b.reshape(1, N))


# ------------------ relative-position MHSA (fused W_o projection + residual) ------------------

def _rel_mhsa_kernel(res_ref, q_ref, k_ref, v_ref, prow_ref, pb_ref, m_ref,
                     wo_ref, bo_ref, o_ref, a_ref, *, scale):
    h_idx = pl.program_id(1)

    q = q_ref[...]                                    # (T, Dh) bf16 (pos_u folded into Q bias)
    qf = q.astype(jnp.float32)
    pb = pb_ref[...]                                  # (1, Dh) f32 = pos_v - pos_u

    # content-content term ("AC") on the MXU (contract over Dh, no materialized transpose)
    ac = jax.lax.dot_general(q, k_ref[...], (((1,), (1,)), ((), ())),
                             preferred_element_type=jnp.float32)         # (T, T)

    # content-position term ("BD"): matmul against the reversed/zero-padded rel-pos projection,
    # then the Transformer-XL rel-shift via a per-row strided lane rotate (XLU).
    c = jax.lax.dot_general((qf + pb).astype(jnp.bfloat16), prow_ref[...],
                            (((1,), (1,)), ((), ())),
                            preferred_element_type=jnp.float32)          # (T, Lp)
    T = c.shape[0]
    Lp = c.shape[1]
    bd = pltpu.roll(c, shift=Lp - T, axis=1, stride=1, stride_axis=0)[:, :T]

    scores = (ac + bd) * scale
    scores = jnp.where(m_ref[...] > 0.5, scores, jnp.float32(-1e9))      # mask padded keys
    smax = jnp.max(scores, axis=-1, keepdims=True)
    e = jnp.exp(scores - smax)
    attn = e * pl.reciprocal(jnp.sum(e, axis=-1, keepdims=True), approx=False)
    a_ref[...] = attn

    ctx = jnp.dot(attn.astype(jnp.bfloat16), v_ref[...],
                  preferred_element_type=jnp.float32)                    # (T, Dh)

    @pl.when(h_idx == 0)
    def _():
        o_ref[...] = res_ref[...] + bo_ref[...]                          # residual + W_o bias

    # accumulate this head's output-projection contribution into the lane-dense (T, D) block
    o_ref[...] += jnp.dot(ctx.astype(jnp.bfloat16), wo_ref[...],
                          preferred_element_type=jnp.float32)


def rel_mhsa(x_res, q, k, v, prow, pos_bias, mask_f, wo_heads, bo):
    """x_res: (B,T,D) f32; q,k,v: (B,H,T,Dh) bf16; prow: (H,Lp,Dh) bf16;
       pos_bias: (H,1,Dh) f32; mask_f: (B,1,T) f32; wo_heads: (H,Dh,D) bf16; bo: (D,) f32."""
    B, H, T, Dh = q.shape
    D = x_res.shape[-1]
    Lp = prow.shape[1]
    scale = 1.0 / math.sqrt(Dh)
    # TODO(synk): for very long sequences (T*T*4 bytes per head approaching VMEM) add query-row
    # tiling with an online-softmax accumulator; not needed at typical encoder lengths.
    return pl.pallas_call(
        partial(_rel_mhsa_kernel, scale=scale),
        out_shape=(jax.ShapeDtypeStruct((B, T, D), jnp.float32),
                   jax.ShapeDtypeStruct((B, H, T, T), jnp.float32)),
        grid=(B, H),
        in_specs=[
            pl.BlockSpec((None, T, D), lambda b, h: (b, 0, 0)),             # residual
            pl.BlockSpec((None, None, T, Dh), lambda b, h: (b, h, 0, 0)),   # q
            pl.BlockSpec((None, None, T, Dh), lambda b, h: (b, h, 0, 0)),   # k
            pl.BlockSpec((None, None, T, Dh), lambda b, h: (b, h, 0, 0)),   # v
            pl.BlockSpec((None, Lp, Dh), lambda b, h: (h, 0, 0)),           # rel-pos rows
            pl.BlockSpec((None, 1, Dh), lambda b, h: (h, 0, 0)),            # pos_v - pos_u
            pl.BlockSpec((None, 1, T), lambda b, h: (b, 0, 0)),             # key mask
            pl.BlockSpec((None, Dh, D), lambda b, h: (h, 0, 0)),            # W_o head slab
            _const_spec((1, D), lambda b, h: (0, 0)),                       # W_o bias
        ],
        out_specs=(pl.BlockSpec((None, T, D), lambda b, h: (b, 0, 0)),      # accumulated ctx
                   pl.BlockSpec((None, None, T, T), lambda b, h: (b, h, 0, 0))),
        compiler_params=_cparams("parallel", "arbitrary"),
    )(x_res, q, k, v, prow, pos_bias, mask_f, wo_heads, bo.reshape(1, D))


# ----------------------------- depthwise conv (+ BN partial stats) -----------------------------

def _dwconv_kernel(xp_ref, w_ref, b_ref, o_ref, s1_ref, s2_ref, *, T, K, Tp8):
    xp = xp_ref[...]                      # (Tp8, D) zero-padded time axis
    w = w_ref[...]                        # (K, D)
    acc = xp[0:T, :] * w[0:1, :]
    for kk in range(1, K):                # static unroll; shift via XLU roll (aligned slice after)
        shifted = pltpu.roll(xp, shift=(Tp8 - kk) % Tp8, axis=0)   # row t -> xp[t + kk]
        acc = acc + shifted[0:T, :] * w[kk:kk + 1, :]
    y = acc + b_ref[...]
    o_ref[...] = y
    s1_ref[...] = jnp.sum(y, axis=0, keepdims=True)        # BN partial sums (per batch element)
    s2_ref[...] = jnp.sum(y * y, axis=0, keepdims=True)


def depthwise_conv1d_stats(x, w, b):
    """'same' depthwise conv along time + per-batch BN partial stats. x:(B,T,D) w:(K,D) b:(D,)."""
    B, T, D = x.shape
    K = w.shape[0]
    pad = K // 2
    Tp8 = ((T + K - 1 + 7) // 8) * 8
    xp = jnp.pad(x, ((0, 0), (pad, Tp8 - T - pad), (0, 0)))
    return pl.pallas_call(
        partial(_dwconv_kernel, T=T, K=K, Tp8=Tp8),
        out_shape=(jax.ShapeDtypeStruct((B, T, D), jnp.float32),
                   jax.ShapeDtypeStruct((B, 1, D), jnp.float32),
                   jax.ShapeDtypeStruct((B, 1, D), jnp.float32)),
        grid=(B,),
        in_specs=[
            pl.BlockSpec((None, Tp8, D), lambda i: (i, 0, 0)),
            _const_spec((K, D), lambda i: (0, 0)),
            _const_spec((1, D), lambda i: (0, 0)),
        ],
        out_specs=(pl.BlockSpec((None, T, D), lambda i: (i, 0, 0)),
                   pl.BlockSpec((None, 1, D), lambda i: (i, 0, 0)),
                   pl.BlockSpec((None, 1, D), lambda i: (i, 0, 0))),
        compiler_params=_cparams("parallel"),
    )(xp, w, b.reshape(1, D))


# ------------------------------- model glue -------------------------------

def sinusoidal_pe(positions, D):
    inv = jnp.exp(-math.log(10000.0) * jnp.arange(0, D, 2, dtype=jnp.float32) / D)
    ang = positions[:, None] * inv[None, :]
    return jnp.stack([jnp.sin(ang), jnp.cos(ang)], axis=-1).reshape(positions.shape[0], D)


def conformer_layer(x2, pe, mask_f3, p, B, T, H):
    D = x2.shape[-1]
    Dh = D // H

    # --- macaron feed-forward #1 (LN -> W1+SiLU -> W2 -> 0.5*residual, Dff-tiled) ---
    x2 = ffn_block(x2, p["ffn1_ln_g"], p["ffn1_ln_b"],
                   p["ffn1_w1"], p["ffn1_b1"], p["ffn1_w2"], p["ffn1_b2"], 0.5)
    # TODO(synk): dropout omitted (identity / inference semantics)

    # --- relative-position multi-head self-attention ---
    qkv = ln_matmul(x2, p["mha_ln_g"], p["mha_ln_b"], p["wqkv"], p["bqkv"],
                    out_dtype=jnp.bfloat16)                                   # (M, 3D)
    # TODO(synk): the (B,T,3,H,Dh)->(3,B,H,T,Dh) transpose is one extra HBM round-trip of the
    # bf16 qkv per layer; kept in JAX because per-head lane blocking of a packed (B,T,3D) array
    # is not (8,128)-legal at small Dh.
    qkv = qkv.reshape(B, T, 3, H, Dh).transpose(2, 0, 3, 1, 4)                # (3,B,H,T,Dh)
    q, k, v = qkv[0], qkv[1], qkv[2]

    p_proj = linear(pe, p["wpos"], p["wpos_b"])                               # (2T-1, D)
    # Reversed, zero-padded positional rows so that bd[i, j] = (q_i + pos_v) . prow[j + T - i]
    # == rel-pos embedding for distance (i - j).
    Lp = pl.cdiv(2 * T, 128) * 128
    prow = jnp.zeros((Lp, D), jnp.float32).at[1:2 * T].set(p_proj[::-1])
    prow = prow.reshape(Lp, H, Dh).transpose(1, 0, 2).astype(jnp.bfloat16)    # (H, Lp, Dh)

    x3, attn = rel_mhsa(x2.reshape(B, T, D), q, k, v, prow, p["pos_bias"], mask_f3,
                        p["wo_heads"], p["bo"])
    x2 = x3.reshape(B * T, D)
    # TODO(synk): padded query rows are not masked (only keys), matching the previous version.

    # --- convolution module ---
    h = ln_matmul_glu(x2, p["conv_ln_g"], p["conv_ln_b"],
                      p["pw1_wa"], p["pw1_ba"], p["pw1_wb"], p["pw1_bb"])     # (M, D)
    h3, s1, s2 = depthwise_conv1d_stats(h.reshape(B, T, D), p["dw_w"], p["dw_b"])
    n = B * T
    mu = jnp.sum(s1, axis=(0, 1)) / n
    var = jnp.maximum(jnp.sum(s2, axis=(0, 1)) / n - mu * mu, 0.0)
    # TODO(synk): BatchNorm training-mode batch statistics include padded frames and running
    # buffers are not updated (matches previous version).
    bn_s = p["bn_g"] * jax.lax.rsqrt(var + EPS_BN)
    bn_t = p["bn_b"] - mu * bn_s
    x2 = bn_swish_proj_residual(x2, h3.reshape(B * T, D), bn_s, bn_t,
                                p["pw2_w"], p["pw2_b"])

    # --- macaron feed-forward #2 with the per-layer final LayerNorm fused into the epilogue ---
    x2 = ffn_block(x2, p["ffn2_ln_g"], p["ffn2_ln_b"],
                   p["ffn2_w1"], p["ffn2_b1"], p["ffn2_w2"], p["ffn2_b2"], 0.5,
                   out_ln_g=p["final_ln_g"], out_ln_b=p["final_ln_b"])
    return x2, attn


def denceformer_forward(src, mask, params, *, heads, iter_loss, vocab_size):
    B, T, D = src.shape
    # RelativePositionalEncoder: x * xscale (xscale=1), dropout identity;
    # pe covers relative distances -(T-1)..(T-1).
    # TODO(synk): DWA_modules is instantiated in __init__ but never used in forward; omitted.
    x = src * 1.0
    pe = sinusoidal_pe(jnp.arange(-(T - 1), T, dtype=jnp.float32), D)      # (2T-1, D)
    mask_f3 = mask.astype(jnp.float32).reshape(B, 1, T)
    x2 = x.reshape(B * T, D)

    attns, iter_preds = [], []
    i_iter = 0
    for i, p in enumerate(params["layers"]):
        x2, attn = conformer_layer(x2, pe, mask_f3, p, B, T, heads)
        if i in iter_loss:
            hp = params["iter_heads"][i_iter]
            iter_preds.append(
                linear(x2, hp["w"], hp["b"])[:, :vocab_size].reshape(B, T, vocab_size))
            i_iter += 1
        attns.append(attn)

    x_out = layernorm(x2, params["top"]["norm_g"], params["top"]["norm_b"]).reshape(B, T, D)
    attns_enc = jnp.stack(attns, axis=1)      # (B, N, heads, T, T)
    return x_out, attns_enc, iter_preds


# ----------------------- one-time parameter packing (bf16 cast / concat / fold) -----------------------

def prepare_params(params, H):
    bf = jnp.bfloat16
    layers = []
    for p in params["layers"]:
        D = p["wq"].shape[0]
        Dh = D // H
        q_bias = p["bq"] + p["pos_u"].reshape(D)        # fold pos_u into the Q projection bias
        layers.append(dict(
            ffn1_ln_g=p["ffn1_ln_g"], ffn1_ln_b=p["ffn1_ln_b"],
            ffn1_w1=p["ffn1_w1"].astype(bf), ffn1_b1=p["ffn1_b1"],
            ffn1_w2=p["ffn1_w2"].astype(bf), ffn1_b2=p["ffn1_b2"],
            mha_ln_g=p["mha_ln_g"], mha_ln_b=p["mha_ln_b"],
            wqkv=jnp.concatenate([p["wq"], p["wk"], p["wv"]], axis=1).astype(bf),
            bqkv=jnp.concatenate([q_bias, p["bk"], p["bv"]], axis=0),
            wpos=p["wpos"].astype(bf), wpos_b=jnp.zeros((D,), jnp.float32),
            pos_bias=(p["pos_v"] - p["pos_u"]).reshape(H, 1, Dh).astype(jnp.float32),
            wo_heads=p["wo"].reshape(H, Dh, D).astype(bf), bo=p["bo"],
            conv_ln_g=p["conv_ln_g"], conv_ln_b=p["conv_ln_b"],
            pw1_wa=p["pw1_w"][:, :D].astype(bf), pw1_ba=p["pw1_b"][:D],
            pw1_wb=p["pw1_w"][:, D:].astype(bf), pw1_bb=p["pw1_b"][D:],
            dw_w=p["dw_w"], dw_b=p["dw_b"],
            bn_g=p["bn_g"], bn_b=p["bn_b"],
            pw2_w=p["pw2_w"].astype(bf), pw2_b=p["pw2_b"],
            ffn2_ln_g=p["ffn2_ln_g"], ffn2_ln_b=p["ffn2_ln_b"],
            ffn2_w1=p["ffn2_w1"].astype(bf), ffn2_b1=p["ffn2_b1"],
            ffn2_w2=p["ffn2_w2"].astype(bf), ffn2_b2=p["ffn2_b2"],
            final_ln_g=p["final_ln_g"], final_ln_b=p["final_ln_b"],
        ))
    iter_heads = []
    for hp in params["iter_heads"]:
        D, V = hp["w"].shape
        Vp = pl.cdiv(V, 128) * 128            # lane-dense padded vocab output
        wpad = jnp.zeros((D, Vp), jnp.float32).at[:, :V].set(hp["w"]).astype(bf)
        bpad = jnp.zeros((Vp,), jnp.float32).at[:V].set(hp["b"])
        iter_heads.append(dict(w=wpad, b=bpad))
    return dict(layers=layers, iter_heads=iter_heads, top=params["top"])


def init_params(key, D, H, Kc, V, N_layers, iter_loss):
    Dh = D // H
    keys = iter(jax.random.split(key, 512))

    def w(shape, scale=0.05):
        return scale * jax.random.normal(next(keys), shape, jnp.float32)

    zeros = lambda s: jnp.zeros(s, jnp.float32)
    ones = lambda s: jnp.ones(s, jnp.float32)

    layers = []
    for _ in range(N_layers):
        layers.append(dict(
            ffn1_ln_g=ones((D,)), ffn1_ln_b=zeros((D,)),
            ffn1_w1=w((D, 4 * D)), ffn1_b1=zeros((4 * D,)),
            ffn1_w2=w((4 * D, D)), ffn1_b2=zeros((D,)),
            mha_ln_g=ones((D,)), mha_ln_b=zeros((D,)),
            wq=w((D, D)), bq=zeros((D,)),
            wk=w((D, D)), bk=zeros((D,)),
            wv=w((D, D)), bv=zeros((D,)),
            wo=w((D, D)), bo=zeros((D,)),
            wpos=w((D, D)),
            pos_u=w((H, Dh)), pos_v=w((H, Dh)),
            conv_ln_g=ones((D,)), conv_ln_b=zeros((D,)),
            pw1_w=w((D, 2 * D)), pw1_b=zeros((2 * D,)),
            dw_w=w((Kc, D)), dw_b=zeros((D,)),
            bn_g=ones((D,)), bn_b=zeros((D,)),
            pw2_w=w((D, D)), pw2_b=zeros((D,)),
            ffn2_ln_g=ones((D,)), ffn2_ln_b=zeros((D,)),
            ffn2_w1=w((D, 4 * D)), ffn2_b1=zeros((4 * D,)),
            ffn2_w2=w((4 * D, D)), ffn2_b2=zeros((D,)),
            final_ln_g=ones((D,)), final_ln_b=zeros((D,)),
        ))
    iter_heads = [dict(w=w((D, V)), b=zeros((V,))) for _ in iter_loss]
    top = dict(norm_g=ones((D,)), norm_b=zeros((D,)))
    return dict(layers=layers, iter_heads=iter_heads, top=top)


if __name__ == "__main__":
    B, T, D, H = 2, 16, 32, 4          # batch, seq, d_model_e, heads
    N_LAYERS, VOCAB, KCONV = 2, 11, 7  # N_e, vocab_size, depthwise conv kernel
    ITER_LOSS = (0,)                   # hp.iter_loss

    key = jax.random.PRNGKey(0)
    k_src, k_par = jax.random.split(key)
    src = jax.random.normal(k_src, (B, T, D), jnp.float32)
    mask = jnp.ones((B, T), jnp.float32).at[1, -3:].set(0.0)  # batch 1 has 3 padded frames
    raw_params = init_params(k_par, D, H, KCONV, VOCAB, N_LAYERS, ITER_LOSS)
    params = prepare_params(raw_params, H)   # one-time bf16 cast / pack (not per forward step)

    fwd = jax.jit(partial(denceformer_forward, heads=H, iter_loss=ITER_LOSS,
                          vocab_size=VOCAB))
    x_out, attns_enc, iter_preds = fwd(src, mask, params)
    jax.block_until_ready((x_out, attns_enc, iter_preds))

    assert x_out.shape == (B, T, D)
    assert attns_enc.shape == (B, N_LAYERS, H, T, T)
    assert len(iter_preds) == len(ITER_LOSS) and iter_preds[0].shape == (B, T, VOCAB)
    assert bool(jnp.isfinite(x_out).all()) and bool(jnp.isfinite(attns_enc).all())
    # attention rows of the fully-valid batch element must be (exactly) normalized
    assert bool(jnp.allclose(attns_enc[0].sum(-1), 1.0, atol=1e-3))
    print("KERNEL_OK")
</pallas_src>

<mosaic_0001>
module attributes {stable_mosaic.version = 11 : i64} {
  func.func @_k(%arg0: i32, %arg1: memref<8x128xf32, #tpu.memory_space<vmem>>, %arg2: memref<8x128xf32, #tpu.memory_space<vmem>>) attributes {dimension_semantics = [#tpu.dimension_semantics<arbitrary>], iteration_bounds = array<i64: 2>, scalar_prefetch = 0 : i64, scratch_operands = 0 : i64, tpu.core_type = #tpu.core_type<tc>, window_params = [{pipeline_mode = #tpu.pipeline_mode<synchronous>, transform_indices = @transform_0, window_bounds = array<i64: 8, 128>}, {transform_indices = @transform_1, window_bounds = array<i64: 8, 128>}]} {
    %c0 = arith.constant 0 : index
    %c0_0 = arith.constant 0 : index
    %0 = vector.load %arg1[%c0, %c0_0] : memref<8x128xf32, #tpu.memory_space<vmem>>, vector<8x128xf32>
    %cst = arith.constant 1.000000e+00 : f32
    %1 = vector.broadcast %cst : f32 to vector<8x128xf32>
    %2 = arith.addf %0, %1 : vector<8x128xf32>
    %c0_1 = arith.constant 0 : index
    %c0_2 = arith.constant 0 : index
    %3 = vector.load %arg2[%c0_1, %c0_2] : memref<8x128xf32, #tpu.memory_space<vmem>>, vector<8x128xf32>
    tpu.vector_store %arg2[%c0_1, %c0_2], %2 {strides = array<i32>} : memref<8x128xf32, #tpu.memory_space<vmem>>, vector<8x128xf32>,
    return
  }
  func.func @transform_0(%arg0: i32) -> (i32, i32) {
    %c0_i32 = arith.constant 0 : i32
    %c0_i32_0 = arith.constant 0 : i32
    %c0_i32_1 = arith.constant 0 : i32
    return %c0_i32, %c0_i32_0 : i32, i32
  }
  func.func @transform_1(%arg0: i32) -> (i32, i32) {
    %c0_i32 = arith.constant 0 : i32
    %c0_i32_0 = arith.constant 0 : i32
    return %arg0, %c0_i32 : i32, i32
  }
}

module attributes {stable_mosaic.version = 11 : i64} {
  func.func @_ln_matmul_kernel(%arg0: i32, %arg1: memref<8x32xf32, #tpu.memory_space<vmem>>, %arg2: memref<1x32xf32, #tpu.memory_space<vmem>>, %arg3: memref<1x32xf32, #tpu.memory_space<vmem>>, %arg4: memref<32x96xbf16, #tpu.memory_space<vmem>>, %arg5: memref<1x96xf32, #tpu.memory_space<vmem>>, %arg6: memref<8x96xbf16, #tpu.memory_space<vmem>>) attributes {dimension_semantics = [#tpu.dimension_semantics<parallel>], iteration_bounds = array<i64: 4>, scalar_prefetch = 0 : i64, scratch_operands = 0 : i64, tpu.core_type = #tpu.core_type<tc>, window_params = [{transform_indices = @transform_0, window_bounds = array<i64: 8, 32>}, {pipeline_mode = #tpu.pipeline_mode<synchronous>, transform_indices = @transform_1, window_bounds = array<i64: 1, 32>}, {pipeline_mode = #tpu.pipeline_mode<synchronous>, transform_indices = @transform_2, window_bounds = array<i64: 1, 32>}, {pipeline_mode = #tpu.pipeline_mode<synchronous>, transform_indices = @transform_3, window_bounds = array<i64: 32, 96>}, {pipeline_mode = #tpu.pipeline_mode<synchronous>, transform_indices = @transform_4, window_bounds = array<i64: 1, 96>}, {transform_indices = @transform_5, window_bounds = array<i64: 8, 96>}]} {
    %c0 = arith.constant 0 : index
    %c0_0 = arith.constant 0 : index
    %0 = vector.load %arg1[%c0, %c0_0] : memref<8x32xf32, #tpu.memory_space<vmem>>, vector<8x32xf32>
    %c0_1 = arith.constant 0 : index
    %c0_2 = arith.constant 0 : index
    %1 = vector.load %arg2[%c0_1, %c0_2] : memref<1x32xf32, #tpu.memory_space<vmem>>, vector<1x32xf32>
    %c0_3 = arith.constant 0 : index
    %c0_4 = arith.constant 0 : index
    %2 = vector.load %arg3[%c0_3, %c0_4] : memref<1x32xf32, #tpu.memory_space<vmem>>, vector<1x32xf32>
    %cst = arith.constant dense<0.000000e+00> : vector<8xf32>
    %3 = vector.multi_reduction <add>, %0, %cst [1] : vector<8x32xf32> to vector<8xf32>
    %4 = vector.shape_cast %3 : vector<8xf32> to vector<8x1xf32>
    %cst_5 = arith.constant 3.200000e+01 : f32
    %5 = vector.broadcast %cst_5 : f32 to vector<8x1xf32>
    %6 = arith.divf %4, %5 : vector<8x1xf32>
    %7 = vector.broadcast %6 : vector<8x1xf32> to vector<8x32xf32>
    %8 = arith.subf %0, %7 : vector<8x32xf32>
    %9 = arith.mulf %8, %8 : vector<8x32xf32>
    %cst_6 = arith.constant dense<0.000000e+00> : vector<8xf32>
    %10 = vector.multi_reduction <add>, %9, %cst_6 [1] : vector<8x32xf32> to vector<8xf32>
    %11 = vector.shape_cast %10 : vector<8xf32> to vector<8x1xf32>
    %cst_7 = arith.constant 3.200000e+01 : f32
    %12 = vector.broadcast %cst_7 : f32 to vector<8x1xf32>
    %13 = arith.divf %11, %12 : vector<8x1xf32>
    %cst_8 = arith.constant 9.99999974E-6 : f32
    %14 = vector.broadcast %cst_8 : f32 to vector<8x1xf32>
    %15 = arith.addf %13, %14 : vector<8x1xf32>
    %16 = math.rsqrt %15 : vector<8x1xf32>
    %17 = vector.broadcast %16 : vector<8x1xf32> to vector<8x32xf32>
    %18 = arith.mulf %8, %17 : vector<8x32xf32>
    %19 = vector.broadcast %1 : vector<1x32xf32> to vector<8x32xf32>
    %20 = arith.mulf %18, %19 : vector<8x32xf32>
    %21 = vector.broadcast %2 : vector<1x32xf32> to vector<8x32xf32>
    %22 = arith.addf %20, %21 : vector<8x32xf32>
    %23 = arith.truncf %22 : vector<8x32xf32> to vector<8x32xbf16>
    %c0_9 = arith.constant 0 : index
    %c0_10 = arith.constant 0 : index
    %24 = vector.load %arg4[%c0_9, %c0_10] : memref<32x96xbf16, #tpu.memory_space<vmem>>, vector<32x96xbf16>
    %cst_11 = arith.constant dense<0.000000e+00> : vector<8x96xf32>
    %25 = tpu.matmul %23, %24, %cst_11 {dimension_numbers = #tpu.dot_dimension_numbers<[1], [0], [0], [1], [0, 0, 1, 1], [], []>} : vector<8x32xbf16>, vector<32x96xbf16>, vector<8x96xf32> -> vector<8x96xf32>
    %c0_12 = arith.constant 0 : index
    %c0_13 = arith.constant 0 : index
    %26 = vector.load %arg5[%c0_12, %c0_13] : memref<1x96xf32, #tpu.memory_space<vmem>>, vector<1x96xf32>
    %27 = vector.broadcast %26 : vector<1x96xf32> to vector<8x96xf32>
    %28 = arith.addf %25, %27 : vector<8x96xf32>
    %29 = arith.truncf %28 : vector<8x96xf32> to vector<8x96xbf16>
    %c0_14 = arith.constant 0 : index
    %c0_15 = arith.constant 0 : index
    %30 = vector.load %arg6[%c0_14, %c0_15] : memref<8x96xbf16, #tpu.memory_space<vmem>>, vector<8x96xbf16>
    tpu.vector_store %arg6[%c0_14, %c0_15], %29 {strides = array<i32>} : memref<8x96xbf16, #tpu.memory_space<vmem>>, vector<8x96xbf16>,
    return
  }
  func.func @transform_0(%arg0: i32) -> (i32, i32) {
    %c0_i32 = arith.constant 0 : i32
    %c0_i32_0 = arith.constant 0 : i32
    return %arg0, %c0_i32 : i32, i32
  }
  func.func @transform_1(%arg0: i32) -> (i32, i32) {
    %c0_i32 = arith.constant 0 : i32
    %c0_i32_0 = arith.constant 0 : i32
    %c0_i32_1 = arith.constant 0 : i32
    return %c0_i32, %c0_i32_0 : i32, i32
  }
  func.func @transform_2(%arg0: i32) -> (i32, i32) {
    %c0_i32 = arith.constant 0 : i32
    %c0_i32_0 = arith.constant 0 : i32
    %c0_i32_1 = arith.constant 0 : i32
    return %c0_i32, %c0_i32_0 : i32, i32
  }
  func.func @transform_3(%arg0: i32) -> (i32, i32) {
    %c0_i32 = arith.constant 0 : i32
    %c0_i32_0 = arith.constant 0 : i32
    %c0_i32_1 = arith.constant 0 : i32
    return %c0_i32, %c0_i32_0 : i32, i32
  }
  func.func @transform_4(%arg0: i32) -> (i32, i32) {
    %c0_i32 = arith.constant 0 : i32
    %c0_i32_0 = arith.constant 0 : i32
    %c0_i32_1 = arith.constant 0 : i32
    return %c0_i32, %c0_i32_0 : i32, i32
  }
  func.func @transform_5(%arg0: i32) -> (i32, i32) {
    %c0_i32 = arith.constant 0 : i32
    %c0_i32_0 = arith.constant 0 : i32
    return %arg0, %c0_i32 : i32, i32
  }
}

module attributes {stable_mosaic.version = 11 : i64} {
  func.func @_ffn_kernel(%arg0: i32, %arg1: i32, %arg2: memref<8x32xf32, #tpu.memory_space<vmem>>, %arg3: memref<1x32xf32, #tpu.memory_space<vmem>>, %arg4: memref<1x32xf32, #tpu.memory_space<vmem>>, %arg5: memref<32x128xbf16, #tpu.memory_space<vmem>>, %arg6: memref<1x128xf32, #tpu.memory_space<vmem>>, %arg7: memref<128x32xbf16, #tpu.memory_space<vmem>>, %arg8: memref<1x32xf32, #tpu.memory_space<vmem>>, %arg9: memref<8x32xf32, #tpu.memory_space<vmem>>, %arg10: memref<8x32xbf16, #tpu.memory_space<vmem>>, %arg11: memref<8x32xf32, #tpu.memory_space<vmem>>) attributes {dimension_semantics = [#tpu.dimension_semantics<parallel>, #tpu.dimension_semantics<arbitrary>], iteration_bounds = array<i64: 4, 1>, scalar_prefetch = 0 : i64, scratch_operands = 2 : i64, tpu.core_type = #tpu.core_type<tc>, window_params = [{transform_indices = @transform_0, window_bounds = array<i64: 8, 32>}, {pipeline_mode = #tpu.pipeline_mode<synchronous>, transform_indices = @transform_1, window_bounds = array<i64: 1, 32>}, {pipeline_mode = #tpu.pipeline_mode<synchronous>, transform_indices = @transform_2, window_bounds = array<i64: 1, 32>}, {transform_indices = @transform_3, window_bounds = array<i64: 32, 128>}, {transform_indices = @transform_4, window_bounds = array<i64: 1, 128>}, {transform_indices = @transform_5, window_bounds = array<i64: 128, 32>}, {pipeline_mode = #tpu.pipeline_mode<synchronous>, transform_indices = @transform_6, window_bounds = array<i64: 1, 32>}, {transform_indices = @transform_7, window_bounds = array<i64: 8, 32>}]} {
    %c0_i32 = arith.constant 0 : i32
    %0 = arith.cmpi eq, %arg1, %c0_i32 : i32
    %1 = arith.extui %0 : i1 to i32
    %c0_i32_0 = arith.constant 0 : i32
    %2 = arith.cmpi ne, %1, %c0_i32_0 : i32
    scf.if %2 {
      %c0_16 = arith.constant 0 : index
      %c0_17 = arith.constant 0 : index
      %24 = vector.load %arg2[%c0_16, %c0_17] : memref<8x32xf32, #tpu.memory_space<vmem>>, vector<8x32xf32>
      %c0_18 = arith.constant 0 : index
      %c0_19 = arith.constant 0 : index
      %25 = vector.load %arg3[%c0_18, %c0_19] : memref<1x32xf32, #tpu.memory_space<vmem>>, vector<1x32xf32>
      %c0_20 = arith.constant 0 : index
      %c0_21 = arith.constant 0 : index
      %26 = vector.load %arg4[%c0_20, %c0_21] : memref<1x32xf32, #tpu.memory_space<vmem>>, vector<1x32xf32>
      %cst_22 = arith.constant dense<0.000000e+00> : vector<8xf32>
      %27 = vector.multi_reduction <add>, %24, %cst_22 [1] : vector<8x32xf32> to vector<8xf32>
      %28 = vector.shape_cast %27 : vector<8xf32> to vector<8x1xf32>
      %cst_23 = arith.constant 3.200000e+01 : f32
      %29 = vector.broadcast %cst_23 : f32 to vector<8x1xf32>
      %30 = arith.divf %28, %29 : vector<8x1xf32>
      %31 = vector.broadcast %30 : vector<8x1xf32> to vector<8x32xf32>
      %32 = arith.subf %24, %31 : vector<8x32xf32>
      %33 = arith.mulf %32, %32 : vector<8x32xf32>
      %cst_24 = arith.constant dense<0.000000e+00> : vector<8xf32>
      %34 = vector.multi_reduction <add>, %33, %cst_24 [1] : vector<8x32xf32> to vector<8xf32>
      %35 = vector.shape_cast %34 : vector<8xf32> to vector<8x1xf32>
      %cst_25 = arith.constant 3.200000e+01 : f32
      %36 = vector.broadcast %cst_25 : f32 to vector<8x1xf32>
      %37 = arith.divf %35, %36 : vector<8x1xf32>
      %cst_26 = arith.constant 9.99999974E-6 : f32
      %38 = vector.broadcast %cst_26 : f32 to vector<8x1xf32>
      %39 = arith.addf %37, %38 : vector<8x1xf32>
      %40 = math.rsqrt %39 : vector<8x1xf32>
      %41 = vector.broadcast %40 : vector<8x1xf32> to vector<8x32xf32>
      %42 = arith.mulf %32, %41 : vector<8x32xf32>
      %43 = vector.broadcast %25 : vector<1x32xf32> to vector<8x32xf32>
      %44 = arith.mulf %42, %43 : vector<8x32xf32>
      %45 = vector.broadcast %26 : vector<1x32xf32> to vector<8x32xf32>
      %46 = arith.addf %44, %45 : vector<8x32xf32>
      %47 = arith.truncf %46 : vector<8x32xf32> to vector<8x32xbf16>
      %c0_27 = arith.constant 0 : index
      %c0_28 = arith.constant 0 : index
      %48 = vector.load %arg10[%c0_27, %c0_28] : memref<8x32xbf16, #tpu.memory_space<vmem>>, vector<8x32xbf16>
      tpu.vector_store %arg10[%c0_27, %c0_28], %47 {strides = array<i32>} : memref<8x32xbf16, #tpu.memory_space<vmem>>, vector<8x32xbf16>,
      %cst_29 = arith.constant 0.000000e+00 : f32
      %49 = vector.broadcast %cst_29 : f32 to vector<8x32xf32>
      %c0_30 = arith.constant 0 : index
      %c0_31 = arith.constant 0 : index
      %50 = vector.load %arg11[%c0_30, %c0_31] : memref<8x32xf32, #tpu.memory_space<vmem>>, vector<8x32xf32>
      tpu.vector_store %arg11[%c0_30, %c0_31], %49 {strides = array<i32>} : memref<8x32xf32, #tpu.memory_space<vmem>>, vector<8x32xf32>,
    } else {
    }
    %c0 = arith.constant 0 : index
    %c0_1 = arith.constant 0 : index
    %3 = vector.load %arg10[%c0, %c0_1] : memref<8x32xbf16, #tpu.memory_space<vmem>>, vector<8x32xbf16>
    %c0_2 = arith.constant 0 : index
    %c0_3 = arith.constant 0 : index
    %4 = vector.load %arg5[%c0_2, %c0_3] : memref<32x128xbf16, #tpu.memory_space<vmem>>, vector<32x128xbf16>
    %cst = arith.constant dense<0.000000e+00> : vector<8x128xf32>
    %5 = tpu.matmul %3, %4, %cst {dimension_numbers = #tpu.dot_dimension_numbers<[1], [0], [0], [1], [0, 0, 1, 1], [], []>} : vector<8x32xbf16>, vector<32x128xbf16>, vector<8x128xf32> -> vector<8x128xf32>
    %c0_4 = arith.constant 0 : index
    %c0_5 = arith.constant 0 : index
    %6 = vector.load %arg6[%c0_4, %c0_5] : memref<1x128xf32, #tpu.memory_space<vmem>>, vector<1x128xf32>
    %7 = vector.broadcast %6 : vector<1x128xf32> to vector<8x128xf32>
    %8 = arith.addf %5, %7 : vector<8x128xf32>
    %9 = arith.negf %8 : vector<8x128xf32>
    %10 = math.exp %9 : vector<8x128xf32>
    %cst_6 = arith.constant 1.000000e+00 : f32
    %11 = vector.broadcast %cst_6 : f32 to vector<8x128xf32>
    %12 = arith.addf %11, %10 : vector<8x128xf32>
    %13 = arith.divf %11, %12 : vector<8x128xf32>
    %14 = arith.mulf %8, %13 : vector<8x128xf32>
    %c0_7 = arith.constant 0 : index
    %c0_8 = arith.constant 0 : index
    %15 = vector.load %arg11[%c0_7, %c0_8] : memref<8x32xf32, #tpu.memory_space<vmem>>, vector<8x32xf32>
    %16 = arith.truncf %14 : vector<8x128xf32> to vector<8x128xbf16>
    %c0_9 = arith.constant 0 : index
    %c0_10 = arith.constant 0 : index
    %17 = vector.load %arg7[%c0_9, %c0_10] : memref<128x32xbf16, #tpu.memory_space<vmem>>, vector<128x32xbf16>
    %cst_11 = arith.constant dense<0.000000e+00> : vector<8x32xf32>
    %18 = tpu.matmul %16, %17, %cst_11 {dimension_numbers = #tpu.dot_dimension_numbers<[1], [0], [0], [1], [0, 0, 1, 1], [], []>} : vector<8x128xbf16>, vector<128x32xbf16>, vector<8x32xf32> -> vector<8x32xf32>
    %19 = arith.addf %15, %18 : vector<8x32xf32>
    %c0_12 = arith.constant 0 : index
    %c0_13 = arith.constant 0 : index
    %20 = vector.load %arg11[%c0_12, %c0_13] : memref<8x32xf32, #tpu.memory_space<vmem>>, vector<8x32xf32>
    tpu.vector_store %arg11[%c0_12, %c0_13], %19 {strides = array<i32>} : memref<8x32xf32, #tpu.memory_space<vmem>>, vector<8x32xf32>,
    %c0_i32_14 = arith.constant 0 : i32
    %21 = arith.cmpi eq, %arg1, %c0_i32_14 : i32
    %22 = arith.extui %21 : i1 to i32
    %c0_i32_15 = arith.constant 0 : i32
    %23 = arith.cmpi ne, %22, %c0_i32_15 : i32
    scf.if %23 {
      %c0_16 = arith.constant 0 : index
      %c0_17 = arith.constant 0 : index
      %24 = vector.load %arg2[%c0_16, %c0_17] : memref<8x32xf32, #tpu.memory_space<vmem>>, vector<8x32xf32>
      %c0_18 = arith.constant 0 : index
      %c0_19 = arith.constant 0 : index
      %25 = vector.load %arg11[%c0_18, %c0_19] : memref<8x32xf32, #tpu.memory_space<vmem>>, vector<8x32xf32>
      %c0_20 = arith.constant 0 : index
      %c0_21 = arith.constant 0 : index
      %26 = vector.load %arg8[%c0_20, %c0_21] : memref<1x32xf32, #tpu.memory_space<vmem>>, vector<1x32xf32>
      %27 = vector.broadcast %26 : vector<1x32xf32> to vector<8x32xf32>
      %28 = arith.addf %25, %27 : vector<8x32xf32>
      %cst_22 = arith.constant 5.000000e-01 : f32
      %29 = vector.broadcast %cst_22 : f32 to vector<8x32xf32>
      %30 = arith.mulf %29, %28 : vector<8x32xf32>
      %31 = arith.addf %24, %30 : vector<8x32xf32>
      %c0_23 = arith.constant 0 : index
      %c0_24 = arith.constant 0 : index
      %32 = vector.load %arg9[%c0_23, %c0_24] : memref<8x32xf32, #tpu.memory_space<vmem>>, vector<8x32xf32>
      tpu.vector_store %arg9[%c0_23, %c0_24], %31 {strides = array<i32>} : memref<8x32xf32, #tpu.memory_space<vmem>>, vector<8x32xf32>,
    } else {
    }
    return
  }
  func.func @transform_0(%arg0: i32, %arg1: i32) -> (i32, i32) {
    %c0_i32 = arith.constant 0 : i32
    %c0_i32_0 = arith.constant 0 : i32
    return %arg0, %c0_i32 : i32, i32
  }
  func.func @transform_1(%arg0: i32, %arg1: i32) -> (i32, i32) {
    %c0_i32 = arith.constant 0 : i32
    %c0_i32_0 = arith.constant 0 : i32
    %c0_i32_1 = arith.constant 0 : i32
    return %c0_i32, %c0_i32_0 : i32, i32
  }
  func.func @transform_2(%arg0: i32, %arg1: i32) -> (i32, i32) {
    %c0_i32 = arith.constant 0 : i32
    %c0_i32_0 = arith.constant 0 : i32
    %c0_i32_1 = arith.constant 0 : i32
    return %c0_i32, %c0_i32_0 : i32, i32
  }
  func.func @transform_3(%arg0: i32, %arg1: i32) -> (i32, i32) {
    %c0_i32 = arith.constant 0 : i32
    %c0_i32_0 = arith.constant 0 : i32
    return %c0_i32, %arg1 : i32, i32
  }
  func.func @transform_4(%arg0: i32, %arg1: i32) -> (i32, i32) {
    %c0_i32 = arith.constant 0 : i32
    %c0_i32_0 = arith.constant 0 : i32
    return %c0_i32, %arg1 : i32, i32
  }
  func.func @transform_5(%arg0: i32, %arg1: i32) -> (i32, i32) {
    %c0_i32 = arith.constant 0 : i32
    %c0_i32_0 = arith.constant 0 : i32
    return %arg1, %c0_i32 : i32, i32
  }
  func.func @transform_6(%arg0: i32, %arg1: i32) -> (i32, i32) {
    %c0_i32 = arith.constant 0 : i32
    %c0_i32_0 = arith.constant 0 : i32
    %c0_i32_1 = arith.constant 0 : i32
    return %c0_i32, %c0_i32_0 : i32, i32
  }
  func.func @transform_7(%arg0: i32, %arg1: i32) -> (i32, i32) {
    %c0_i32 = arith.constant 0 : i32
    %c0_i32_0 = arith.constant 0 : i32
    return %arg0, %c0_i32 : i32, i32
  }
}

module attributes {stable_mosaic.version = 11 : i64} {
  func.func @_linear_kernel(%arg0: i32, %arg1: memref<31x32xf32, #tpu.memory_space<vmem>>, %arg2: memref<32x32xbf16, #tpu.memory_space<vmem>>, %arg3: memref<1x32xf32, #tpu.memory_space<vmem>>, %arg4: memref<31x32xf32, #tpu.memory_space<vmem>>) attributes {dimension_semantics = [#tpu.dimension_semantics<parallel>], iteration_bounds = array<i64: 1>, scalar_prefetch = 0 : i64, scratch_operands = 0 : i64, tpu.core_type = #tpu.core_type<tc>, window_params = [{transform_indices = @transform_0, window_bounds = array<i64: 31, 32>}, {pipeline_mode = #tpu.pipeline_mode<synchronous>, transform_indices = @transform_1, window_bounds = array<i64: 32, 32>}, {pipeline_mode = #tpu.pipeline_mode<synchronous>, transform_indices = @transform_2, window_bounds = array<i64: 1, 32>}, {transform_indices = @transform_3, window_bounds = array<i64: 31, 32>}]} {
    %c0 = arith.constant 0 : index
    %c0_0 = arith.constant 0 : index
    %0 = vector.load %arg1[%c0, %c0_0] : memref<31x32xf32, #tpu.memory_space<vmem>>, vector<31x32xf32>
    %1 = arith.truncf %0 : vector<31x32xf32> to vector<31x32xbf16>
    %c0_1 = arith.constant 0 : index
    %c0_2 = arith.constant 0 : index
    %2 = vector.load %arg2[%c0_1, %c0_2] : memref<32x32xbf16, #tpu.memory_space<vmem>>, vector<32x32xbf16>
    %cst = arith.constant dense<0.000000e+00> : vector<31x32xf32>
    %3 = tpu.matmul %1, %2, %cst {dimension_numbers = #tpu.dot_dimension_numbers<[1], [0], [0], [1], [0, 0, 1, 1], [], []>} : vector<31x32xbf16>, vector<32x32xbf16>, vector<31x32xf32> -> vector<31x32xf32>
    %c0_3 = arith.constant 0 : index
    %c0_4 = arith.constant 0 : index
    %4 = vector.load %arg3[%c0_3, %c0_4] : memref<1x32xf32, #tpu.memory_space<vmem>>, vector<1x32xf32>
    %5 = vector.broadcast %4 : vector<1x32xf32> to vector<31x32xf32>
    %6 = arith.addf %3, %5 : vector<31x32xf32>
    %c0_5 = arith.constant 0 : index
    %c0_6 = arith.constant 0 : index
    %7 = vector.load %arg4[%c0_5, %c0_6] : memref<31x32xf32, #tpu.memory_space<vmem>>, vector<31x32xf32>
    tpu.vector_store %arg4[%c0_5, %c0_6], %6 {strides = array<i32>} : memref<31x32xf32, #tpu.memory_space<vmem>>, vector<31x32xf32>,
    return
  }
  func.func @transform_0(%arg0: i32) -> (i32, i32) {
    %c0_i32 = arith.constant 0 : i32
    %c0_i32_0 = arith.constant 0 : i32
    return %arg0, %c0_i32 : i32, i32
  }
  func.func @transform_1(%arg0: i32) -> (i32, i32) {
    %c0_i32 = arith.constant 0 : i32
    %c0_i32_0 = arith.constant 0 : i32
    %c0_i32_1 = arith.constant 0 : i32
    return %c0_i32, %c0_i32_0 : i32, i32
  }
  func.func @transform_2(%arg0: i32) -> (i32, i32) {
    %c0_i32 = arith.constant 0 : i32
    %c0_i32_0 = arith.constant 0 : i32
    %c0_i32_1 = arith.constant 0 : i32
    return %c0_i32, %c0_i32_0 : i32, i32
  }
  func.func @transform_3(%arg0: i32) -> (i32, i32) {
    %c0_i32 = arith.constant 0 : i32
    %c0_i32_0 = arith.constant 0 : i32
    return %arg0, %c0_i32 : i32, i32
  }
}

module attributes {stable_mosaic.version = 11 : i64} {
  func.func @_rel_mhsa_kernel(%arg0: i32, %arg1: i32, %arg2: memref<1x16x32xf32, #tpu.memory_space<vmem>>, %arg3: memref<1x1x16x8xbf16, #tpu.memory_space<vmem>>, %arg4: memref<1x1x16x8xbf16, #tpu.memory_space<vmem>>, %arg5: memref<1x1x16x8xbf16, #tpu.memory_space<vmem>>, %arg6: memref<1x128x8xbf16, #tpu.memory_space<vmem>>, %arg7: memref<1x1x8xf32, #tpu.memory_space<vmem>>, %arg8: memref<1x1x16xf32, #tpu.memory_space<vmem>>, %arg9: memref<1x8x32xbf16, #tpu.memory_space<vmem>>, %arg10: memref<1x32xf32, #tpu.memory_space<vmem>>, %arg11: memref<1x16x32xf32, #tpu.memory_space<vmem>>, %arg12: memref<1x1x16x16xf32, #tpu.memory_space<vmem>>) attributes {dimension_semantics = [#tpu.dimension_semantics<parallel>, #tpu.dimension_semantics<arbitrary>], iteration_bounds = array<i64: 2, 4>, scalar_prefetch = 0 : i64, scratch_operands = 0 : i64, tpu.core_type = #tpu.core_type<tc>, window_params = [{transform_indices = @transform_0, window_bounds = array<i64: 1, 16, 32>}, {transform_indices = @transform_1, window_bounds = array<i64: 1, 1, 16, 8>}, {transform_indices = @transform_2, window_bounds = array<i64: 1, 1, 16, 8>}, {transform_indices = @transform_3, window_bounds = array<i64: 1, 1, 16, 8>}, {transform_indices = @transform_4, window_bounds = array<i64: 1, 128, 8>}, {transform_indices = @transform_5, window_bounds = array<i64: 1, 1, 8>}, {transform_indices = @transform_6, window_bounds = array<i64: 1, 1, 16>}, {transform_indices = @transform_7, window_bounds = array<i64: 1, 8, 32>}, {pipeline_mode = #tpu.pipeline_mode<synchronous>, transform_indices = @transform_8, window_bounds = array<i64: 1, 32>}, {transform_indices = @transform_9, window_bounds = array<i64: 1, 16, 32>}, {transform_indices = @transform_10, window_bounds = array<i64: 1, 1, 16, 16>}]} {
    %c0 = arith.constant 0 : index
    %c0_0 = arith.constant 0 : index
    %c0_1 = arith.constant 0 : index
    %c0_2 = arith.constant 0 : index
    %0 = vector.load %arg3[%c0, %c0_0, %c0_1, %c0_2] : memref<1x1x16x8xbf16, #tpu.memory_space<vmem>>, vector<1x1x16x8xbf16>
    %1 = vector.shape_cast %0 : vector<1x1x16x8xbf16> to vector<16x8xbf16>
    %2 = arith.extf %1 : vector<16x8xbf16> to vector<16x8xf32>
    %c0_3 = arith.constant 0 : index
    %c0_4 = arith.constant 0 : index
    %c0_5 = arith.constant 0 : index
    %3 = vector.load %arg7[%c0_3, %c0_4, %c0_5] : memref<1x1x8xf32, #tpu.memory_space<vmem>>, vector<1x1x8xf32>
    %4 = vector.shape_cast %3 : vector<1x1x8xf32> to vector<1x8xf32>
    %c0_6 = arith.constant 0 : index
    %c0_7 = arith.constant 0 : index
    %c0_8 = arith.constant 0 : index
    %c0_9 = arith.constant 0 : index
    %5 = vector.load %arg4[%c0_6, %c0_7, %c0_8, %c0_9] : memref<1x1x16x8xbf16, #tpu.memory_space<vmem>>, vector<1x1x16x8xbf16>
    %6 = vector.shape_cast %5 : vector<1x1x16x8xbf16> to vector<16x8xbf16>
    %cst = arith.constant dense<0.000000e+00> : vector<16x16xf32>
    %7 = tpu.matmul %1, %6, %cst {dimension_numbers = #tpu.dot_dimension_numbers<[1], [1], [0], [0], [0, 0, 1, 0], [], []>} : vector<16x8xbf16>, vector<16x8xbf16>, vector<16x16xf32> -> vector<16x16xf32>
    %8 = vector.broadcast %4 : vector<1x8xf32> to vector<16x8xf32>
    %9 = arith.addf %2, %8 : vector<16x8xf32>
    %10 = arith.truncf %9 : vector<16x8xf32> to vector<16x8xbf16>
    %c0_10 = arith.constant 0 : index
    %c0_11 = arith.constant 0 : index
    %c0_12 = arith.constant 0 : index
    %11 = vector.load %arg6[%c0_10, %c0_11, %c0_12] : memref<1x128x8xbf16, #tpu.memory_space<vmem>>, vector<1x128x8xbf16>
    %12 = vector.shape_cast %11 : vector<1x128x8xbf16> to vector<128x8xbf16>
    %cst_13 = arith.constant dense<0.000000e+00> : vector<16x128xf32>
    %13 = tpu.matmul %10, %12, %cst_13 {dimension_numbers = #tpu.dot_dimension_numbers<[1], [1], [0], [0], [0, 0, 1, 0], [], []>} : vector<16x8xbf16>, vector<128x8xbf16>, vector<16x128xf32> -> vector<16x128xf32>
    %c112_i32 = arith.constant 112 : i32
    %14 = tpu.dynamic_rotate %13 by %c112_i32 dim 1 {stride = 1 : si32, stride_dimension = 0 : si32} : vector<16x128xf32>, i32 -> vector<16x128xf32>
    %15 = vector.extract_strided_slice %14 {offsets = [0, 0], sizes = [16, 16], strides = [1, 1]} : vector<16x128xf32> to vector<16x16xf32>
    %16 = arith.addf %7, %15 : vector<16x16xf32>
    %cst_14 = arith.constant 0.353553385 : f32
    %17 = vector.broadcast %cst_14 : f32 to vector<16x16xf32>
    %18 = arith.mulf %16, %17 : vector<16x16xf32>
    %c0_15 = arith.constant 0 : index
    %c0_16 = arith.constant 0 : index
    %c0_17 = arith.constant 0 : index
    %19 = vector.load %arg8[%c0_15, %c0_16, %c0_17] : memref<1x1x16xf32, #tpu.memory_space<vmem>>, vector<1x1x16xf32>
    %20 = vector.shape_cast %19 : vector<1x1x16xf32> to vector<1x16xf32>
    %cst_18 = arith.constant 5.000000e-01 : f32
    %21 = vector.broadcast %cst_18 : f32 to vector<1x16xf32>
    %22 = arith.cmpf ogt, %20, %21 : vector<1x16xf32>
    %cst_19 = arith.constant -1.000000e+09 : f32
    %23 = vector.shape_cast %22 : vector<1x16xi1> to vector<1x16xi1>
    %24 = vector.broadcast %23 : vector<1x16xi1> to vector<16x16xi1>
    %25 = vector.broadcast %cst_19 : f32 to vector<16x16xf32>
    %26 = arith.select %24, %18, %25 : vector<16x16xi1>, vector<16x16xf32>
    %cst_20 = arith.constant dense<0xFF800000> : vector<16xf32>
    %27 = vector.multi_reduction <maximumf>, %26, %cst_20 [1] : vector<16x16xf32> to vector<16xf32>
    %28 = vector.shape_cast %27 : vector<16xf32> to vector<16x1xf32>
    %29 = vector.broadcast %28 : vector<16x1xf32> to vector<16x16xf32>
    %30 = arith.subf %26, %29 : vector<16x16xf32>
    %31 = math.exp %30 : vector<16x16xf32>
    %cst_21 = arith.constant dense<0.000000e+00> : vector<16xf32>
    %32 = vector.multi_reduction <add>, %31, %cst_21 [1] : vector<16x16xf32> to vector<16xf32>
    %33 = vector.shape_cast %32 : vector<16xf32> to vector<16x1xf32>
    %34 = tpu.reciprocal %33 : vector<16x1xf32> -> vector<16x1xf32>
    %35 = vector.broadcast %34 : vector<16x1xf32> to vector<16x16xf32>
    %36 = arith.mulf %31, %35 : vector<16x16xf32>
    %c0_22 = arith.constant 0 : index
    %c0_23 = arith.constant 0 : index
    %c0_24 = arith.constant 0 : index
    %c0_25 = arith.constant 0 : index
    %37 = vector.load %arg12[%c0_22, %c0_23, %c0_24, %c0_25] : memref<1x1x16x16xf32, #tpu.memory_space<vmem>>, vector<1x1x16x16xf32>
    %38 = vector.shape_cast %37 : vector<1x1x16x16xf32> to vector<16x16xf32>
    %39 = vector.shape_cast %36 : vector<16x16xf32> to vector<1x1x16x16xf32>
    tpu.vector_store %arg12[%c0_22, %c0_23, %c0_24, %c0_25], %39 {strides = array<i32>} : memref<1x1x16x16xf32, #tpu.memory_space<vmem>>, vector<1x1x16x16xf32>,
    %40 = arith.truncf %36 : vector<16x16xf32> to vector<16x16xbf16>
    %c0_26 = arith.constant 0 : index
    %c0_27 = arith.constant 0 : index
    %c0_28 = arith.constant 0 : index
    %c0_29 = arith.constant 0 : index
    %41 = vector.load %arg5[%c0_26, %c0_27, %c0_28, %c0_29] : memref<1x1x16x8xbf16, #tpu.memory_space<vmem>>, vector<1x1x16x8xbf16>
    %42 = vector.shape_cast %41 : vector<1x1x16x8xbf16> to vector<16x8xbf16>
    %cst_30 = arith.constant dense<0.000000e+00> : vector<16x8xf32>
    %43 = tpu.matmul %40, %42, %cst_30 {dimension_numbers = #tpu.dot_dimension_numbers<[1], [0], [0], [1], [0, 0, 1, 1], [], []>} : vector<16x16xbf16>, vector<16x8xbf16>, vector<16x8xf32> -> vector<16x8xf32>
    %c0_i32 = arith.constant 0 : i32
    %44 = arith.cmpi eq, %arg1, %c0_i32 : i32
    %45 = arith.extui %44 : i1 to i32
    %c0_i32_31 = arith.constant 0 : i32
    %46 = arith.cmpi ne, %45, %c0_i32_31 : i32
    scf.if %46 {
      %c0_42 = arith.constant 0 : index
      %c0_43 = arith.constant 0 : index
      %c0_44 = arith.constant 0 : index
      %57 = vector.load %arg2[%c0_42, %c0_43, %c0_44] : memref<1x16x32xf32, #tpu.memory_space<vmem>>, vector<1x16x32xf32>
      %58 = vector.shape_cast %57 : vector<1x16x32xf32> to vector<16x32xf32>
      %c0_45 = arith.constant 0 : index
      %c0_46 = arith.constant 0 : index
      %59 = vector.load %arg10[%c0_45, %c0_46] : memref<1x32xf32, #tpu.memory_space<vmem>>, vector<1x32xf32>
      %60 = vector.broadcast %59 : vector<1x32xf32> to vector<16x32xf32>
      %61 = arith.addf %58, %60 : vector<16x32xf32>
      %c0_47 = arith.constant 0 : index
      %c0_48 = arith.constant 0 : index
      %c0_49 = arith.constant 0 : index
      %62 = vector.load %arg11[%c0_47, %c0_48, %c0_49] : memref<1x16x32xf32, #tpu.memory_space<vmem>>, vector<1x16x32xf32>
      %63 = vector.shape_cast %62 : vector<1x16x32xf32> to vector<16x32xf32>
      %64 = vector.shape_cast %61 : vector<16x32xf32> to vector<1x16x32xf32>
      tpu.vector_store %arg11[%c0_47, %c0_48, %c0_49], %64 {strides = array<i32>} : memref<1x16x32xf32, #tpu.memory_space<vmem>>, vector<1x16x32xf32>,
    } else {
    }
    %c0_32 = arith.constant 0 : index
    %c0_33 = arith.constant 0 : index
    %c0_34 = arith.constant 0 : index
    %47 = vector.load %arg11[%c0_32, %c0_33, %c0_34] : memref<1x16x32xf32, #tpu.memory_space<vmem>>, vector<1x16x32xf32>
    %48 = vector.shape_cast %47 : vector<1x16x32xf32> to vector<16x32xf32>
    %49 = arith.truncf %43 : vector<16x8xf32> to vector<16x8xbf16>
    %c0_35 = arith.constant 0 : index
    %c0_36 = arith.constant 0 : index
    %c0_37 = arith.constant 0 : index
    %50 = vector.load %arg9[%c0_35, %c0_36, %c0_37] : memref<1x8x32xbf16, #tpu.memory_space<vmem>>, vector<1x8x32xbf16>
    %51 = vector.shape_cast %50 : vector<1x8x32xbf16> to vector<8x32xbf16>
    %cst_38 = arith.constant dense<0.000000e+00> : vector<16x32xf32>
    %52 = tpu.matmul %49, %51, %cst_38 {dimension_numbers = #tpu.dot_dimension_numbers<[1], [0], [0], [1], [0, 0, 1, 1], [], []>} : vector<16x8xbf16>, vector<8x32xbf16>, vector<16x32xf32> -> vector<16x32xf32>
    %53 = arith.addf %48, %52 : vector<16x32xf32>
    %c0_39 = arith.constant 0 : index
    %c0_40 = arith.constant 0 : index
    %c0_41 = arith.constant 0 : index
    %54 = vector.load %arg11[%c0_39, %c0_40, %c0_41] : memref<1x16x32xf32, #tpu.memory_space<vmem>>, vector<1x16x32xf32>
    %55 = vector.shape_cast %54 : vector<1x16x32xf32> to vector<16x32xf32>
    %56 = vector.shape_cast %53 : vector<16x32xf32> to vector<1x16x32xf32>
    tpu.vector_store %arg11[%c0_39, %c0_40, %c0_41], %56 {strides = array<i32>} : memref<1x16x32xf32, #tpu.memory_space<vmem>>, vector<1x16x32xf32>,
    return
  }
  func.func @transform_0(%arg0: i32, %arg1: i32) -> (i32, i32, i32) {
    %c0_i32 = arith.constant 0 : i32
    %c0_i32_0 = arith.constant 0 : i32
    %c0_i32_1 = arith.constant 0 : i32
    return %arg0, %c0_i32, %c0_i32_0 : i32, i32, i32
  }
  func.func @transform_1(%arg0: i32, %arg1: i32) -> (i32, i32, i32, i32) {
    %c0_i32 = arith.constant 0 : i32
    %c0_i32_0 = arith.constant 0 : i32
    %c0_i32_1 = arith.constant 0 : i32
    return %arg0, %arg1, %c0_i32, %c0_i32_0 : i32, i32, i32, i32
  }
  func.func @transform_2(%arg0: i32, %arg1: i32) -> (i32, i32, i32, i32) {
    %c0_i32 = arith.constant 0 : i32
    %c0_i32_0 = arith.constant 0 : i32
    %c0_i32_1 = arith.constant 0 : i32
    return %arg0, %arg1, %c0_i32, %c0_i32_0 : i32, i32, i32, i32
  }
  func.func @transform_3(%arg0: i32, %arg1: i32) -> (i32, i32, i32, i32) {
    %c0_i32 = arith.constant 0 : i32
    %c0_i32_0 = arith.constant 0 : i32
    %c0_i32_1 = arith.constant 0 : i32
    return %arg0, %arg1, %c0_i32, %c0_i32_0 : i32, i32, i32, i32
  }
  func.func @transform_4(%arg0: i32, %arg1: i32) -> (i32, i32, i32) {
    %c0_i32 = arith.constant 0 : i32
    %c0_i32_0 = arith.constant 0 : i32
    %c0_i32_1 = arith.constant 0 : i32
    return %arg1, %c0_i32, %c0_i32_0 : i32, i32, i32
  }
  func.func @transform_5(%arg0: i32, %arg1: i32) -> (i32, i32, i32) {
    %c0_i32 = arith.constant 0 : i32
    %c0_i32_0 = arith.constant 0 : i32
    %c0_i32_1 = arith.constant 0 : i32
    return %arg1, %c0_i32, %c0_i32_0 : i32, i32, i32
  }
  func.func @transform_6(%arg0: i32, %arg1: i32) -> (i32, i32, i32) {
    %c0_i32 = arith.constant 0 : i32
    %c0_i32_0 = arith.constant 0 : i32
    %c0_i32_1 = arith.constant 0 : i32
    return %arg0, %c0_i32, %c0_i32_0 : i32, i32, i32
  }
  func.func @transform_7(%arg0: i32, %arg1: i32) -> (i32, i32, i32) {
    %c0_i32 = arith.constant 0 : i32
    %c0_i32_0 = arith.constant 0 : i32
    %c0_i32_1 = arith.constant 0 : i32
    return %arg1, %c0_i32, %c0_i32_0 : i32, i32, i32
  }
  func.func @transform_8(%arg0: i32, %arg1: i32) -> (i32, i32) {
    %c0_i32 = arith.constant 0 : i32
    %c0_i32_0 = arith.constant 0 : i32
    %c0_i32_1 = arith.constant 0 : i32
    return %c0_i32, %c0_i32_0 : i32, i32
  }
  func.func @transform_9(%arg0: i32, %arg1: i32) -> (i32, i32, i32) {
    %c0_i32 = arith.constant 0 : i32
    %c0_i32_0 = arith.constant 0 : i32
    %c0_i32_1 = arith.constant 0 : i32
    return %arg0, %c0_i32, %c0_i32_0 : i32, i32, i32
  }
  func.func @transform_10(%arg0: i32, %arg1: i32) -> (i32, i32, i32, i32) {
    %c0_i32 = arith.constant 0 : i32
    %c0_i32_0 = arith.constant 0 : i32
    %c0_i32_1 = arith.constant 0 : i32
    return %arg0, %arg1, %c0_i32, %c0_i32_0 : i32, i32, i32, i32
  }
}

module attributes {stable_mosaic.version = 11 : i64} {
  func.func @_ln_matmul_glu_kernel(%arg0: i32, %arg1: memref<8x32xf32, #tpu.memory_space<vmem>>, %arg2: memref<1x32xf32, #tpu.memory_space<vmem>>, %arg3: memref<1x32xf32, #tpu.memory_space<vmem>>, %arg4: memref<32x32xbf16, #tpu.memory_space<vmem>>, %arg5: memref<1x32xf32, #tpu.memory_space<vmem>>, %arg6: memref<32x32xbf16, #tpu.memory_space<vmem>>, %arg7: memref<1x32xf32, #tpu.memory_space<vmem>>, %arg8: memref<8x32xf32, #tpu.memory_space<vmem>>) attributes {dimension_semantics = [#tpu.dimension_semantics<parallel>], iteration_bounds = array<i64: 4>, scalar_prefetch = 0 : i64, scratch_operands = 0 : i64, tpu.core_type = #tpu.core_type<tc>, window_params = [{transform_indices = @transform_0, window_bounds = array<i64: 8, 32>}, {pipeline_mode = #tpu.pipeline_mode<synchronous>, transform_indices = @transform_1, window_bounds = array<i64: 1, 32>}, {pipeline_mode = #tpu.pipeline_mode<synchronous>, transform_indices = @transform_2, window_bounds = array<i64: 1, 32>}, {pipeline_mode = #tpu.pipeline_mode<synchronous>, transform_indices = @transform_3, window_bounds = array<i64: 32, 32>}, {pipeline_mode = #tpu.pipeline_mode<synchronous>, transform_indices = @transform_4, window_bounds = array<i64: 1, 32>}, {pipeline_mode = #tpu.pipeline_mode<synchronous>, transform_indices = @transform_5, window_bounds = array<i64: 32, 32>}, {pipeline_mode = #tpu.pipeline_mode<synchronous>, transform_indices = @transform_6, window_bounds = array<i64: 1, 32>}, {transform_indices = @transform_7, window_bounds = array<i64: 8, 32>}]} {
    %c0 = arith.constant 0 : index
    %c0_0 = arith.constant 0 : index
    %0 = vector.load %arg1[%c0, %c0_0] : memref<8x32xf32, #tpu.memory_space<vmem>>, vector<8x32xf32>
    %c0_1 = arith.constant 0 : index
    %c0_2 = arith.constant 0 : index
    %1 = vector.load %arg2[%c0_1, %c0_2] : memref<1x32xf32, #tpu.memory_space<vmem>>, vector<1x32xf32>
    %c0_3 = arith.constant 0 : index
    %c0_4 = arith.constant 0 : index
    %2 = vector.load %arg3[%c0_3, %c0_4] : memref<1x32xf32, #tpu.memory_space<vmem>>, vector<1x32xf32>
    %cst = arith.constant dense<0.000000e+00> : vector<8xf32>
    %3 = vector.multi_reduction <add>, %0, %cst [1] : vector<8x32xf32> to vector<8xf32>
    %4 = vector.shape_cast %3 : vector<8xf32> to vector<8x1xf32>
    %cst_5 = arith.constant 3.200000e+01 : f32
    %5 = vector.broadcast %cst_5 : f32 to vector<8x1xf32>
    %6 = arith.divf %4, %5 : vector<8x1xf32>
    %7 = vector.broadcast %6 : vector<8x1xf32> to vector<8x32xf32>
    %8 = arith.subf %0, %7 : vector<8x32xf32>
    %9 = arith.mulf %8, %8 : vector<8x32xf32>
    %cst_6 = arith.constant dense<0.000000e+00> : vector<8xf32>
    %10 = vector.multi_reduction <add>, %9, %cst_6 [1] : vector<8x32xf32> to vector<8xf32>
    %11 = vector.shape_cast %10 : vector<8xf32> to vector<8x1xf32>
    %cst_7 = arith.constant 3.200000e+01 : f32
    %12 = vector.broadcast %cst_7 : f32 to vector<8x1xf32>
    %13 = arith.divf %11, %12 : vector<8x1xf32>
    %cst_8 = arith.constant 9.99999974E-6 : f32
    %14 = vector.broadcast %cst_8 : f32 to vector<8x1xf32>
    %15 = arith.addf %13, %14 : vector<8x1xf32>
    %16 = math.rsqrt %15 : vector<8x1xf32>
    %17 = vector.broadcast %16 : vector<8x1xf32> to vector<8x32xf32>
    %18 = arith.mulf %8, %17 : vector<8x32xf32>
    %19 = vector.broadcast %1 : vector<1x32xf32> to vector<8x32xf32>
    %20 = arith.mulf %18, %19 : vector<8x32xf32>
    %21 = vector.broadcast %2 : vector<1x32xf32> to vector<8x32xf32>
    %22 = arith.addf %20, %21 : vector<8x32xf32>
    %23 = arith.truncf %22 : vector<8x32xf32> to vector<8x32xbf16>
    %c0_9 = arith.constant 0 : index
    %c0_10 = arith.constant 0 : index
    %24 = vector.load %arg4[%c0_9, %c0_10] : memref<32x32xbf16, #tpu.memory_space<vmem>>, vector<32x32xbf16>
    %cst_11 = arith.constant dense<0.000000e+00> : vector<8x32xf32>
    %25 = tpu.matmul %23, %24, %cst_11 {dimension_numbers = #tpu.dot_dimension_numbers<[1], [0], [0], [1], [0, 0, 1, 1], [], []>} : vector<8x32xbf16>, vector<32x32xbf16>, vector<8x32xf32> -> vector<8x32xf32>
    %c0_12 = arith.constant 0 : index
    %c0_13 = arith.constant 0 : index
    %26 = vector.load %arg5[%c0_12, %c0_13] : memref<1x32xf32, #tpu.memory_space<vmem>>, vector<1x32xf32>
    %27 = vector.broadcast %26 : vector<1x32xf32> to vector<8x32xf32>
    %28 = arith.addf %25, %27 : vector<8x32xf32>
    %c0_14 = arith.constant 0 : index
    %c0_15 = arith.constant 0 : index
    %29 = vector.load %arg6[%c0_14, %c0_15] : memref<32x32xbf16, #tpu.memory_space<vmem>>, vector<32x32xbf16>
    %cst_16 = arith.constant dense<0.000000e+00> : vector<8x32xf32>
    %30 = tpu.matmul %23, %29, %cst_16 {dimension_numbers = #tpu.dot_dimension_numbers<[1], [0], [0], [1], [0, 0, 1, 1], [], []>} : vector<8x32xbf16>, vector<32x32xbf16>, vector<8x32xf32> -> vector<8x32xf32>
    %c0_17 = arith.constant 0 : index
    %c0_18 = arith.constant 0 : index
    %31 = vector.load %arg7[%c0_17, %c0_18] : memref<1x32xf32, #tpu.memory_space<vmem>>, vector<1x32xf32>
    %32 = vector.broadcast %31 : vector<1x32xf32> to vector<8x32xf32>
    %33 = arith.addf %30, %32 : vector<8x32xf32>
    %34 = arith.negf %33 : vector<8x32xf32>
    %35 = math.exp %34 : vector<8x32xf32>
    %cst_19 = arith.constant 1.000000e+00 : f32
    %36 = vector.broadcast %cst_19 : f32 to vector<8x32xf32>
    %37 = arith.addf %36, %35 : vector<8x32xf32>
    %38 = arith.divf %36, %37 : vector<8x32xf32>
    %39 = arith.mulf %28, %38 : vector<8x32xf32>
    %c0_20 = arith.constant 0 : index
    %c0_21 = arith.constant 0 : index
    %40 = vector.load %arg8[%c0_20, %c0_21] : memref<8x32xf32, #tpu.memory_space<vmem>>, vector<8x32xf32>
    tpu.vector_store %arg8[%c0_20, %c0_21], %39 {strides = array<i32>} : memref<8x32xf32, #tpu.memory_space<vmem>>, vector<8x32xf32>,
    return
  }
  func.func @transform_0(%arg0: i32) -> (i32, i32) {
    %c0_i32 = arith.constant 0 : i32
    %c0_i32_0 = arith.constant 0 : i32
    return %arg0, %c0_i32 : i32, i32
  }
  func.func @transform_1(%arg0: i32) -> (i32, i32) {
    %c0_i32 = arith.constant 0 : i32
    %c0_i32_0 = arith.constant 0 : i32
    %c0_i32_1 = arith.constant 0 : i32
    return %c0_i32, %c0_i32_0 : i32, i32
  }
  func.func @transform_2(%arg0: i32) -> (i32, i32) {
    %c0_i32 = arith.constant 0 : i32
    %c0_i32_0 = arith.constant 0 : i32
    %c0_i32_1 = arith.constant 0 : i32
    return %c0_i32, %c0_i32_0 : i32, i32
  }
  func.func @transform_3(%arg0: i32) -> (i32, i32) {
    %c0_i32 = arith.constant 0 : i32
    %c0_i32_0 = arith.constant 0 : i32
    %c0_i32_1 = arith.constant 0 : i32
    return %c0_i32, %c0_i32_0 : i32, i32
  }
  func.func @transform_4(%arg0: i32) -> (i32, i32) {
    %c0_i32 = arith.constant 0 : i32
    %c0_i32_0 = arith.constant 0 : i32
    %c0_i32_1 = arith.constant 0 : i32
    return %c0_i32, %c0_i32_0 : i32, i32
  }
  func.func @transform_5(%arg0: i32) -> (i32, i32) {
    %c0_i32 = arith.constant 0 : i32
    %c0_i32_0 = arith.constant 0 : i32
    %c0_i32_1 = arith.constant 0 : i32
    return %c0_i32, %c0_i32_0 : i32, i32
  }
  func.func @transform_6(%arg0: i32) -> (i32, i32) {
    %c0_i32 = arith.constant 0 : i32
    %c0_i32_0 = arith.constant 0 : i32
    %c0_i32_1 = arith.constant 0 : i32
    return %c0_i32, %c0_i32_0 : i32, i32
  }
  func.func @transform_7(%arg0: i32) -> (i32, i32) {
    %c0_i32 = arith.constant 0 : i32
    %c0_i32_0 = arith.constant 0 : i32
    return %arg0, %c0_i32 : i32, i32
  }
}

module attributes {stable_mosaic.version = 11 : i64} {
  func.func @_bn_swish_proj_kernel(%arg0: i32, %arg1: memref<8x32xf32, #tpu.memory_space<vmem>>, %arg2: memref<8x32xf32, #tpu.memory_space<vmem>>, %arg3: memref<1x32xf32, #tpu.memory_space<vmem>>, %arg4: memref<1x32xf32, #tpu.memory_space<vmem>>, %arg5: memref<32x32xbf16, #tpu.memory_space<vmem>>, %arg6: memref<1x32xf32, #tpu.memory_space<vmem>>, %arg7: memref<8x32xf32, #tpu.memory_space<vmem>>) attributes {dimension_semantics = [#tpu.dimension_semantics<parallel>], iteration_bounds = array<i64: 4>, scalar_prefetch = 0 : i64, scratch_operands = 0 : i64, tpu.core_type = #tpu.core_type<tc>, window_params = [{transform_indices = @transform_0, window_bounds = array<i64: 8, 32>}, {transform_indices = @transform_1, window_bounds = array<i64: 8, 32>}, {pipeline_mode = #tpu.pipeline_mode<synchronous>, transform_indices = @transform_2, window_bounds = array<i64: 1, 32>}, {pipeline_mode = #tpu.pipeline_mode<synchronous>, transform_indices = @transform_3, window_bounds = array<i64: 1, 32>}, {pipeline_mode = #tpu.pipeline_mode<synchronous>, transform_indices = @transform_4, window_bounds = array<i64: 32, 32>}, {pipeline_mode = #tpu.pipeline_mode<synchronous>, transform_indices = @transform_5, window_bounds = array<i64: 1, 32>}, {transform_indices = @transform_6, window_bounds = array<i64: 8, 32>}]} {
    %c0 = arith.constant 0 : index
    %c0_0 = arith.constant 0 : index
    %0 = vector.load %arg2[%c0, %c0_0] : memref<8x32xf32, #tpu.memory_space<vmem>>, vector<8x32xf32>
    %c0_1 = arith.constant 0 : index
    %c0_2 = arith.constant 0 : index
    %1 = vector.load %arg3[%c0_1, %c0_2] : memref<1x32xf32, #tpu.memory_space<vmem>>, vector<1x32xf32>
    %2 = vector.broadcast %1 : vector<1x32xf32> to vector<8x32xf32>
    %3 = arith.mulf %0, %2 : vector<8x32xf32>
    %c0_3 = arith.constant 0 : index
    %c0_4 = arith.constant 0 : index
    %4 = vector.load %arg4[%c0_3, %c0_4] : memref<1x32xf32, #tpu.memory_space<vmem>>, vector<1x32xf32>
    %5 = vector.broadcast %4 : vector<1x32xf32> to vector<8x32xf32>
    %6 = arith.addf %3, %5 : vector<8x32xf32>
    %7 = arith.negf %6 : vector<8x32xf32>
    %8 = math.exp %7 : vector<8x32xf32>
    %cst = arith.constant 1.000000e+00 : f32
    %9 = vector.broadcast %cst : f32 to vector<8x32xf32>
    %10 = arith.addf %9, %8 : vector<8x32xf32>
    %11 = arith.divf %9, %10 : vector<8x32xf32>
    %12 = arith.mulf %6, %11 : vector<8x32xf32>
    %13 = arith.truncf %12 : vector<8x32xf32> to vector<8x32xbf16>
    %c0_5 = arith.constant 0 : index
    %c0_6 = arith.constant 0 : index
    %14 = vector.load %arg5[%c0_5, %c0_6] : memref<32x32xbf16, #tpu.memory_space<vmem>>, vector<32x32xbf16>
    %cst_7 = arith.constant dense<0.000000e+00> : vector<8x32xf32>
    %15 = tpu.matmul %13, %14, %cst_7 {dimension_numbers = #tpu.dot_dimension_numbers<[1], [0], [0], [1], [0, 0, 1, 1], [], []>} : vector<8x32xbf16>, vector<32x32xbf16>, vector<8x32xf32> -> vector<8x32xf32>
    %c0_8 = arith.constant 0 : index
    %c0_9 = arith.constant 0 : index
    %16 = vector.load %arg1[%c0_8, %c0_9] : memref<8x32xf32, #tpu.memory_space<vmem>>, vector<8x32xf32>
    %17 = arith.addf %16, %15 : vector<8x32xf32>
    %c0_10 = arith.constant 0 : index
    %c0_11 = arith.constant 0 : index
    %18 = vector.load %arg6[%c0_10, %c0_11] : memref<1x32xf32, #tpu.memory_space<vmem>>, vector<1x32xf32>
    %19 = vector.broadcast %18 : vector<1x32xf32> to vector<8x32xf32>
    %20 = arith.addf %17, %19 : vector<8x32xf32>
    %c0_12 = arith.constant 0 : index
    %c0_13 = arith.constant 0 : index
    %21 = vector.load %arg7[%c0_12, %c0_13] : memref<8x32xf32, #tpu.memory_space<vmem>>, vector<8x32xf32>
    tpu.vector_store %arg7[%c0_12, %c0_13], %20 {strides = array<i32>} : memref<8x32xf32, #tpu.memory_space<vmem>>, vector<8x32xf32>,
    return
  }
  func.func @transform_0(%arg0: i32) -> (i32, i32) {
    %c0_i32 = arith.constant 0 : i32
    %c0_i32_0 = arith.constant 0 : i32
    return %arg0, %c0_i32 : i32, i32
  }
  func.func @transform_1(%arg0: i32) -> (i32, i32) {
    %c0_i32 = arith.constant 0 : i32
    %c0_i32_0 = arith.constant 0 : i32
    return %arg0, %c0_i32 : i32, i32
  }
  func.func @transform_2(%arg0: i32) -> (i32, i32) {
    %c0_i32 = arith.constant 0 : i32
    %c0_i32_0 = arith.constant 0 : i32
    %c0_i32_1 = arith.constant 0 : i32
    return %c0_i32, %c0_i32_0 : i32, i32
  }
  func.func @transform_3(%arg0: i32) -> (i32, i32) {
    %c0_i32 = arith.constant 0 : i32
    %c0_i32_0 = arith.constant 0 : i32
    %c0_i32_1 = arith.constant 0 : i32
    return %c0_i32, %c0_i32_0 : i32, i32
  }
  func.func @transform_4(%arg0: i32) -> (i32, i32) {
    %c0_i32 = arith.constant 0 : i32
    %c0_i32_0 = arith.constant 0 : i32
    %c0_i32_1 = arith.constant 0 : i32
    return %c0_i32, %c0_i32_0 : i32, i32
  }
  func.func @transform_5(%arg0: i32) -> (i32, i32) {
    %c0_i32 = arith.constant 0 : i32
    %c0_i32_0 = arith.constant 0 : i32
    %c0_i32_1 = arith.constant 0 : i32
    return %c0_i32, %c0_i32_0 : i32, i32
  }
  func.func @transform_6(%arg0: i32) -> (i32, i32) {
    %c0_i32 = arith.constant 0 : i32
    %c0_i32_0 = arith.constant 0 : i32
    return %arg0, %c0_i32 : i32, i32
  }
}

module attributes {stable_mosaic.version = 11 : i64} {
  func.func @_dwconv_kernel(%arg0: i32, %arg1: memref<1x24x32xf32, #tpu.memory_space<vmem>>, %arg2: memref<7x32xf32, #tpu.memory_space<vmem>>, %arg3: memref<1x32xf32, #tpu.memory_space<vmem>>, %arg4: memref<1x16x32xf32, #tpu.memory_space<vmem>>, %arg5: memref<1x1x32xf32, #tpu.memory_space<vmem>>, %arg6: memref<1x1x32xf32, #tpu.memory_space<vmem>>) attributes {dimension_semantics = [#tpu.dimension_semantics<parallel>], iteration_bounds = array<i64: 2>, scalar_prefetch = 0 : i64, scratch_operands = 0 : i64, tpu.core_type = #tpu.core_type<tc>, window_params = [{transform_indices = @transform_0, window_bounds = array<i64: 1, 24, 32>}, {pipeline_mode = #tpu.pipeline_mode<synchronous>, transform_indices = @transform_1, window_bounds = array<i64: 7, 32>}, {pipeline_mode = #tpu.pipeline_mode<synchronous>, transform_indices = @transform_2, window_bounds = array<i64: 1, 32>}, {transform_indices = @transform_3, window_bounds = array<i64: 1, 16, 32>}, {transform_indices = @transform_4, window_bounds = array<i64: 1, 1, 32>}, {transform_indices = @transform_5, window_bounds = array<i64: 1, 1, 32>}]} {
    %c0 = arith.constant 0 : index
    %c0_0 = arith.constant 0 : index
    %c0_1 = arith.constant 0 : index
    %0 = vector.load %arg1[%c0, %c0_0, %c0_1] : memref<1x24x32xf32, #tpu.memory_space<vmem>>, vector<1x24x32xf32>
    %1 = vector.shape_cast %0 : vector<1x24x32xf32> to vector<24x32xf32>
    %c0_2 = arith.constant 0 : index
    %c0_3 = arith.constant 0 : index
    %2 = vector.load %arg2[%c0_2, %c0_3] : memref<7x32xf32, #tpu.memory_space<vmem>>, vector<7x32xf32>
    %3 = vector.extract_strided_slice %1 {offsets = [0, 0], sizes = [16, 32], strides = [1, 1]} : vector<24x32xf32> to vector<16x32xf32>
    %4 = vector.extract_strided_slice %2 {offsets = [0, 0], sizes = [1, 32], strides = [1, 1]} : vector<7x32xf32> to vector<1x32xf32>
    %5 = vector.broadcast %4 : vector<1x32xf32> to vector<16x32xf32>
    %6 = arith.mulf %3, %5 : vector<16x32xf32>
    %c23_i32 = arith.constant 23 : i32
    %7 = tpu.dynamic_rotate %1 by %c23_i32 dim 0 : vector<24x32xf32>, i32 -> vector<24x32xf32>
    %8 = vector.extract_strided_slice %7 {offsets = [0, 0], sizes = [16, 32], strides = [1, 1]} : vector<24x32xf32> to vector<16x32xf32>
    %9 = vector.extract_strided_slice %2 {offsets = [1, 0], sizes = [1, 32], strides = [1, 1]} : vector<7x32xf32> to vector<1x32xf32>
    %10 = vector.broadcast %9 : vector<1x32xf32> to vector<16x32xf32>
    %11 = arith.mulf %8, %10 : vector<16x32xf32>
    %12 = arith.addf %6, %11 : vector<16x32xf32>
    %c22_i32 = arith.constant 22 : i32
    %13 = tpu.dynamic_rotate %1 by %c22_i32 dim 0 : vector<24x32xf32>, i32 -> vector<24x32xf32>
    %14 = vector.extract_strided_slice %13 {offsets = [0, 0], sizes = [16, 32], strides = [1, 1]} : vector<24x32xf32> to vector<16x32xf32>
    %15 = vector.extract_strided_slice %2 {offsets = [2, 0], sizes = [1, 32], strides = [1, 1]} : vector<7x32xf32> to vector<1x32xf32>
    %16 = vector.broadcast %15 : vector<1x32xf32> to vector<16x32xf32>
    %17 = arith.mulf %14, %16 : vector<16x32xf32>
    %18 = arith.addf %12, %17 : vector<16x32xf32>
    %c21_i32 = arith.constant 21 : i32
    %19 = tpu.dynamic_rotate %1 by %c21_i32 dim 0 : vector<24x32xf32>, i32 -> vector<24x32xf32>
    %20 = vector.extract_strided_slice %19 {offsets = [0, 0], sizes = [16, 32], strides = [1, 1]} : vector<24x32xf32> to vector<16x32xf32>
    %21 = vector.extract_strided_slice %2 {offsets = [3, 0], sizes = [1, 32], strides = [1, 1]} : vector<7x32xf32> to vector<1x32xf32>
    %22 = vector.broadcast %21 : vector<1x32xf32> to vector<16x32xf32>
    %23 = arith.mulf %20, %22 : vector<16x32xf32>
    %24 = arith.addf %18, %23 : vector<16x32xf32>
    %c20_i32 = arith.constant 20 : i32
    %25 = tpu.dynamic_rotate %1 by %c20_i32 dim 0 : vector<24x32xf32>, i32 -> vector<24x32xf32>
    %26 = vector.extract_strided_slice %25 {offsets = [0, 0], sizes = [16, 32], strides = [1, 1]} : vector<24x32xf32> to vector<16x32xf32>
    %27 = vector.extract_strided_slice %2 {offsets = [4, 0], sizes = [1, 32], strides = [1, 1]} : vector<7x32xf32> to vector<1x32xf32>
    %28 = vector.broadcast %27 : vector<1x32xf32> to vector<16x32xf32>
    %29 = arith.mulf %26, %28 : vector<16x32xf32>
    %30 = arith.addf %24, %29 : vector<16x32xf32>
    %c19_i32 = arith.constant 19 : i32
    %31 = tpu.dynamic_rotate %1 by %c19_i32 dim 0 : vector<24x32xf32>, i32 -> vector<24x32xf32>
    %32 = vector.extract_strided_slice %31 {offsets = [0, 0], sizes = [16, 32], strides = [1, 1]} : vector<24x32xf32> to vector<16x32xf32>
    %33 = vector.extract_strided_slice %2 {offsets = [5, 0], sizes = [1, 32], strides = [1, 1]} : vector<7x32xf32> to vector<1x32xf32>
    %34 = vector.broadcast %33 : vector<1x32xf32> to vector<16x32xf32>
    %35 = arith.mulf %32, %34 : vector<16x32xf32>
    %36 = arith.addf %30, %35 : vector<16x32xf32>
    %c18_i32 = arith.constant 18 : i32
    %37 = tpu.dynamic_rotate %1 by %c18_i32 dim 0 : vector<24x32xf32>, i32 -> vector<24x32xf32>
    %38 = vector.extract_strided_slice %37 {offsets = [0, 0], sizes = [16, 32], strides = [1, 1]} : vector<24x32xf32> to vector<16x32xf32>
    %39 = vector.extract_strided_slice %2 {offsets = [6, 0], sizes = [1, 32], strides = [1, 1]} : vector<7x32xf32> to vector<1x32xf32>
    %40 = vector.broadcast %39 : vector<1x32xf32> to vector<16x32xf32>
    %41 = arith.mulf %38, %40 : vector<16x32xf32>
    %42 = arith.addf %36, %41 : vector<16x32xf32>
    %c0_4 = arith.constant 0 : index
    %c0_5 = arith.constant 0 : index
    %43 = vector.load %arg3[%c0_4, %c0_5] : memref<1x32xf32, #tpu.memory_space<vmem>>, vector<1x32xf32>
    %44 = vector.broadcast %43 : vector<1x32xf32> to vector<16x32xf32>
    %45 = arith.addf %42, %44 : vector<16x32xf32>
    %c0_6 = arith.constant 0 : index
    %c0_7 = arith.constant 0 : index
    %c0_8 = arith.constant 0 : index
    %46 = vector.load %arg4[%c0_6, %c0_7, %c0_8] : memref<1x16x32xf32, #tpu.memory_space<vmem>>, vector<1x16x32xf32>
    %47 = vector.shape_cast %46 : vector<1x16x32xf32> to vector<16x32xf32>
    %48 = vector.shape_cast %45 : vector<16x32xf32> to vector<1x16x32xf32>
    tpu.vector_store %arg4[%c0_6, %c0_7, %c0_8], %48 {strides = array<i32>} : memref<1x16x32xf32, #tpu.memory_space<vmem>>, vector<1x16x32xf32>,
    %cst = arith.constant dense<0.000000e+00> : vector<32xf32>
    %49 = vector.multi_reduction <add>, %45, %cst [0] : vector<16x32xf32> to vector<32xf32>
    %50 = vector.shape_cast %49 : vector<32xf32> to vector<1x32xf32>
    %c0_9 = arith.constant 0 : index
    %c0_10 = arith.constant 0 : index
    %c0_11 = arith.constant 0 : index
    %51 = vector.load %arg5[%c0_9, %c0_10, %c0_11] : memref<1x1x32xf32, #tpu.memory_space<vmem>>, vector<1x1x32xf32>
    %52 = vector.shape_cast %51 : vector<1x1x32xf32> to vector<1x32xf32>
    %53 = vector.shape_cast %50 : vector<1x32xf32> to vector<1x1x32xf32>
    tpu.vector_store %arg5[%c0_9, %c0_10, %c0_11], %53 {strides = array<i32>} : memref<1x1x32xf32, #tpu.memory_space<vmem>>, vector<1x1x32xf32>,
    %54 = arith.mulf %45, %45 : vector<16x32xf32>
    %cst_12 = arith.constant dense<0.000000e+00> : vector<32xf32>
    %55 = vector.multi_reduction <add>, %54, %cst_12 [0] : vector<16x32xf32> to vector<32xf32>
    %56 = vector.shape_cast %55 : vector<32xf32> to vector<1x32xf32>
    %c0_13 = arith.constant 0 : index
    %c0_14 = arith.constant 0 : index
    %c0_15 = arith.constant 0 : index
    %57 = vector.load %arg6[%c0_13, %c0_14, %c0_15] : memref<1x1x32xf32, #tpu.memory_space<vmem>>, vector<1x1x32xf32>
    %58 = vector.shape_cast %57 : vector<1x1x32xf32> to vector<1x32xf32>
    %59 = vector.shape_cast %56 : vector<1x32xf32> to vector<1x1x32xf32>
    tpu.vector_store %arg6[%c0_13, %c0_14, %c0_15], %59 {strides = array<i32>} : memref<1x1x32xf32, #tpu.memory_space<vmem>>, vector<1x1x32xf32>,
    return
  }
  func.func @transform_0(%arg0: i32) -> (i32, i32, i32) {
    %c0_i32 = arith.constant 0 : i32
    %c0_i32_0 = arith.constant 0 : i32
    %c0_i32_1 = arith.constant 0 : i32
    return %arg0, %c0_i32, %c0_i32_0 : i32, i32, i32
  }
  func.func @transform_1(%arg0: i32) -> (i32, i32) {
    %c0_i32 = arith.constant 0 : i32
    %c0_i32_0 = arith.constant 0 : i32
    %c0_i32_1 = arith.constant 0 : i32
    return %c0_i32, %c0_i32_0 : i32, i32
  }
  func.func @transform_2(%arg0: i32) -> (i32, i32) {
    %c0_i32 = arith.constant 0 : i32
    %c0_i32_0 = arith.constant 0 : i32
    %c0_i32_1 = arith.constant 0 : i32
    return %c0_i32, %c0_i32_0 : i32, i32
  }
  func.func @transform_3(%arg0: i32) -> (i32, i32, i32) {
    %c0_i32 = arith.constant 0 : i32
    %c0_i32_0 = arith.constant 0 : i32
    %c0_i32_1 = arith.constant 0 : i32
    return %arg0, %c0_i32, %c0_i32_0 : i32, i32, i32
  }
  func.func @transform_4(%arg0: i32) -> (i32, i32, i32) {
    %c0_i32 = arith.constant 0 : i32
    %c0_i32_0 = arith.constant 0 : i32
    %c0_i32_1 = arith.constant 0 : i32
    return %arg0, %c0_i32, %c0_i32_0 : i32, i32, i32
  }
  func.func @transform_5(%arg0: i32) -> (i32, i32, i32) {
    %c0_i32 = arith.constant 0 : i32
    %c0_i32_0 = arith.constant 0 : i32
    %c0_i32_1 = arith.constant 0 : i32
    return %arg0, %c0_i32, %c0_i32_0 : i32, i32, i32
  }
}

module attributes {stable_mosaic.version = 11 : i64} {
  func.func @_ffn_kernel(%arg0: i32, %arg1: i32, %arg2: memref<8x32xf32, #tpu.memory_space<vmem>>, %arg3: memref<1x32xf32, #tpu.memory_space<vmem>>, %arg4: memref<1x32xf32, #tpu.memory_space<vmem>>, %arg5: memref<32x128xbf16, #tpu.memory_space<vmem>>, %arg6: memref<1x128xf32, #tpu.memory_space<vmem>>, %arg7: memref<128x32xbf16, #tpu.memory_space<vmem>>, %arg8: memref<1x32xf32, #tpu.memory_space<vmem>>, %arg9: memref<1x32xf32, #tpu.memory_space<vmem>>, %arg10: memref<1x32xf32, #tpu.memory_space<vmem>>, %arg11: memref<8x32xf32, #tpu.memory_space<vmem>>, %arg12: memref<8x32xbf16, #tpu.memory_space<vmem>>, %arg13: memref<8x32xf32, #tpu.memory_space<vmem>>) attributes {dimension_semantics = [#tpu.dimension_semantics<parallel>, #tpu.dimension_semantics<arbitrary>], iteration_bounds = array<i64: 4, 1>, scalar_prefetch = 0 : i64, scratch_operands = 2 : i64, tpu.core_type = #tpu.core_type<tc>, window_params = [{transform_indices = @transform_0, window_bounds = array<i64: 8, 32>}, {pipeline_mode = #tpu.pipeline_mode<synchronous>, transform_indices = @transform_1, window_bounds = array<i64: 1, 32>}, {pipeline_mode = #tpu.pipeline_mode<synchronous>, transform_indices = @transform_2, window_bounds = array<i64: 1, 32>}, {transform_indices = @transform_3, window_bounds = array<i64: 32, 128>}, {transform_indices = @transform_4, window_bounds = array<i64: 1, 128>}, {transform_indices = @transform_5, window_bounds = array<i64: 128, 32>}, {pipeline_mode = #tpu.pipeline_mode<synchronous>, transform_indices = @transform_6, window_bounds = array<i64: 1, 32>}, {pipeline_mode = #tpu.pipeline_mode<synchronous>, transform_indices = @transform_7, window_bounds = array<i64: 1, 32>}, {pipeline_mode = #tpu.pipeline_mode<synchronous>, transform_indices = @transform_8, window_bounds = array<i64: 1, 32>}, {transform_indices = @transform_9, window_bounds = array<i64: 8, 32>}]} {
    %c0_i32 = arith.constant 0 : i32
    %0 = arith.cmpi eq, %arg1, %c0_i32 : i32
    %1 = arith.extui %0 : i1 to i32
    %c0_i32_0 = arith.constant 0 : i32
    %2 = arith.cmpi ne, %1, %c0_i32_0 : i32
    scf.if %2 {
      %c0_16 = arith.constant 0 : index
      %c0_17 = arith.constant 0 : index
      %24 = vector.load %arg2[%c0_16, %c0_17] : memref<8x32xf32, #tpu.memory_space<vmem>>, vector<8x32xf32>
      %c0_18 = arith.constant 0 : index
      %c0_19 = arith.constant 0 : index
      %25 = vector.load %arg3[%c0_18, %c0_19] : memref<1x32xf32, #tpu.memory_space<vmem>>, vector<1x32xf32>
      %c0_20 = arith.constant 0 : index
      %c0_21 = arith.constant 0 : index
      %26 = vector.load %arg4[%c0_20, %c0_21] : memref<1x32xf32, #tpu.memory_space<vmem>>, vector<1x32xf32>
      %cst_22 = arith.constant dense<0.000000e+00> : vector<8xf32>
      %27 = vector.multi_reduction <add>, %24, %cst_22 [1] : vector<8x32xf32> to vector<8xf32>
      %28 = vector.shape_cast %27 : vector<8xf32> to vector<8x1xf32>
      %cst_23 = arith.constant 3.200000e+01 : f32
      %29 = vector.broadcast %cst_23 : f32 to vector<8x1xf32>
      %30 = arith.divf %28, %29 : vector<8x1xf32>
      %31 = vector.broadcast %30 : vector<8x1xf32> to vector<8x32xf32>
      %32 = arith.subf %24, %31 : vector<8x32xf32>
      %33 = arith.mulf %32, %32 : vector<8x32xf32>
      %cst_24 = arith.constant dense<0.000000e+00> : vector<8xf32>
      %34 = vector.multi_reduction <add>, %33, %cst_24 [1] : vector<8x32xf32> to vector<8xf32>
      %35 = vector.shape_cast %34 : vector<8xf32> to vector<8x1xf32>
      %cst_25 = arith.constant 3.200000e+01 : f32
      %36 = vector.broadcast %cst_25 : f32 to vector<8x1xf32>
      %37 = arith.divf %35, %36 : vector<8x1xf32>
      %cst_26 = arith.constant 9.99999974E-6 : f32
      %38 = vector.broadcast %cst_26 : f32 to vector<8x1xf32>
      %39 = arith.addf %37, %38 : vector<8x1xf32>
      %40 = math.rsqrt %39 : vector<8x1xf32>
      %41 = vector.broadcast %40 : vector<8x1xf32> to vector<8x32xf32>
      %42 = arith.mulf %32, %41 : vector<8x32xf32>
      %43 = vector.broadcast %25 : vector<1x32xf32> to vector<8x32xf32>
      %44 = arith.mulf %42, %43 : vector<8x32xf32>
      %45 = vector.broadcast %26 : vector<1x32xf32> to vector<8x32xf32>
      %46 = arith.addf %44, %45 : vector<8x32xf32>
      %47 = arith.truncf %46 : vector<8x32xf32> to vector<8x32xbf16>
      %c0_27 = arith.constant 0 : index
      %c0_28 = arith.constant 0 : index
      %48 = vector.load %arg12[%c0_27, %c0_28] : memref<8x32xbf16, #tpu.memory_space<vmem>>, vector<8x32xbf16>
      tpu.vector_store %arg12[%c0_27, %c0_28], %47 {strides = array<i32>} : memref<8x32xbf16, #tpu.memory_space<vmem>>, vector<8x32xbf16>,
      %cst_29 = arith.constant 0.000000e+00 : f32
      %49 = vector.broadcast %cst_29 : f32 to vector<8x32xf32>
      %c0_30 = arith.constant 0 : index
      %c0_31 = arith.constant 0 : index
      %50 = vector.load %arg13[%c0_30, %c0_31] : memref<8x32xf32, #tpu.memory_space<vmem>>, vector<8x32xf32>
      tpu.vector_store %arg13[%c0_30, %c0_31], %49 {strides = array<i32>} : memref<8x32xf32, #tpu.memory_space<vmem>>, vector<8x32xf32>,
    } else {
    }
    %c0 = arith.constant 0 : index
    %c0_1 = arith.constant 0 : index
    %3 = vector.load %arg12[%c0, %c0_1] : memref<8x32xbf16, #tpu.memory_space<vmem>>, vector<8x32xbf16>
    %c0_2 = arith.constant 0 : index
    %c0_3 = arith.constant 0 : index
    %4 = vector.load %arg5[%c0_2, %c0_3] : memref<32x128xbf16, #tpu.memory_space<vmem>>, vector<32x128xbf16>
    %cst = arith.constant dense<0.000000e+00> : vector<8x128xf32>
    %5 = tpu.matmul %3, %4, %cst {dimension_numbers = #tpu.dot_dimension_numbers<[1], [0], [0], [1], [0, 0, 1, 1], [], []>} : vector<8x32xbf16>, vector<32x128xbf16>, vector<8x128xf32> -> vector<8x128xf32>
    %c0_4 = arith.constant 0 : index
    %c0_5 = arith.constant 0 : index
    %6 = vector.load %arg6[%c0_4, %c0_5] : memref<1x128xf32, #tpu.memory_space<vmem>>, vector<1x128xf32>
    %7 = vector.broadcast %6 : vector<1x128xf32> to vector<8x128xf32>
    %8 = arith.addf %5, %7 : vector<8x128xf32>
    %9 = arith.negf %8 : vector<8x128xf32>
    %10 = math.exp %9 : vector<8x128xf32>
    %cst_6 = arith.constant 1.000000e+00 : f32
    %11 = vector.broadcast %cst_6 : f32 to vector<8x128xf32>
    %12 = arith.addf %11, %10 : vector<8x128xf32>
    %13 = arith.divf %11, %12 : vector<8x128xf32>
    %14 = arith.mulf %8, %13 : vector<8x128xf32>
    %c0_7 = arith.constant 0 : index
    %c0_8 = arith.constant 0 : index
    %15 = vector.load %arg13[%c0_7, %c0_8] : memref<8x32xf32, #tpu.memory_space<vmem>>, vector<8x32xf32>
    %16 = arith.truncf %14 : vector<8x128xf32> to vector<8x128xbf16>
    %c0_9 = arith.constant 0 : index
    %c0_10 = arith.constant 0 : index
    %17 = vector.load %arg7[%c0_9, %c0_10] : memref<128x32xbf16, #tpu.memory_space<vmem>>, vector<128x32xbf16>
    %cst_11 = arith.constant dense<0.000000e+00> : vector<8x32xf32>
    %18 = tpu.matmul %16, %17, %cst_11 {dimension_numbers = #tpu.dot_dimension_numbers<[1], [0], [0], [1], [0, 0, 1, 1], [], []>} : vector<8x128xbf16>, vector<128x32xbf16>, vector<8x32xf32> -> vector<8x32xf32>
    %19 = arith.addf %15, %18 : vector<8x32xf32>
    %c0_12 = arith.constant 0 : index
    %c0_13 = arith.constant 0 : index
    %20 = vector.load %arg13[%c0_12, %c0_13] : memref<8x32xf32, #tpu.memory_space<vmem>>, vector<8x32xf32>
    tpu.vector_store %arg13[%c0_12, %c0_13], %19 {strides = array<i32>} : memref<8x32xf32, #tpu.memory_space<vmem>>, vector<8x32xf32>,
    %c0_i32_14 = arith.constant 0 : i32
    %21 = arith.cmpi eq, %arg1, %c0_i32_14 : i32
    %22 = arith.extui %21 : i1 to i32
    %c0_i32_15 = arith.constant 0 : i32
    %23 = arith.cmpi ne, %22, %c0_i32_15 : i32
    scf.if %23 {
      %c0_16 = arith.constant 0 : index
      %c0_17 = arith.constant 0 : index
      %24 = vector.load %arg2[%c0_16, %c0_17] : memref<8x32xf32, #tpu.memory_space<vmem>>, vector<8x32xf32>
      %c0_18 = arith.constant 0 : index
      %c0_19 = arith.constant 0 : index
      %25 = vector.load %arg13[%c0_18, %c0_19] : memref<8x32xf32, #tpu.memory_space<vmem>>, vector<8x32xf32>
      %c0_20 = arith.constant 0 : index
      %c0_21 = arith.constant 0 : index
      %26 = vector.load %arg8[%c0_20, %c0_21] : memref<1x32xf32, #tpu.memory_space<vmem>>, vector<1x32xf32>
      %27 = vector.broadcast %26 : vector<1x32xf32> to vector<8x32xf32>
      %28 = arith.addf %25, %27 : vector<8x32xf32>
      %cst_22 = arith.constant 5.000000e-01 : f32
      %29 = vector.broadcast %cst_22 : f32 to vector<8x32xf32>
      %30 = arith.mulf %29, %28 : vector<8x32xf32>
      %31 = arith.addf %24, %30 : vector<8x32xf32>
      %c0_23 = arith.constant 0 : index
      %c0_24 = arith.constant 0 : index
      %32 = vector.load %arg9[%c0_23, %c0_24] : memref<1x32xf32, #tpu.memory_space<vmem>>, vector<1x32xf32>
      %c0_25 = arith.constant 0 : index
      %c0_26 = arith.constant 0 : index
      %33 = vector.load %arg10[%c0_25, %c0_26] : memref<1x32xf32, #tpu.memory_space<vmem>>, vector<1x32xf32>
      %cst_27 = arith.constant dense<0.000000e+00> : vector<8xf32>
      %34 = vector.multi_reduction <add>, %31, %cst_27 [1] : vector<8x32xf32> to vector<8xf32>
      %35 = vector.shape_cast %34 : vector<8xf32> to vector<8x1xf32>
      %cst_28 = arith.constant 3.200000e+01 : f32
      %36 = vector.broadcast %cst_28 : f32 to vector<8x1xf32>
      %37 = arith.divf %35, %36 : vector<8x1xf32>
      %38 = vector.broadcast %37 : vector<8x1xf32> to vector<8x32xf32>
      %39 = arith.subf %31, %38 : vector<8x32xf32>
      %40 = arith.mulf %39, %39 : vector<8x32xf32>
      %cst_29 = arith.constant dense<0.000000e+00> : vector<8xf32>
      %41 = vector.multi_reduction <add>, %40, %cst_29 [1] : vector<8x32xf32> to vector<8xf32>
      %42 = vector.shape_cast %41 : vector<8xf32> to vector<8x1xf32>
      %cst_30 = arith.constant 3.200000e+01 : f32
      %43 = vector.broadcast %cst_30 : f32 to vector<8x1xf32>
      %44 = arith.divf %42, %43 : vector<8x1xf32>
      %cst_31 = arith.constant 9.99999974E-6 : f32
      %45 = vector.broadcast %cst_31 : f32 to vector<8x1xf32>
      %46 = arith.addf %44, %45 : vector<8x1xf32>
      %47 = math.rsqrt %46 : vector<8x1xf32>
      %48 = vector.broadcast %47 : vector<8x1xf32> to vector<8x32xf32>
      %49 = arith.mulf %39, %48 : vector<8x32xf32>
      %50 = vector.broadcast %32 : vector<1x32xf32> to vector<8x32xf32>
      %51 = arith.mulf %49, %50 : vector<8x32xf32>
      %52 = vector.broadcast %33 : vector<1x32xf32> to vector<8x32xf32>
      %53 = arith.addf %51, %52 : vector<8x32xf32>
      %c0_32 = arith.constant 0 : index
      %c0_33 = arith.constant 0 : index
      %54 = vector.load %arg11[%c0_32, %c0_33] : memref<8x32xf32, #tpu.memory_space<vmem>>, vector<8x32xf32>
      tpu.vector_store %arg11[%c0_32, %c0_33], %53 {strides = array<i32>} : memref<8x32xf32, #tpu.memory_space<vmem>>, vector<8x32xf32>,
    } else {
    }
    return
  }
  func.func @transform_0(%arg0: i32, %arg1: i32) -> (i32, i32) {
    %c0_i32 = arith.constant 0 : i32
    %c0_i32_0 = arith.constant 0 : i32
    return %arg0, %c0_i32 : i32, i32
  }
  func.func @transform_1(%arg0: i32, %arg1: i32) -> (i32, i32) {
    %c0_i32 = arith.constant 0 : i32
    %c0_i32_0 = arith.constant 0 : i32
    %c0_i32_1 = arith.constant 0 : i32
    return %c0_i32, %c0_i32_0 : i32, i32
  }
  func.func @transform_2(%arg0: i32, %arg1: i32) -> (i32, i32) {
    %c0_i32 = arith.constant 0 : i32
    %c0_i32_0 = arith.constant 0 : i32
    %c0_i32_1 = arith.constant 0 : i32
    return %c0_i32, %c0_i32_0 : i32, i32
  }
  func.func @transform_3(%arg0: i32, %arg1: i32) -> (i32, i32) {
    %c0_i32 = arith.constant 0 : i32
    %c0_i32_0 = arith.constant 0 : i32
    return %c0_i32, %arg1 : i32, i32
  }
  func.func @transform_4(%arg0: i32, %arg1: i32) -> (i32, i32) {
    %c0_i32 = arith.constant 0 : i32
    %c0_i32_0 = arith.constant 0 : i32
    return %c0_i32, %arg1 : i32, i32
  }
  func.func @transform_5(%arg0: i32, %arg1: i32) -> (i32, i32) {
    %c0_i32 = arith.constant 0 : i32
    %c0_i32_0 = arith.constant 0 : i32
    return %arg1, %c0_i32 : i32, i32
  }
  func.func @transform_6(%arg0: i32, %arg1: i32) -> (i32, i32) {
    %c0_i32 = arith.constant 0 : i32
    %c0_i32_0 = arith.constant 0 : i32
    %c0_i32_1 = arith.constant 0 : i32
    return %c0_i32, %c0_i32_0 : i32, i32
  }
  func.func @transform_7(%arg0: i32, %arg1: i32) -> (i32, i32) {
    %c0_i32 = arith.constant 0 : i32
    %c0_i32_0 = arith.constant 0 : i32
    %c0_i32_1 = arith.constant 0 : i32
    return %c0_i32, %c0_i32_0 : i32, i32
  }
  func.func @transform_8(%arg0: i32, %arg1: i32) -> (i32, i32) {
    %c0_i32 = arith.constant 0 : i32
    %c0_i32_0 = arith.constant 0 : i32
    %c0_i32_1 = arith.constant 0 : i32
    return %c0_i32, %c0_i32_0 : i32, i32
  }
  func.func @transform_9(%arg0: i32, %arg1: i32) -> (i32, i32) {
    %c0_i32 = arith.constant 0 : i32
    %c0_i32_0 = arith.constant 0 : i32
    return %arg0, %c0_i32 : i32, i32
  }
}

module attributes {stable_mosaic.version = 11 : i64} {
  func.func @_linear_kernel(%arg0: i32, %arg1: memref<8x32xf32, #tpu.memory_space<vmem>>, %arg2: memref<32x128xbf16, #tpu.memory_space<vmem>>, %arg3: memref<1x128xf32, #tpu.memory_space<vmem>>, %arg4: memref<8x128xf32, #tpu.memory_space<vmem>>) attributes {dimension_semantics = [#tpu.dimension_semantics<parallel>], iteration_bounds = array<i64: 4>, scalar_prefetch = 0 : i64, scratch_operands = 0 : i64, tpu.core_type = #tpu.core_type<tc>, window_params = [{transform_indices = @transform_0, window_bounds = array<i64: 8, 32>}, {pipeline_mode = #tpu.pipeline_mode<synchronous>, transform_indices = @transform_1, window_bounds = array<i64: 32, 128>}, {pipeline_mode = #tpu.pipeline_mode<synchronous>, transform_indices = @transform_2, window_bounds = array<i64: 1, 128>}, {transform_indices = @transform_3, window_bounds = array<i64: 8, 128>}]} {
    %c0 = arith.constant 0 : index
    %c0_0 = arith.constant 0 : index
    %0 = vector.load %arg1[%c0, %c0_0] : memref<8x32xf32, #tpu.memory_space<vmem>>, vector<8x32xf32>
    %1 = arith.truncf %0 : vector<8x32xf32> to vector<8x32xbf16>
    %c0_1 = arith.constant 0 : index
    %c0_2 = arith.constant 0 : index
    %2 = vector.load %arg2[%c0_1, %c0_2] : memref<32x128xbf16, #tpu.memory_space<vmem>>, vector<32x128xbf16>
    %cst = arith.constant dense<0.000000e+00> : vector<8x128xf32>
    %3 = tpu.matmul %1, %2, %cst {dimension_numbers = #tpu.dot_dimension_numbers<[1], [0], [0], [1], [0, 0, 1, 1], [], []>} : vector<8x32xbf16>, vector<32x128xbf16>, vector<8x128xf32> -> vector<8x128xf32>
    %c0_3 = arith.constant 0 : index
    %c0_4 = arith.constant 0 : index
    %4 = vector.load %arg3[%c0_3, %c0_4] : memref<1x128xf32, #tpu.memory_space<vmem>>, vector<1x128xf32>
    %5 = vector.broadcast %4 : vector<1x128xf32> to vector<8x128xf32>
    %6 = arith.addf %3, %5 : vector<8x128xf32>
    %c0_5 = arith.constant 0 : index
    %c0_6 = arith.constant 0 : index
    %7 = vector.load %arg4[%c0_5, %c0_6] : memref<8x128xf32, #tpu.memory_space<vmem>>, vector<8x128xf32>
    tpu.vector_store %arg4[%c0_5, %c0_6], %6 {strides = array<i32>} : memref<8x128xf32, #tpu.memory_space<vmem>>, vector<8x128xf32>,
    return
  }
  func.func @transform_0(%arg0: i32) -> (i32, i32) {
    %c0_i32 = arith.constant 0 : i32
    %c0_i32_0 = arith.constant 0 : i32
    return %arg0, %c0_i32 : i32, i32
  }
  func.func @transform_1(%arg0: i32) -> (i32, i32) {
    %c0_i32 = arith.constant 0 : i32
    %c0_i32_0 = arith.constant 0 : i32
    %c0_i32_1 = arith.constant 0 : i32
    return %c0_i32, %c0_i32_0 : i32, i32
  }
  func.func @transform_2(%arg0: i32) -> (i32, i32) {
    %c0_i32 = arith.constant 0 : i32
    %c0_i32_0 = arith.constant 0 : i32
    %c0_i32_1 = arith.constant 0 : i32
    return %c0_i32, %c0_i32_0 : i32, i32
  }
  func.func @transform_3(%arg0: i32) -> (i32, i32) {
    %c0_i32 = arith.constant 0 : i32
    %c0_i32_0 = arith.constant 0 : i32
    return %arg0, %c0_i32 : i32, i32
  }
}

module attributes {stable_mosaic.version = 11 : i64} {
  func.func @_layernorm_kernel(%arg0: i32, %arg1: memref<8x32xf32, #tpu.memory_space<vmem>>, %arg2: memref<1x32xf32, #tpu.memory_space<vmem>>, %arg3: memref<1x32xf32, #tpu.memory_space<vmem>>, %arg4: memref<8x32xf32, #tpu.memory_space<vmem>>) attributes {dimension_semantics = [#tpu.dimension_semantics<parallel>], iteration_bounds = array<i64: 4>, scalar_prefetch = 0 : i64, scratch_operands = 0 : i64, tpu.core_type = #tpu.core_type<tc>, window_params = [{transform_indices = @transform_0, window_bounds = array<i64: 8, 32>}, {pipeline_mode = #tpu.pipeline_mode<synchronous>, transform_indices = @transform_1, window_bounds = array<i64: 1, 32>}, {pipeline_mode = #tpu.pipeline_mode<synchronous>, transform_indices = @transform_2, window_bounds = array<i64: 1, 32>}, {transform_indices = @transform_3, window_bounds = array<i64: 8, 32>}]} {
    %c0 = arith.constant 0 : index
    %c0_0 = arith.constant 0 : index
    %0 = vector.load %arg1[%c0, %c0_0] : memref<8x32xf32, #tpu.memory_space<vmem>>, vector<8x32xf32>
    %c0_1 = arith.constant 0 : index
    %c0_2 = arith.constant 0 : index
    %1 = vector.load %arg2[%c0_1, %c0_2] : memref<1x32xf32, #tpu.memory_space<vmem>>, vector<1x32xf32>
    %c0_3 = arith.constant 0 : index
    %c0_4 = arith.constant 0 : index
    %2 = vector.load %arg3[%c0_3, %c0_4] : memref<1x32xf32, #tpu.memory_space<vmem>>, vector<1x32xf32>
    %cst = arith.constant dense<0.000000e+00> : vector<8xf32>
    %3 = vector.multi_reduction <add>, %0, %cst [1] : vector<8x32xf32> to vector<8xf32>
    %4 = vector.shape_cast %3 : vector<8xf32> to vector<8x1xf32>
    %cst_5 = arith.constant 3.200000e+01 : f32
    %5 = vector.broadcast %cst_5 : f32 to vector<8x1xf32>
    %6 = arith.divf %4, %5 : vector<8x1xf32>
    %7 = vector.broadcast %6 : vector<8x1xf32> to vector<8x32xf32>
    %8 = arith.subf %0, %7 : vector<8x32xf32>
    %9 = arith.mulf %8, %8 : vector<8x32xf32>
    %cst_6 = arith.constant dense<0.000000e+00> : vector<8xf32>
    %10 = vector.multi_reduction <add>, %9, %cst_6 [1] : vector<8x32xf32> to vector<8xf32>
    %11 = vector.shape_cast %10 : vector<8xf32> to vector<8x1xf32>
    %cst_7 = arith.constant 3.200000e+01 : f32
    %12 = vector.broadcast %cst_7 : f32 to vector<8x1xf32>
    %13 = arith.divf %11, %12 : vector<8x1xf32>
    %cst_8 = arith.constant 9.99999974E-6 : f32
    %14 = vector.broadcast %cst_8 : f32 to vector<8x1xf32>
    %15 = arith.addf %13, %14 : vector<8x1xf32>
    %16 = math.rsqrt %15 : vector<8x1xf32>
    %17 = vector.broadcast %16 : vector<8x1xf32> to vector<8x32xf32>
    %18 = arith.mulf %8, %17 : vector<8x32xf32>
    %19 = vector.broadcast %1 : vector<1x32xf32> to vector<8x32xf32>
    %20 = arith.mulf %18, %19 : vector<8x32xf32>
    %21 = vector.broadcast %2 : vector<1x32xf32> to vector<8x32xf32>
    %22 = arith.addf %20, %21 : vector<8x32xf32>
    %c0_9 = arith.constant 0 : index
    %c0_10 = arith.constant 0 : index
    %23 = vector.load %arg4[%c0_9, %c0_10] : memref<8x32xf32, #tpu.memory_space<vmem>>, vector<8x32xf32>
    tpu.vector_store %arg4[%c0_9, %c0_10], %22 {strides = array<i32>} : memref<8x32xf32, #tpu.memory_space<vmem>>, vector<8x32xf32>,
    return
  }
  func.func @transform_0(%arg0: i32) -> (i32, i32) {
    %c0_i32 = arith.constant 0 : i32
    %c0_i32_0 = arith.constant 0 : i32
    return %arg0, %c0_i32 : i32, i32
  }
  func.func @transform_1(%arg0: i32) -> (i32, i32) {
    %c0_i32 = arith.constant 0 : i32
    %c0_i32_0 = arith.constant 0 : i32
    %c0_i32_1 = arith.constant 0 : i32
    return %c0_i32, %c0_i32_0 : i32, i32
  }
  func.func @transform_2(%arg0: i32) -> (i32, i32) {
    %c0_i32 = arith.constant 0 : i32
    %c0_i32_0 = arith.constant 0 : i32
    %c0_i32_1 = arith.constant 0 : i32
    return %c0_i32, %c0_i32_0 : i32, i32
  }
  func.func @transform_3(%arg0: i32) -> (i32, i32) {
    %c0_i32 = arith.constant 0 : i32
    %c0_i32_0 = arith.constant 0 : i32
    return %arg0, %c0_i32 : i32, i32
  }
}

</mosaic_0001>

<bundles_post_ra>
// kernel: tpu_custom_call.1
= control target key start
LH: loop header
LB: loop body
LE: loop exit
PB: predicated region body
PF: predicated region fallthrough
CT: control target
= control target key end

     0   :  { %6 = vsyncpa [#allocation3], 0  ;;  %s441_s0 = inlined_call_operand.hbm [shape: f32[8,128], index: 0, kind: input, shape index: {}]   ;;  %s442_s1 = inlined_call_operand.hbm [shape: f32[16,128], index: 1, kind: output, shape index: {}]  }
   0x1   :  { %7 = vsyncpa [#allocation4], 0 }
   0x2   :  { %9 = vsyncpa [#allocation4 + $0x1], 0  ;;  %s357_s6 = smov 0   ;;  %s359_s7 = smov 0  }
   0x3   :  { %s361_s8 = smov 0   ;;  %s363_s9 = smov 0  }
   0x4 LB: > { %s378_s10 = sadd.s32 4294967295, %s344_s9   ;;  %s188_s11 = sadd.s32 4294967294, %s344_s9   ;;  %s344_s9 = sphi %s363_s9, %s448_s9   ;;  %s340_s8 = sphi %s361_s8, %s447_s8   ;;  %s336_s7 = sphi %s359_s7, %s446_s7   ;;  %s332_s6 = sphi %s357_s6, %s445_s6  }
   0x5   : > { %s382_s12 = sadd.s32 1, %s344_s9   ;;  %s43_s13 = sadd.s32 1, %s340_s8 }
   0x6   : > { %s40_s14 = ssub.s32 %s344_s9, %s382_s12  ;;  %p53_p0 = scmp.ne.s32.totalorder %s340_s8, %s336_s7 }
   0x7   : > { %p41_p1 = scmp.eq.s32.totalorder %s40_s14, 0  ;;  %p54_p2 = scmp.eq.s32.totalorder %s378_s10, 1 }
   0x8   : > { %p59_p3 = scmp.ne.s32.totalorder %s336_s7, %s332_s6  ;;  %p60_p4 = scmp.eq.s32.totalorder %s188_s11, 1 }
   0x9   : > { %s393_s15 = scalar_select %p41_p1, %s340_s8, %s43_s13  }
   0xa   : > { %p395_p5 = por %p54_p2, %p53_p0  ;;  %p399_p6 = por %p60_p4, %p59_p3 }
   0xb   : > { %p189_p7 = scmp.ge.s32.totalorder %s344_s9, 1  ;;  %p67_p8 = scmp.lt.s32.totalorder %s344_s9, 3 }
   0xc   : > { %p212_p9 = scmp.eq.s32.totalorder %s378_s10, 0  ;;  %s79_s20 = sshll.u32 %s441_s0, 4  ;;  %s80_s20 = int_to_ptr.hbm [resolvable:$true] %s79_s20 }
   0xd   : > { %p68_p10 = pnand %p189_p7, %p67_p8  ;;  %s346_s21 = smov [#allocation2]  }
   0xe   : > { %s81_s22 = sshll.u32 %s346_s21, 4  ;;  %s82_s22 = int_to_ptr.vmem [resolvable:$true] %s81_s22 }
   0xf   : > { %p204_p11 = pneg %p68_p10  ;;  %94 = sbr.rel (%p68_p10) target bundleno = 37 (0x25), region = 24 }
  0x11   : > { %p205_p12 = pnand %p212_p9, %p204_p11 }
  0x13   : > { %207 = dma.hbm_to_vmem [thread:$0]  (!%p205_p12), %s80_s20, 128, %s82_s22, [#allocation3]  }
  0x14   : > { %323 = dma.done.wait (%p212_p9), [#allocation3], 128  }
  0x15   : > { %325 = vsyncadd (%p212_p9), [#allocation3], 4294967168  ;;  %s107_s23 = sand.u32 1, %s336_s7   ;;  %s195_s24 = sshll.u32 %s378_s10, 3  ;;  %v110_v0 = vld [vmem:[#allocation2] sm:$0xff] }
  0x16   : > { %s193_s25 = sshll.u32 %s107_s23, 3  ;;  %s124_s28 = scalar_lea.hbm %s442_s1, %s195_s24  ;;  %v111_v1 = vadd.f32 1.0, %v110_v0 }
  0x17   : > { %s109_s29 = scalar_lea.vmem [#allocation5], %s193_s25  ;;  %s128_s2 = sshll.u32 %s124_s28, 4  ;;  %s129_s2 = int_to_ptr.hbm [resolvable:$true] %s128_s2 }
  0x18   : > { %s126_s30 = sshll.u32 %s109_s29, 4  ;;  %112 = vst [vmem:[%s109_s29] sm:$0xff] %v111_v1  ;;  %s114_s3 = scalar_lea.sflag [#allocation4], %s107_s23  ;;  %s127_s30 = int_to_ptr.vmem [resolvable:$true] %s126_s30 }
  0x19   : > { %s292_s4 = sshra.s32 %s129_s2, 4  ;;  %s298_s13 = scalar_lea.hbm %s442_s1, 16  ;;  %s293_s4 = int_to_ptr.hbm [resolvable:$true] %s292_s4 }
  0x1a   : > { %s294_s5 = scalar_lea.hbm %s293_s4, 8  ;;  %p299_p2 = scmp.lt.s32.totalorder %s293_s4, %s442_s1 }
  0x1b   : > { %p295_p13 = scmp.ne.s32.totalorder %s293_s4, %s294_s5  ;;  %p300_p3 = scmp.lt.s32.totalorder %s298_s13, %s294_s5 }
  0x1d   : > { %p296_p0 = pnand %p295_p13, %p395_p5  ;;  %p301_p4 = por %p300_p3, %p299_p2 }
  0x1f   : > { %p297_p1 = pneg %p296_p0 }
  0x21   : > { %p302_p7 = pnand %p301_p4, %p297_p1 }
  0x23   : > { %305 = shalt.err (!%p302_p7)
}
  0x24   : > { %202 = dma.vmem_to_hbm [thread:$0]  (%p395_p5), %s127_s30, 128, %s129_s2, %s114_s3  }
  0x25 PF: > { %p214_p8 = scmp.ge.s32.totalorder %s344_s9, 2  ;;  %s140_s19 = sand.u32 1, %s332_s6  }
  0x26   : > { %s141_s20 = scalar_lea.sflag [#allocation4], %s140_s19 }
  0x27   : > { %p209_p9 = pnand %p214_p8, %p399_p6 }
  0x29   : > { %p210_p10 = pneg %p209_p9 }
  0x2b   : > { %327 = dma.done.wait (%p210_p10), %s141_s20, 128  }
  0x2c   : > { %329 = vsyncadd (%p210_p10), %s141_s20, 4294967168  ;;  %p12_p11 = scmp.ge.s32.totalorder %s382_s12, 4   ;;  %s445_s6 = smov %s336_s7 }
  0x2d   : > { %s446_s7 = smov %s340_s8  ;;  %s447_s8 = smov %s393_s15 }
  0x2e   : > { %s448_s9 = smov %s382_s12  ;;  %14 = sbr.rel (!%p12_p11) target bundleno = 4 (0x4), region = 61 }
  0x33   :  { %147 = vsyncpa [#allocation3], 1 }
  0x34   :  { %149 = vsyncpa [#allocation3 + $0x1], 1 }
  0x35   :  { %150 = vsyncpa [#allocation4], 1 }
  0x36   :  { %152 = vsyncpa [#allocation4 + $0x1], 1 }

// kernel: denceformer_forward.19
= control target key start
LH: loop header
LB: loop body
LE: loop exit
PB: predicated region body
PF: predicated region fallthrough
CT: control target
= control target key end

     0   :  { %s430_s18 = smov 0   ;;  %s469_s0 = inlined_call_operand.vmem [shape: f32[32,32], index: 0, kind: input, shape index: {}]   ;;  %s470_s1 = inlined_call_operand.vmem [shape: f32[1,32], index: 1, kind: input, shape index: {}]   ;;  %s471_s2 = inlined_call_operand.vmem [shape: f32[1,32], index: 2, kind: input, shape index: {}]   ;;  %s472_s3 = inlined_call_operand.vmem [shape: bf16[32,96], index: 3, kind: input, shape index: {}]   ;;  %s473_s4 = inlined_call_operand.vmem [shape: f32[1,96], index: 4, kind: input, shape index: {}]   ;;  %s474_s5 = inlined_call_operand.vmem [shape: bf16[32,96], index: 5, kind: output, shape index: {}]  }
   0x1 LB: > { %s355_s19 = sadd.s32 4294967295, %s397_s18   ;;  %p359_p0 = scmp.ge.s32.totalorder %s397_s18, 1  ;;  %s397_s18 = sphi %s430_s18, %s15_s18  }
   0x2   : > { %p186_p1 = scmp.lt.s32.totalorder %s397_s18, 5 }
   0x4   : > { %p187_p2 = pnand %p359_p0, %p186_p1 }
   0x5   : > { %p212_p3 = scmp.lt.s32.totalorder (!%p187_p2), %s355_s19, 3 }
   0x6   : > { %190 = sbr.rel (%p187_p2) target bundleno = 419 (0x1a3), region = 40 }
   0xb   : > { %s476_s19 = smov (!%p212_p3, %s355_s19), 3  ;;  %vm224_vm0 = vcmask 261120   ;;  %v399_v2 = vmov 32.0   ;;  %v374_v14 = vld [vmem:[%s472_s3 + $0x8] sm:$0xff]  ;;  %v373_v15 = vld [vmem:[%s472_s3] sm:$0xff]  ;;  %vm300_vm5 = vcmask 781312  }
   0xc   : > { %s360_s20 = sshll.u32 %s476_s19, 3  ;;  %387 = vrcp.f32 %v399_v2  ;;  %292 = vmatpush.bf16.msra.mxu0 %v374_v14  ;;  %v384_v25 = vld [vmem:[%s470_s1] ss:$0 sm:$0xff]  ;;  %s361_s9 = sshll.u32 %s476_s19, 2 }
   0xd   : > { %s215_s23 = scalar_lea.vmem %s469_s0, %s360_s20  ;;  %v385_v28 = vld [vmem:[%s471_s2] ss:$0 sm:$0xff]  ;;  %s219_s12 = scalar_lea.vmem %s474_s5, %s361_s9 }
   0xe   : > { %v221_v0 = vld [vmem:[%s215_s23] sm:$0xff] }
   0xf   : > { %v225_v1 = vsel %vm224_vm0, %v221_v0, 0.0  ;;  %v386_v32 = vld [vmem:[%s473_s4] ss:$0 sm:$0xff] }
  0x10   : > { %226 = vadd.xlane.f32.xlu0 %v225_v1  ;;  %293 = vmatpush.bf16.msra.mxu0 %v373_v15 }
  0x12   : > { %v388_v3 = vpop.eup %387 }
  0x13   : > { %v229_v4 = vmul.f32 32.0, %v388_v3  ;;  %vm233_vm1 = vweird.f32 %v388_v3 }
  0x15   : > { %v230_v5 = vsub.f32 1.0, %v229_v4 }
  0x17   : > { %v231_v6 = vmul.f32 %v388_v3, %v230_v5 }
  0x19   : > { %v232_v7 = vadd.f32 %v388_v3, %v231_v6 }
  0x1b   : > { %v234_v8 = vsel %vm233_vm1, %v388_v3, %v232_v7 }
  0x83   : > { %v227_v9 = vpop.xlane.xlu0 %226 }
  0x84   : > { %v235_v10 = vmul.f32 %v234_v8, %v227_v9 }
  0x86   : > { %v236_v11 = vsub.f32 %v221_v0, %v235_v10 }
  0x88   : > { %v237_v12 = vmul.f32 %v236_v11, %v236_v11 }
  0x8a   : > { %v238_v13 = vsel %vm224_vm0, %v237_v12, 0.0 }
  0x8b   : > { %239 = vadd.xlane.f32.xlu0 %v238_v13 }
  0xfe   : > { %v240_v16 = vpop.xlane.xlu0 %239 }
  0xff   : > { %v241_v17 = vmul.f32 %v240_v16, %v234_v8 }
 0x101   : > { %v242_v18 = vadd.f32 1e-05, %v241_v17 }
 0x103   : > { %389 = vrsqrt.f32 %v242_v18  ;;  %vm249_vm3 = vweird.f32 %v242_v18 }
 0x109   : > { %v390_v19 = vpop.eup %389 }
 0x10a   : > { %v244_v20 = vmul.f32 %v390_v19, %v242_v18  ;;  %vm250_vm2 = vweird.f32 %v390_v19 }
 0x10b   : > { %vm251_vm4 = vmor %vm249_vm3, %vm250_vm2 }
 0x10c   : > { %v245_v21 = vmul.f32 %v390_v19, %v244_v20 }
 0x10e   : > { %v246_v22 = vmul.f32 0.5, %v245_v21 }
 0x110   : > { %v247_v23 = vsub.f32 1.5, %v246_v22 }
 0x112   : > { %v248_v24 = vmul.f32 %v390_v19, %v247_v23 }
 0x114   : > { %v252_v26 = vsel %vm251_vm4, %v390_v19, %v248_v24 }
 0x115   : > { %v253_v27 = vmul.f32 %v252_v26, %v236_v11 }
 0x117   : > { %v257_v29 = vmul.f32 %v384_v25, %v253_v27 }
 0x119   : > { %v261_v30 = vadd.f32 %v385_v28, %v257_v29 }
 0x11b   : > { %v262_v31 = vpack.c.bf16 %v261_v30, %v261_v30 }
 0x11d   : > { %370 = vmatmul.msk.bf16.vlgmr.msra.gmra.mxu0 %vm224_vm0, %v262_v31 }
 0x19a   : > { %v295_v33 = vpop.f32.mrf.mxu0 }
 0x19b   : > { %v296_v34 = vadd.f32 %v386_v32, %v295_v33 }
 0x19d   : > { %v299_v35 = vpack.c.bf16 %v296_v34, %v296_v34 }
 0x19f   : > { %301 = vst.msk [vmem:[%s219_s12] sm:$0xf] %vm300_vm5, %v299_v35 }
 0x1a2   : > { %v297_v36 = vpop.f32.mrf.mxu0 }
 0x1a3 PF: > { %s15_s18 = sadd.s32 1, %s397_s18  }
 0x1a4   : > { %p12_p4 = scmp.ge.s32.totalorder %s15_s18, 6  }
 0x1a6   :  { %14 = sbr.rel (!%p12_p4) target bundleno = 1 (0x1), region = 70 }

// kernel: denceformer_forward.18
= control target key start
LH: loop header
LB: loop body
LE: loop exit
PB: predicated region body
PF: predicated region fallthrough
CT: control target
= control target key end

     0   :  { %s813_s24 = smov 0   ;;  %s815_s25 = smov 0   ;;  %s906_s0 = inlined_call_operand.vmem [shape: f32[32,32], index: 0, kind: input, shape index: {}]   ;;  %s907_s1 = inlined_call_operand.vmem [shape: f32[1,32], index: 1, kind: input, shape index: {}]   ;;  %s908_s2 = inlined_call_operand.vmem [shape: f32[1,32], index: 2, kind: input, shape index: {}]   ;;  %s909_s3 = inlined_call_operand.vmem [shape: bf16[32,128], index: 3, kind: input, shape index: {}]   ;;  %s910_s4 = inlined_call_operand.vmem [shape: f32[1,128], index: 4, kind: input, shape index: {}]   ;;  %s911_s5 = inlined_call_operand.vmem [shape: bf16[128,32], index: 5, kind: input, shape index: {}]   ;;  %s912_s6 = inlined_call_operand.vmem [shape: f32[1,32], index: 6, kind: input, shape index: {}]   ;;  %s913_s7 = inlined_call_operand.vmem [shape: f32[32,32], index: 7, kind: output, shape index: {}]  }
   0x1   :  { %s817_s26 = smov 0  }
   0x2 LB: > { %s29_s27 = sadd.s32 1, %s765_s25  ;;  %p652_p0 = scmp.ge.s32.totalorder %s769_s26, 1  ;;  %s769_s26 = sphi %s817_s26, %s17_s26   ;;  %s765_s25 = sphi %s815_s25, %s915_s25   ;;  %s761_s24 = sphi %s813_s24, %s914_s24  }
   0x3   : > { %p31_p1 = scmp.ge.s32.totalorder %s29_s27, 4  ;;  %p276_p2 = scmp.lt.s32.totalorder %s769_s26, 5 }
   0x5   : > { %s917_s27 = smov (%p31_p1, %s29_s27), 0  ;;  %p277_p3 = pnand %p652_p0, %p276_p2 }
   0x6   : > { %p318_p4 = scmp.lt.s32.totalorder (!%p277_p3), %s761_s24, 3 }
   0x7   : > { %280 = sbr.rel (%p277_p3) target bundleno = 597 (0x255), region = 48 }
   0xc   : > { %s919_s24 = smov (!%p318_p4, %s761_s24), 3  ;;  %vm347_vm0 = vcmask 261120   ;;  %v771_v2 = vmov 32.0   ;;  %v700_v14 = vld [vmem:[%s909_s3 + $0x8] sm:$0xff]  ;;  %v699_v16 = vld [vmem:[%s909_s3] sm:$0xff]  ;;  %vm386_vm5 = vcmask 257024  }
   0xd   : > { %s653_s28 = sshll.u32 %s919_s24, 3  ;;  %739 = vrcp.f32 %v771_v2  ;;  %420 = vmatpush.bf16.msra.mxu0 %v700_v14  ;;  %v735_v25 = vld [vmem:[%s907_s1] ss:$0 sm:$0xff]  ;;  %v708_v33 = vld [vmem:[%s911_s5 + $0x38] sm:$0xff]  ;;  %v707_v34 = vld [vmem:[%s911_s5 + $0x30] sm:$0xff]  ;;  %v772_v45 = vmov 0.0  }
   0xe   : > { %s321_s8 = scalar_lea.vmem %s906_s0, %s653_s28  ;;  %v736_v27 = vld [vmem:[%s908_s2] ss:$0 sm:$0xff]  ;;  %513 = vmatpush.bf16.msra.mxu1 %v708_v33  ;;  %v706_v35 = vld [vmem:[%s911_s5 + $0x28] sm:$0xff]  ;;  %v704_v37 = vld [vmem:[%s911_s5 + $0x18] sm:$0xff]  ;;  %388 = vst.msk [vmem:[#allocation3] sm:$0xff] %vm347_vm0, %v772_v45  ;;  %s338_s21 = scalar_lea.vmem %s913_s7, %s653_s28 }
   0xf   : > { %v839_v0 = vld [vmem:[%s321_s8] sm:$0xff]  ;;  %v703_v38 = vld [vmem:[%s911_s5 + $0x10] sm:$0xff]  ;;  %v702_v39 = vld [vmem:[%s911_s5 + $0x8] sm:$0xff] }
  0x10   : > { %v348_v1 = vsel %vm347_vm0, %v839_v0, 0.0  ;;  %v705_v36 = vld [vmem:[%s911_s5 + $0x20] sm:$0xff] }
  0x11   : > { %349 = vadd.xlane.f32.xlu0 %v348_v1  ;;  %421 = vmatpush.bf16.msra.mxu0 %v699_v16  ;;  %v701_v40 = vld [vmem:[%s911_s5] sm:$0xff] }
  0x12   : > { %514 = vmatpush.bf16.msra.mxu1 %v707_v34  ;;  %v737_v41 = vld [vmem:[%s910_s4] ss:$0 sm:$0xff] }
  0x13   : > { %v740_v3 = vpop.eup %739  ;;  %v738_v1 = vld [vmem:[%s912_s6] ss:$0 sm:$0xff] }
  0x14   : > { %v352_v4 = vmul.f32 32.0, %v740_v3  ;;  %vm356_vm1 = vweird.f32 %v740_v3 }
  0x15   : > { %v447_v61 = vld [vmem:[#allocation3] sm:$0xff] }
  0x16   : > { %v353_v5 = vsub.f32 1.0, %v352_v4  ;;  %515 = vmatpush.bf16.msra.mxu1 %v706_v35 }
  0x18   : > { %v354_v6 = vmul.f32 %v740_v3, %v353_v5 }
  0x1a   : > { %v355_v7 = vadd.f32 %v740_v3, %v354_v6  ;;  %516 = vmatpush.bf16.msra.mxu1 %v705_v36 }
  0x1c   : > { %v357_v8 = vsel %vm356_vm1, %v740_v3, %v355_v7 }
  0x1e   : > { %517 = vmatpush.bf16.msra.mxu1 %v704_v37 }
  0x22   : > { %518 = vmatpush.bf16.msra.mxu1 %v703_v38 }
  0x26   : > { %519 = vmatpush.bf16.msra.mxu1 %v702_v39 }
  0x2a   : > { %520 = vmatpush.bf16.msra.mxu1 %v701_v40 }
  0x84   : > { %v350_v9 = vpop.xlane.xlu0 %349 }
  0x85   : > { %v358_v10 = vmul.f32 %v357_v8, %v350_v9 }
  0x87   : > { %v359_v11 = vsub.f32 %v839_v0, %v358_v10 }
  0x89   : > { %v360_v12 = vmul.f32 %v359_v11, %v359_v11 }
  0x8b   : > { %v361_v13 = vsel %vm347_vm0, %v360_v12, 0.0 }
  0x8c   : > { %362 = vadd.xlane.f32.xlu0 %v361_v13 }
  0xff   : > { %v363_v15 = vpop.xlane.xlu0 %362 }
 0x100   : > { %v364_v17 = vmul.f32 %v363_v15, %v357_v8 }
 0x102   : > { %v365_v18 = vadd.f32 1e-05, %v364_v17 }
 0x104   : > { %741 = vrsqrt.f32 %v365_v18  ;;  %vm372_vm3 = vweird.f32 %v365_v18 }
 0x10a   : > { %v742_v19 = vpop.eup %741 }
 0x10b   : > { %v367_v20 = vmul.f32 %v742_v19, %v365_v18  ;;  %vm373_vm2 = vweird.f32 %v742_v19 }
 0x10c   : > { %vm374_vm4 = vmor %vm372_vm3, %vm373_vm2 }
 0x10d   : > { %v368_v21 = vmul.f32 %v742_v19, %v367_v20 }
 0x10f   : > { %v369_v22 = vmul.f32 0.5, %v368_v21 }
 0x111   : > { %v370_v23 = vsub.f32 1.5, %v369_v22 }
 0x113   : > { %v371_v24 = vmul.f32 %v742_v19, %v370_v23 }
 0x115   : > { %v375_v26 = vsel %vm374_vm4, %v742_v19, %v371_v24 }
 0x116   : > { %v376_v28 = vmul.f32 %v375_v26, %v359_v11 }
 0x118   : > { %v380_v29 = vmul.f32 %v735_v25, %v376_v28 }
 0x11a   : > { %v384_v30 = vadd.f32 %v736_v27, %v380_v29 }
 0x11c   : > { %v385_v31 = vpack.c.bf16 %v384_v30, %v384_v30 }
 0x11e   : > { %387 = vst.msk [vmem:[#allocation2] sm:$0xf] %vm386_vm5, %v385_v31 }
 0x125   : > { %v389_v32 = vld [vmem:[#allocation2] sm:$0xf] }
 0x126   : > { %663 = vmatmul.msk.bf16.vlgmr.msra.gmra.mxu0 %vm347_vm0, %v389_v32 }
 0x1a3   : > { %v423_v42 = vpop.f32.mrf.mxu0 }
 0x1a4   : > { %v424_v43 = vadd.f32 %v737_v41, %v423_v42 }
 0x1a6   : > { %v664_v44 = vmul.f32 -1.442695, %v424_v43 }
 0x1a8   : > { %743 = vpow2.f32 %v664_v44 }
 0x1ab   : > { %v425_v46 = vpop.f32.mrf.mxu0 }
 0x1ae   : > { %v744_v47 = vpop.eup %743 }
 0x1af   : > { %v430_v48 = vadd.f32 1.0, %v744_v47 }
 0x1b1   : > { %745 = vrcp.f32 %v430_v48  ;;  %v442_v52 = vand.u32 2147483648, %v430_v48  ;;  %v440_v54 = vand.u32 2147483647, %v430_v48  ;;  %vm436_vm7 = vweird.f32 %v430_v48 }
 0x1b3   : > { %v443_v56 = vor.u32 1.1754944e-38, %v442_v52  ;;  %vm441_vm9 = vcmp.eq.f32.partialorder %v440_v54, 8.507059e+37 }
 0x1b7   : > { %v746_v49 = vpop.eup %745 }
 0x1b8   : > { %v432_v50 = vmul.f32 %v746_v49, %v430_v48  ;;  %vm437_vm6 = vweird.f32 %v746_v49 }
 0x1b9   : > { %vm438_vm8 = vmor %vm436_vm7, %vm437_vm6 }
 0x1ba   : > { %v433_v51 = vsub.f32 1.0, %v432_v50 }
 0x1bc   : > { %v434_v53 = vmul.f32 %v746_v49, %v433_v51 }
 0x1be   : > { %v435_v55 = vadd.f32 %v746_v49, %v434_v53 }
 0x1c0   : > { %v439_v57 = vsel %vm438_vm8, %v746_v49, %v435_v55 }
 0x1c1   : > { %v444_v58 = vsel %vm441_vm9, %v443_v56, %v439_v57 }
 0x1c2   : > { %v446_v59 = vmul.f32 %v444_v58, %v424_v43 }
 0x1c4   : > { %v448_v60 = vpack.c.bf16 %v446_v59, %v446_v59 }
 0x1c6   : > { %521 = vmatmul.bf16.vlgmr.msra.gmra.mxu1 %v448_v60 }
 0x243   : > { %v522_v62 = vpop.f32.mrf.mxu1 }
 0x244   : > { %v526_v63 = vadd.f32 %v522_v62, %v447_v61 }
 0x246   : > { %527 = vst.msk [vmem:[#allocation3] sm:$0xff] %vm347_vm0, %v526_v63 }
 0x24b   : > { %v524_v2 = vpop.f32.mrf.mxu1 }
 0x24d   : > { %v532_v3 = vld [vmem:[#allocation3] sm:$0xff] }
 0x24e   : > { %v537_v4 = vadd.f32 %v738_v1, %v532_v3 }
 0x250   : > { %v538_v5 = vmul.f32 0.5, %v537_v4 }
 0x252   : > { %v539_v6 = vadd.f32 %v538_v5, %v839_v0 }
 0x254   : > { %540 = vst.msk [vmem:[%s338_s21] sm:$0xff] %vm347_vm0, %v539_v6 }
 0x255 PF: > { %s17_s26 = sadd.s32 1, %s769_s26   ;;  %s914_s24 = smov %s765_s25 }
 0x256   : > { %p14_p5 = scmp.ge.s32.totalorder %s17_s26, 6   ;;  %s915_s25 = smov %s917_s27 }
 0x258   :  { %16 = sbr.rel (!%p14_p5) target bundleno = 2 (0x2), region = 95 }

// kernel: denceformer_forward.20
= control target key start
LH: loop header
LB: loop body
LE: loop exit
PB: predicated region body
PF: predicated region fallthrough
CT: control target
= control target key end

     0   :  { %vm41_vm0 = vcmask 261120   ;;  %vm70_vm1 = vcmask 260096   ;;  %s149_s1 = inlined_call_operand.vmem [shape: bf16[32,32], index: 1, kind: input, shape index: {}]   ;;  %s150_s0 = inlined_call_operand.vmem [shape: f32[31,32], index: 0, kind: input, shape index: {}]   ;;  %s151_s2 = inlined_call_operand.vmem [shape: f32[1,32], index: 2, kind: input, shape index: {}]   ;;  %s152_s3 = inlined_call_operand.vmem [shape: f32[31,32], index: 3, kind: output, shape index: {}]  }
   0x1   :  { %v87_v0 = vld [vmem:[%s149_s1 + $0x8] sm:$0xff]  ;;  %v86_v1 = vld [vmem:[%s149_s1] sm:$0xff]  ;;  %v17_v4 = vld [vmem:[%s150_s0 + $0x10] sm:$0xff] }
   0x2   :  { %v15_v2 = vld [vmem:[%s150_s0] sm:$0xff]  ;;  %v16_v3 = vld [vmem:[%s150_s0 + $0x8] sm:$0xff]  ;;  %54 = vmatpush.bf16.msra.mxu0 %v87_v0  ;;  %88 = vmatpush.bf16.msra.mxu1 %v87_v0  ;;  %v18_v5 = vld [vmem:[%s150_s0 + $0x18] sm:$0x7f] }
   0x3   :  { %v19_v6 = vpack.c.bf16 %v16_v3, %v15_v2  ;;  %v20_v7 = vpack.c.bf16 %v18_v5, %v17_v4  ;;  %v90_v8 = vld [vmem:[%s151_s2] ss:$0 sm:$0xff] }
   0x6   :  { %55 = vmatpush.bf16.msra.mxu0 %v86_v1  ;;  %89 = vmatpush.bf16.msra.mxu1 %v86_v1 }
   0x9   :  { %84 = vmatmul.msk.bf16.vlgmr.msra.gmra.mxu0 %vm41_vm0, %v19_v6  ;;  %85 = vmatmul.msk.bf16.vlgmr.msra.gmra.mxu1 %vm41_vm0, %v20_v7 }
  0x86   :  { %v57_v9 = vpop.f32.mrf.mxu0  ;;  %v62_v10 = vpop.f32.mrf.mxu1 }
  0x87   :  { %v58_v11 = vadd.f32 %v90_v8, %v57_v9  ;;  %v63_v12 = vadd.f32 %v90_v8, %v62_v10 }
  0x89   :  { %67 = vst.msk [vmem:[%s152_s3] sm:$0xff] %vm41_vm0, %v58_v11 }
  0x8a   :  { %69 = vst.msk [vmem:[%s152_s3 + $0x10] sm:$0xff] %vm41_vm0, %v63_v12 }
  0x8e   :  { %v59_v13 = vpop.f32.mrf.mxu0  ;;  %v64_v14 = vpop.f32.mrf.mxu1 }
  0x8f   :  { %v60_v15 = vadd.f32 %v90_v8, %v59_v13  ;;  %v65_v16 = vadd.f32 %v90_v8, %v64_v14 }
  0x91   :  { %68 = vst.msk [vmem:[%s152_s3 + $0x8] sm:$0xff] %vm41_vm0, %v60_v15 }
  0x92   :  { %71 = vst.msk [vmem:[%s152_s3 + $0x18] sm:$0x7f] %vm70_vm1, %v65_v16 }

// kernel: denceformer_forward.24
= control target key start
LH: loop header
LB: loop body
LE: loop exit
PB: predicated region body
PF: predicated region fallthrough
CT: control target
= control target key end

     0   :  { %s483_s21 = smov 0   ;;  %s523_s0 = inlined_call_operand.vmem [shape: f32[32,32], index: 0, kind: input, shape index: {}]   ;;  %s524_s1 = inlined_call_operand.vmem [shape: f32[32,32], index: 1, kind: input, shape index: {}]   ;;  %s525_s2 = inlined_call_operand.vmem [shape: f32[1,32], index: 2, kind: input, shape index: {}]   ;;  %s526_s3 = inlined_call_operand.vmem [shape: f32[1,32], index: 3, kind: input, shape index: {}]   ;;  %s527_s4 = inlined_call_operand.vmem [shape: bf16[32,32], index: 4, kind: input, shape index: {}]   ;;  %s528_s5 = inlined_call_operand.vmem [shape: f32[1,32], index: 5, kind: input, shape index: {}]   ;;  %s529_s6 = inlined_call_operand.vmem [shape: f32[32,32], index: 6, kind: output, shape index: {}]  }
   0x1 LB: > { %s403_s22 = sadd.s32 4294967295, %s446_s21   ;;  %p407_p0 = scmp.ge.s32.totalorder %s446_s21, 1  ;;  %s446_s21 = sphi %s483_s21, %s16_s21  }
   0x2   : > { %p220_p1 = scmp.lt.s32.totalorder %s446_s21, 5 }
   0x4   : > { %p221_p2 = pnand %p407_p0, %p220_p1 }
   0x5   : > { %p252_p3 = scmp.lt.s32.totalorder (!%p221_p2), %s403_s22, 3 }
   0x6   : > { %224 = sbr.rel (%p221_p2) target bundleno = 185 (0xb9), region = 44 }
   0xb   : > { %v424_v0 = vld [vmem:[%s527_s4 + $0x8] sm:$0xff]  ;;  %v423_v1 = vld [vmem:[%s527_s4] sm:$0xff]  ;;  %s531_s22 = smov (!%p252_p3, %s403_s22), 3  ;;  %vm313_vm4 = vcmask 261120  }
   0xc   : > { %323 = vmatpush.bf16.msra.mxu0 %v424_v0  ;;  %v433_v2 = vld [vmem:[%s525_s2] ss:$0 sm:$0xff]  ;;  %s500_s29 = sshll.u32 %s531_s22, 3 }
   0xd   : > { %s259_s8 = scalar_lea.vmem %s524_s1, %s500_s29  ;;  %v434_v3 = vld [vmem:[%s526_s3] ss:$0 sm:$0xff]  ;;  %s255_s13 = scalar_lea.vmem %s523_s0, %s500_s29 }
   0xe   : > { %v265_v4 = vld [vmem:[%s259_s8] sm:$0xff]  ;;  %s263_s18 = scalar_lea.vmem %s529_s6, %s500_s29 }
   0xf   : > { %v270_v5 = vmul.f32 %v433_v2, %v265_v4  ;;  %v330_v22 = vld [vmem:[%s255_s13] sm:$0xff] }
  0x10   : > { %324 = vmatpush.bf16.msra.mxu0 %v423_v1  ;;  %v435_v23 = vld [vmem:[%s528_s5] ss:$0 sm:$0xff] }
  0x11   : > { %v275_v6 = vadd.f32 %v434_v3, %v270_v5 }
  0x13   : > { %v411_v7 = vmul.f32 -1.442695, %v275_v6 }
  0x15   : > { %436 = vpow2.f32 %v411_v7 }
  0x1b   : > { %v437_v8 = vpop.eup %436 }
  0x1c   : > { %v279_v9 = vadd.f32 1.0, %v437_v8 }
  0x1e   : > { %438 = vrcp.f32 %v279_v9  ;;  %v291_v12 = vand.u32 2147483648, %v279_v9  ;;  %vm285_vm0 = vweird.f32 %v279_v9  ;;  %v289_v14 = vand.u32 2147483647, %v279_v9 }
  0x20   : > { %v292_v16 = vor.u32 1.1754944e-38, %v291_v12  ;;  %vm290_vm3 = vcmp.eq.f32.partialorder %v289_v14, 8.507059e+37 }
  0x24   : > { %v439_v10 = vpop.eup %438 }
  0x25   : > { %v281_v11 = vmul.f32 %v439_v10, %v279_v9  ;;  %vm286_vm1 = vweird.f32 %v439_v10 }
  0x26   : > { %vm287_vm2 = vmor %vm285_vm0, %vm286_vm1 }
  0x27   : > { %v282_v13 = vsub.f32 1.0, %v281_v11 }
  0x29   : > { %v283_v15 = vmul.f32 %v439_v10, %v282_v13 }
  0x2b   : > { %v284_v17 = vadd.f32 %v439_v10, %v283_v15 }
  0x2d   : > { %v288_v18 = vsel %vm287_vm2, %v439_v10, %v284_v17 }
  0x2e   : > { %v293_v19 = vsel %vm290_vm3, %v292_v16, %v288_v18 }
  0x2f   : > { %v295_v20 = vmul.f32 %v293_v19, %v275_v6 }
  0x31   : > { %v296_v21 = vpack.c.bf16 %v295_v20, %v295_v20 }
  0x33   : > { %420 = vmatmul.msk.bf16.vlgmr.msra.gmra.mxu0 %vm313_vm4, %v296_v21 }
  0xb0   : > { %v326_v24 = vpop.f32.mrf.mxu0 }
  0xb1   : > { %v331_v25 = vadd.f32 %v330_v22, %v326_v24 }
  0xb3   : > { %v336_v26 = vadd.f32 %v435_v23, %v331_v25 }
  0xb5   : > { %337 = vst.msk [vmem:[%s263_s18] sm:$0xff] %vm313_vm4, %v336_v26 }
  0xb8   : > { %v328_v27 = vpop.f32.mrf.mxu0 }
  0xb9 PF: > { %s16_s21 = sadd.s32 1, %s446_s21  }
  0xba   : > { %p13_p4 = scmp.ge.s32.totalorder %s16_s21, 6  }
  0xbc   :  { %15 = sbr.rel (!%p13_p4) target bundleno = 1 (0x1), region = 77 }

// kernel: denceformer_forward.22
= control target key start
LH: loop header
LB: loop body
LE: loop exit
PB: predicated region body
PF: predicated region fallthrough
CT: control target
= control target key end

     0   :  { %s562_s24 = smov 0   ;;  %s615_s0 = inlined_call_operand.vmem [shape: f32[32,32], index: 0, kind: input, shape index: {}]   ;;  %s616_s1 = inlined_call_operand.vmem [shape: f32[1,32], index: 1, kind: input, shape index: {}]   ;;  %s617_s2 = inlined_call_operand.vmem [shape: f32[1,32], index: 2, kind: input, shape index: {}]   ;;  %s618_s3 = inlined_call_operand.vmem [shape: bf16[32,32], index: 3, kind: input, shape index: {}]   ;;  %s619_s4 = inlined_call_operand.vmem [shape: f32[1,32], index: 4, kind: input, shape index: {}]   ;;  %s620_s5 = inlined_call_operand.vmem [shape: bf16[32,32], index: 5, kind: input, shape index: {}]   ;;  %s621_s6 = inlined_call_operand.vmem [shape: f32[1,32], index: 6, kind: input, shape index: {}]   ;;  %s622_s7 = inlined_call_operand.vmem [shape: f32[32,32], index: 7, kind: output, shape index: {}]  }
   0x1 LB: > { %s460_s25 = sadd.s32 4294967295, %s519_s24   ;;  %p464_p0 = scmp.ge.s32.totalorder %s519_s24, 1  ;;  %s519_s24 = sphi %s562_s24, %s17_s24  }
   0x2   : > { %p236_p1 = scmp.lt.s32.totalorder %s519_s24, 5 }
   0x4   : > { %p237_p2 = pnand %p464_p0, %p236_p1 }
   0x5   : > { %p266_p3 = scmp.lt.s32.totalorder (!%p237_p2), %s460_s25, 3 }
   0x6   : > { %240 = sbr.rel (%p237_p2) target bundleno = 444 (0x1bc), region = 48 }
   0xb   : > { %s624_s25 = smov (!%p266_p3, %s460_s25), 3  ;;  %vm278_vm0 = vcmask 261120   ;;  %v521_v2 = vmov 32.0   ;;  %v489_v14 = vld [vmem:[%s618_s3 + $0x8] sm:$0xff]  ;;  %v488_v16 = vld [vmem:[%s618_s3] sm:$0xff] }
   0xc   : > { %s465_s26 = sshll.u32 %s624_s25, 3  ;;  %505 = vrcp.f32 %v521_v2  ;;  %v491_v15 = vld [vmem:[%s620_s5 + $0x8] sm:$0xff]  ;;  %346 = vmatpush.bf16.msra.mxu0 %v489_v14  ;;  %v490_v17 = vld [vmem:[%s620_s5] sm:$0xff] }
   0xd   : > { %s269_s29 = scalar_lea.vmem %s615_s0, %s465_s26  ;;  %379 = vmatpush.bf16.msra.mxu1 %v491_v15  ;;  %v501_v27 = vld [vmem:[%s616_s1] ss:$0 sm:$0xff]  ;;  %s273_s28 = scalar_lea.vmem %s622_s7, %s465_s26 }
   0xe   : > { %v275_v0 = vld [vmem:[%s269_s29] sm:$0xff] }
   0xf   : > { %v279_v1 = vsel %vm278_vm0, %v275_v0, 0.0  ;;  %v502_v30 = vld [vmem:[%s617_s2] ss:$0 sm:$0xff] }
  0x10   : > { %280 = vadd.xlane.f32.xlu0 %v279_v1  ;;  %347 = vmatpush.bf16.msra.mxu0 %v488_v16  ;;  %v504_v34 = vld [vmem:[%s621_s6] ss:$0 sm:$0xff] }
  0x11   : > { %380 = vmatpush.bf16.msra.mxu1 %v490_v17  ;;  %v503_v47 = vld [vmem:[%s619_s4] ss:$0 sm:$0xff] }
  0x12   : > { %v506_v3 = vpop.eup %505 }
  0x13   : > { %v283_v4 = vmul.f32 32.0, %v506_v3  ;;  %vm287_vm1 = vweird.f32 %v506_v3 }
  0x15   : > { %v284_v5 = vsub.f32 1.0, %v283_v4 }
  0x17   : > { %v285_v6 = vmul.f32 %v506_v3, %v284_v5 }
  0x19   : > { %v286_v7 = vadd.f32 %v506_v3, %v285_v6 }
  0x1b   : > { %v288_v8 = vsel %vm287_vm1, %v506_v3, %v286_v7 }
  0x83   : > { %v281_v9 = vpop.xlane.xlu0 %280 }
  0x84   : > { %v289_v10 = vmul.f32 %v288_v8, %v281_v9 }
  0x86   : > { %v290_v11 = vsub.f32 %v275_v0, %v289_v10 }
  0x88   : > { %v291_v12 = vmul.f32 %v290_v11, %v290_v11 }
  0x8a   : > { %v292_v13 = vsel %vm278_vm0, %v291_v12, 0.0 }
  0x8b   : > { %293 = vadd.xlane.f32.xlu0 %v292_v13 }
  0xfe   : > { %v294_v18 = vpop.xlane.xlu0 %293 }
  0xff   : > { %v295_v19 = vmul.f32 %v294_v18, %v288_v8 }
 0x101   : > { %v296_v20 = vadd.f32 1e-05, %v295_v19 }
 0x103   : > { %507 = vrsqrt.f32 %v296_v20  ;;  %vm303_vm3 = vweird.f32 %v296_v20 }
 0x109   : > { %v508_v21 = vpop.eup %507 }
 0x10a   : > { %v298_v22 = vmul.f32 %v508_v21, %v296_v20  ;;  %vm304_vm2 = vweird.f32 %v508_v21 }
 0x10b   : > { %vm305_vm4 = vmor %vm303_vm3, %vm304_vm2 }
 0x10c   : > { %v299_v23 = vmul.f32 %v508_v21, %v298_v22 }
 0x10e   : > { %v300_v24 = vmul.f32 0.5, %v299_v23 }
 0x110   : > { %v301_v25 = vsub.f32 1.5, %v300_v24 }
 0x112   : > { %v302_v26 = vmul.f32 %v508_v21, %v301_v25 }
 0x114   : > { %v306_v28 = vsel %vm305_vm4, %v508_v21, %v302_v26 }
 0x115   : > { %v307_v29 = vmul.f32 %v306_v28, %v290_v11 }
 0x117   : > { %v311_v31 = vmul.f32 %v501_v27, %v307_v29 }
 0x119   : > { %v315_v32 = vadd.f32 %v502_v30, %v311_v31 }
 0x11b   : > { %v316_v33 = vpack.c.bf16 %v315_v32, %v315_v32 }
 0x11d   : > { %475 = vmatmul.msk.bf16.vlgmr.msra.gmra.mxu0 %vm278_vm0, %v316_v33  ;;  %484 = vmatmul.msk.bf16.vlgmr.msra.gmra.mxu1 %vm278_vm0, %v316_v33 }
 0x19a   : > { %v349_v35 = vpop.f32.mrf.mxu0  ;;  %v382_v36 = vpop.f32.mrf.mxu1 }
 0x19b   : > { %v383_v37 = vadd.f32 %v504_v34, %v382_v36  ;;  %v350_v52 = vadd.f32 %v503_v47, %v349_v35 }
 0x19d   : > { %v485_v38 = vmul.f32 -1.442695, %v383_v37 }
 0x19f   : > { %509 = vpow2.f32 %v485_v38 }
 0x1a2   : > { %v351_v39 = vpop.f32.mrf.mxu0  ;;  %v384_v40 = vpop.f32.mrf.mxu1 }
 0x1a5   : > { %v510_v41 = vpop.eup %509 }
 0x1a6   : > { %v389_v42 = vadd.f32 1.0, %v510_v41 }
 0x1a8   : > { %511 = vrcp.f32 %v389_v42  ;;  %v401_v46 = vand.u32 2147483648, %v389_v42  ;;  %v399_v49 = vand.u32 2147483647, %v389_v42  ;;  %vm395_vm6 = vweird.f32 %v389_v42 }
 0x1aa   : > { %v402_v51 = vor.u32 1.1754944e-38, %v401_v46  ;;  %vm400_vm8 = vcmp.eq.f32.partialorder %v399_v49, 8.507059e+37 }
 0x1ae   : > { %v512_v43 = vpop.eup %511 }
 0x1af   : > { %v391_v44 = vmul.f32 %v512_v43, %v389_v42  ;;  %vm396_vm5 = vweird.f32 %v512_v43 }
 0x1b0   : > { %vm397_vm7 = vmor %vm395_vm6, %vm396_vm5 }
 0x1b1   : > { %v392_v45 = vsub.f32 1.0, %v391_v44 }
 0x1b3   : > { %v393_v48 = vmul.f32 %v512_v43, %v392_v45 }
 0x1b5   : > { %v394_v50 = vadd.f32 %v512_v43, %v393_v48 }
 0x1b7   : > { %v398_v53 = vsel %vm397_vm7, %v512_v43, %v394_v50 }
 0x1b8   : > { %v403_v54 = vsel %vm400_vm8, %v402_v51, %v398_v53 }
 0x1b9   : > { %v405_v55 = vmul.f32 %v403_v54, %v350_v52 }
 0x1bb   : > { %406 = vst.msk [vmem:[%s273_s28] sm:$0xff] %vm278_vm0, %v405_v55 }
 0x1bc PF: > { %s17_s24 = sadd.s32 1, %s519_s24  }
 0x1bd   : > { %p14_p4 = scmp.ge.s32.totalorder %s17_s24, 6  }
 0x1bf   :  { %16 = sbr.rel (!%p14_p4) target bundleno = 1 (0x1), region = 78 }

// kernel: denceformer_forward.21
= control target key start
LH: loop header
LB: loop body
LE: loop exit
PB: predicated region body
PF: predicated region fallthrough
CT: control target
= control target key end

     0   :  { %s1307_s13 = smov 0   ;;  %s1309_s14 = smov 0   ;;  %s1459_s0 = inlined_call_operand.vmem [shape: f32[2,16,32], index: 0, kind: input, shape index: {}]   ;;  %s1460_s1 = inlined_call_operand.vmem [shape: bf16[2,4,16,8], index: 1, kind: input, shape index: {}]   ;;  %s1461_s2 = inlined_call_operand.vmem [shape: bf16[2,4,16,8], index: 2, kind: input, shape index: {}]   ;;  %s1462_s3 = inlined_call_operand.vmem [shape: bf16[2,4,16,8], index: 3, kind: input, shape index: {}]   ;;  %s1463_s4 = inlined_call_operand.vmem [shape: bf16[4,128,8], index: 4, kind: input, shape index: {}]   ;;  %s1464_s5 = inlined_call_operand.vmem [shape: f32[4,1,8], index: 5, kind: input, shape index: {}]   ;;  %s1465_s6 = inlined_call_operand.vmem [shape: f32[2,1,16], index: 6, kind: input, shape index: {}]   ;;  %s1466_s7 = inlined_call_operand.vmem [shape: bf16[4,8,32], index: 7, kind: input, shape index: {}]   ;;  %s1467_s8 = inlined_call_operand.vmem [shape: f32[1,32], index: 8, kind: input, shape index: {}]   ;;  %s1468_s9 = inlined_call_operand.vmem [shape: f32[2,16,32], index: 9, kind: output, shape index: {0}]   ;;  %s1469_s10 = inlined_call_operand.vmem [shape: f32[2,4,16,16], index: 10, kind: output, shape index: {1}]  }
   0x1   :  { %s1311_s15 = smov 0   ;;  %s1313_s16 = smov 0  }
   0x2   :  { %s1315_s17 = smov 0  }
   0x3 LB: > { %s30_s18 = sadd.s32 1, %s1239_s15  ;;  %s33_s19 = sadd.s32 1, %s1243_s16  ;;  %s1247_s17 = sphi %s1315_s17, %s21_s17   ;;  %s1243_s16 = sphi %s1313_s16, %s1474_s16   ;;  %s1239_s15 = sphi %s1311_s15, %s1473_s15   ;;  %s1235_s14 = sphi %s1309_s14, %s1472_s14   ;;  %s1231_s13 = sphi %s1307_s13, %s1471_s13  }
   0x4   : > { %p31_p0 = scmp.ge.s32.totalorder %s30_s18, 4  ;;  %p1071_p1 = scmp.ge.s32.totalorder %s1247_s17, 1 }
   0x5   : > { %p412_p2 = scmp.lt.s32.totalorder %s1247_s17, 9 }
   0x6   : > { %s1476_s18 = smov (%p31_p0, %s30_s18), 0  ;;  %s1478_s19 = smov (!%p31_p0, %s33_s19), %s1243_s16 }
   0x7   : > { %p413_p3 = pnand %p1071_p1, %p412_p2  ;;  %p35_p4 = scmp.ge.s32.totalorder %s1478_s19, 2 }
   0x8   : > { %p508_p5 = scmp.lt.s32.totalorder (!%p413_p3), %s1231_s13, 3  ;;  %p501_p6 = scmp.lt.s32.totalorder (!%p413_p3), %s1235_s14, 1 }
   0x9   : > { %s1480_s19 = smov (%p35_p4, %s1478_s19), 0  ;;  %416 = sbr.rel (%p413_p3) target bundleno = 897 (0x381), region = 56 }
   0xa   : > { %p1138_p7 = scmp.ne.s32.totalorder (!%p413_p3), %s1231_s13, 0 }
   0xe   : > { %s1341_s20 = scalar_select %p508_p5, %s1231_s13, 3  ;;  %vm632_vm0 = vcmask 64512   ;;  %v1251_v29 = vmov 0   ;;  %vm721_vm3 = vcmask 130048  }
   0xf   : > { %s1482_s14 = smov (!%p501_p6, %s1235_s14), 1 }
  0x10   : > { %s1143_s21 = sshll.u32 %s1341_s20, 6  ;;  %s1085_s22 = sshll.u32 %s1341_s20, 2 }
  0x11   : > { %s1350_s25 = scalar_lea.vmem %s1463_s4, %s1143_s21  ;;  %s1355_s28 = scalar_lea.vmem %s1466_s7, %s1085_s22 }
  0x12   : > { %v1154_v0 = vld [vmem:[%s1350_s25 + $0x38] sm:$0xff]  ;;  %s1142_s29 = sshll.u32 %s1482_s14, 4  ;;  %v1153_v2 = vld [vmem:[%s1350_s25 + $0x30] sm:$0xff]  ;;  %v1152_v4 = vld [vmem:[%s1350_s25 + $0x28] sm:$0xff]  ;;  %s1074_s30 = sshll.u32 %s1341_s20, 1 }
  0x13   : > { %s1362_s12 = scalar_lea.vmem %s1459_s0, %s1142_s29  ;;  %v658_v1 = vsel %vm632_vm0, %v1154_v0, 0  ;;  %s1372_s27 = scalar_lea.vmem %s1468_s9, %s1142_s29  ;;  %v655_v3 = vsel %vm632_vm0, %v1153_v2, 0  ;;  %v652_v5 = vsel %vm632_vm0, %v1152_v4, 0  ;;  %v1151_v6 = vld [vmem:[%s1350_s25 + $0x20] sm:$0xff]  ;;  %v1150_v8 = vld [vmem:[%s1350_s25 + $0x18] sm:$0xff]  ;;  %v1149_v11 = vld [vmem:[%s1350_s25 + $0x10] sm:$0xff] }
  0x14   : > { %660 = vmatpush.bf16.xpose.msra.mxu0 %v658_v1  ;;  %v649_v7 = vsel %vm632_vm0, %v1151_v6, 0  ;;  %s1075_s11 = sshll.u32 %s1482_s14, 3  ;;  %v646_v9 = vsel %vm632_vm0, %v1150_v8, 0  ;;  %v643_v13 = vsel %vm632_vm0, %v1149_v11, 0  ;;  %v1148_v15 = vld [vmem:[%s1350_s25 + $0x8] sm:$0xff]  ;;  %v1147_v18 = vld [vmem:[%s1350_s25] sm:$0xff]  ;;  %s543_s23 = scalar_lea.vmem %s1465_s6, %s1482_s14 }
  0x15   : > { %s1382_s21 = sadd.s32 %s1075_s11, %s1074_s30  ;;  %v640_v16 = vsel %vm632_vm0, %v1148_v15, 0  ;;  %v637_v22 = vsel %vm632_vm0, %v1147_v18, 0  ;;  %s1249_s30 = smov 368   ;;  %v714_v28 = vld [vmem:[%s543_s23] sm:$0x1] }
  0x16   : > { %s1386_s29 = sshll.u32 %s1382_s21, 2  ;;  %s1250_s25 = smov 376   ;;  %vm715_vm1 = vcmp.gt.f32.partialorder %v714_v28, 0.5 }
  0x17   : > { %s523_s26 = scalar_lea.vmem %s1461_s2, %s1386_s29  ;;  %s514_s24 = scalar_lea.vmem %s1460_s1, %s1386_s29  ;;  %v716_v30 = vsel %vm715_vm1, 1, %v1251_v29 }
  0x18   : > { %v1146_v10 = vld [vmem:[%s523_s26] sm:$0xff]  ;;  %s1470_s26 = scalar_lea.vmem %s1464_s5, %s1341_s20  ;;  %v717_v32 = vperm.slane %v716_v30, 0  ;;  %s532_s22 = scalar_lea.vmem %s1462_s3, %s1386_s29 }
  0x19   : > { %v696_v12 = vsel %vm632_vm0, %v1146_v10, 0  ;;  %v1145_v14 = vld [vmem:[%s514_s24] sm:$0xff] }
  0x1a   : > { %705 = vmatpush.bf16.xpose.msra.mxu1 %v696_v12  ;;  %v563_v17 = vld [vmem:[%s514_s24] sm:$0xff]   ;;  %vm718_vm2 = vcmp.eq.s32.totalorder %v717_v32, 1 }
  0x1b   : > { %v565_v19 = vunpack.c.l.bf16 %v563_v17  ;;  %v566_v20 = vunpack.c.h.bf16 %v563_v17  ;;  %v1199_v21 = vld [vmem:[%s1470_s26] ss:$0 sm:$0xff]  ;;  %s1090_s26 = sshll.u32 %s1382_s21, 3 }
  0x1c   : > { %661 = vmatpush.bf16.xpose.msra.mxu0 %v655_v3  ;;  %v1155_v54 = vld [vmem:[%s532_s22] sm:$0xff] }
  0x1d   : > { %v573_v23 = vadd.f32 %v1199_v21, %v565_v19  ;;  %v574_v24 = vadd.f32 %v1199_v21, %v566_v20  ;;  %791 = vmatpush.bf16.msra.mxu2 %v1155_v54 }
  0x1f   : > { %v575_v25 = vpack.c.bf16 %v574_v24, %v573_v23 }
  0x21   : > { %1132 = vmatmul.msk.bf16.vlgmr.msra.gmra.mxu1 %vm632_vm0, %v1145_v14 }
  0x24   : > { %662 = vmatpush.bf16.xpose.msra.mxu0 %v652_v5 }
  0x2c   : > { %663 = vmatpush.bf16.xpose.msra.mxu0 %v649_v7 }
  0x34   : > { %664 = vmatpush.bf16.xpose.msra.mxu0 %v646_v9 }
  0x3c   : > { %665 = vmatpush.bf16.xpose.msra.mxu0 %v643_v13 }
  0x44   : > { %666 = vmatpush.bf16.xpose.msra.mxu0 %v640_v16 }
  0x4c   : > { %667 = vmatpush.bf16.xpose.msra.mxu0 %v637_v22 }
  0x53   : > { %1123 = vmatmul.msk.bf16.vlgmr.msra.gmra.mxu0 %vm632_vm0, %v575_v25 }
  0x9e   : > { %v707_v31 = vpop.f32.mrf.mxu1 }
  0xa6   : > { %v709_v38 = vpop.f32.mrf.mxu1 }
  0xd0   : > { %v669_v26 = vpop.f32.mrf.mxu0 }
  0xd1   : > { %676 = vrot.lane.b32.xlu0 %v669_v26, %s1249_s30 }
  0xd8   : > { %v671_v27 = vpop.f32.mrf.mxu0 }
  0xd9   : > { %680 = vrot.lane.b32.xlu0 %v671_v27, %s1250_s25  ;;  %s561_s25 = scalar_lea.vmem %s1469_s10, %s1090_s26 }
 0x143   : > { %v677_v33 = vpop.permute.xlu0 %676 }
 0x144   : > { %v708_v34 = vadd.f32 %v707_v31, %v677_v33 }
 0x146   : > { %v712_v35 = vmul.f32 0.35355338, %v708_v34 }
 0x148   : > { %v719_v36 = vsel %vm718_vm2, %v712_v35, -1e+09 }
 0x149   : > { %v722_v37 = vsel %vm721_vm3, %v719_v36, -inf }
 0x14a   : > { %723 = vmax.xlane.f32.xlu1 %v722_v37 }
 0x14b   : > { %v681_v39 = vpop.permute.xlu0 %680 }
 0x14c   : > { %v710_v40 = vadd.f32 %v709_v38, %v681_v39 }
 0x14e   : > { %v713_v41 = vmul.f32 0.35355338, %v710_v40 }
 0x150   : > { %v720_v42 = vsel %vm718_vm2, %v713_v41, -1e+09 }
 0x151   : > { %v725_v43 = vsel %vm721_vm3, %v720_v42, -inf }
 0x152   : > { %726 = vmax.xlane.f32.xlu1 %v725_v43 }
 0x1bd   : > { %v724_v44 = vpop.xlane.xlu1 %723 }
 0x1be   : > { %v728_v45 = vsub.f32 %v719_v36, %v724_v44 }
 0x1c0   : > { %v730_v46 = vmul.f32 1.442695, %v728_v45 }
 0x1c2   : > { %1200 = vpow2.f32 %v730_v46 }
 0x1c5   : > { %v727_v47 = vpop.xlane.xlu1 %726 }
 0x1c6   : > { %v729_v48 = vsub.f32 %v720_v42, %v727_v47 }
 0x1c8   : > { %v1201_v49 = vpop.eup %1200  ;;  %v732_v50 = vmul.f32 1.442695, %v729_v48 }
 0x1c9   : > { %v734_v51 = vsel %vm721_vm3, %v1201_v49, 0.0 }
 0x1ca   : > { %1202 = vpow2.f32 %v732_v50  ;;  %735 = vadd.xlane.f32.xlu2 %v734_v51 }
 0x1d0   : > { %v1203_v52 = vpop.eup %1202 }
 0x1d1   : > { %v737_v53 = vsel %vm721_vm3, %v1203_v52, 0.0 }
 0x1d2   : > { %738 = vadd.xlane.f32.xlu2 %v737_v53 }
 0x23d   : > { %v736_v55 = vpop.xlane.xlu2 %735 }
 0x23e   : > { %1204 = vrcp.f32 %v736_v55  ;;  %v751_v60 = vand.u32 2147483648, %v736_v55  ;;  %v749_v62 = vand.u32 2147483647, %v736_v55  ;;  %vm745_vm5 = vweird.f32 %v736_v55 }
 0x240   : > { %v752_v1 = vor.u32 1.1754944e-38, %v751_v60  ;;  %vm750_vm7 = vcmp.eq.f32.partialorder %v749_v62, 8.507059e+37 }
 0x244   : > { %v1205_v56 = vpop.eup %1204 }
 0x245   : > { %v741_v57 = vmul.f32 %v1205_v56, %v736_v55  ;;  %v739_v58 = vpop.xlane.xlu2 %738  ;;  %vm746_vm4 = vweird.f32 %v1205_v56 }
 0x246   : > { %1206 = vrcp.f32 %v739_v58  ;;  %vm747_vm6 = vmor %vm745_vm5, %vm746_vm4  ;;  %v765_v7 = vand.u32 2147483648, %v739_v58  ;;  %v763_v9 = vand.u32 2147483647, %v739_v58  ;;  %vm759_vm9 = vweird.f32 %v739_v58 }
 0x247   : > { %v742_v59 = vsub.f32 1.0, %v741_v57 }
 0x248   : > { %v766_v11 = vor.u32 1.1754944e-38, %v765_v7  ;;  %vm764_vm11 = vcmp.eq.f32.partialorder %v763_v9, 8.507059e+37 }
 0x249   : > { %v743_v61 = vmul.f32 %v1205_v56, %v742_v59 }
 0x24b   : > { %v744_v63 = vadd.f32 %v1205_v56, %v743_v61 }
 0x24c   : > { %v1207_v0 = vpop.eup %1206 }
 0x24d   : > { %v755_v2 = vmul.f32 %v1207_v0, %v739_v58  ;;  %v748_v3 = vsel %vm747_vm6, %v1205_v56, %v744_v63  ;;  %vm760_vm8 = vweird.f32 %v1207_v0 }
 0x24e   : > { %v753_v4 = vsel %vm750_vm7, %v752_v1, %v748_v3  ;;  %vm761_vm10 = vmor %vm759_vm9, %vm760_vm8 }
 0x24f   : > { %v756_v5 = vsub.f32 1.0, %v755_v2  ;;  %v768_v6 = vmul.f32 %v1201_v49, %v753_v4 }
 0x251   : > { %v757_v8 = vmul.f32 %v1207_v0, %v756_v5  ;;  %770 = vst.msk [vmem:[%s561_s25] sm:$0xff] %vm721_vm3, %v768_v6 }
 0x253   : > { %v758_v10 = vadd.f32 %v1207_v0, %v757_v8 }
 0x255   : > { %v762_v12 = vsel %vm761_vm10, %v1207_v0, %v758_v10 }
 0x256   : > { %v767_v13 = vsel %vm764_vm11, %v766_v11, %v762_v12 }
 0x257   : > { %v769_v14 = vmul.f32 %v1203_v52, %v767_v13 }
 0x259   : > { %771 = vst.msk [vmem:[%s561_s25 + $0x8] sm:$0xff] %vm721_vm3, %v769_v14  ;;  %v772_v15 = vpack.c.bf16 %v769_v14, %v768_v6 }
 0x25b   : > { %1137 = vmatmul.msk.bf16.vlgmr.msra.gmra.mxu2 %vm721_vm3, %v772_v15 }
 0x2de   : > { %v793_v16 = vpop.f32.mrf.mxu2 }
 0x2e2   : > { %801 = sbr.rel (%p1138_p7) target bundleno = 749 (0x2ed), region = 60 }
 0x2e6   : > { %v795_v17 = vpop.f32.mrf.mxu2 }
 0x2e7   : > { %v802_v18 = vld [vmem:[%s1362_s12] sm:$0xff]  ;;  %vm810_vm12 = vcmask 261120   ;;  %v803_v20 = vld [vmem:[%s1362_s12 + $0x8] sm:$0xff] }
 0x2e8   : > { %v1208_v19 = vld [vmem:[%s1467_s8] ss:$0 sm:$0xff] }
 0x2e9   : > { %v808_v21 = vadd.f32 %v1208_v19, %v802_v18  ;;  %v809_v22 = vadd.f32 %v1208_v19, %v803_v20 }
 0x2eb   : > { %811 = vst.msk [vmem:[%s1372_s27] sm:$0xff] %vm810_vm12, %v808_v21 }
 0x2ec   : > { %812 = vst.msk [vmem:[%s1372_s27 + $0x8] sm:$0xff] %vm810_vm12, %v809_v22 }
 0x2ed PF: > { %v816_v23 = vld [vmem:[%s1355_s28] sm:$0xf]  ;;  %vm820_vm13 = vcmask 1043456   ;;  %v815_v25 = vpack.c.bf16 %v795_v17, %v793_v16  ;;  %vm840_vm14 = vcmask 261120  }
 0x2ee   : > { %v822_v24 = vsel %vm820_vm13, %v816_v23, 0 }
 0x2ef   : > { %831 = vmatpush.bf16.msra.mxu3 %v822_v24 }
 0x2f2   : > { %1139 = vmatmul.msk.bf16.vlgmr.msra.gmra.mxu3 %vm632_vm0, %v815_v25  ;;  %v813_v26 = vld [vmem:[%s1372_s27] sm:$0xff] }
 0x2f3   : > { %v814_v29 = vld [vmem:[%s1372_s27 + $0x8] sm:$0xff] }
 0x375   : > { %v833_v27 = vpop.f32.mrf.mxu3 }
 0x376   : > { %v838_v28 = vadd.f32 %v833_v27, %v813_v26 }
 0x378   : > { %841 = vst.msk [vmem:[%s1372_s27] sm:$0xff] %vm840_vm14, %v838_v28 }
 0x37d   : > { %v835_v30 = vpop.f32.mrf.mxu3 }
 0x37e   : > { %v839_v31 = vadd.f32 %v835_v30, %v814_v29 }
 0x380   : > { %842 = vst.msk [vmem:[%s1372_s27 + $0x8] sm:$0xff] %vm840_vm14, %v839_v31 }
 0x381 PF: > { %s21_s17 = sadd.s32 1, %s1247_s17   ;;  %s1471_s13 = smov %s1239_s15 }
 0x382   : > { %p18_p8 = scmp.ge.s32.totalorder %s21_s17, 10   ;;  %s1472_s14 = smov %s1243_s16 }
 0x383   : > { %s1473_s15 = smov %s1476_s18  ;;  %s1474_s16 = smov %s1480_s19 }
 0x384   :  { %20 = sbr.rel (!%p18_p8) target bundleno = 3 (0x3), region = 123 }

// kernel: denceformer_forward.23
= control target key start
LH: loop header
LB: loop body
LE: loop exit
PB: predicated region body
PF: predicated region fallthrough
CT: control target
= control target key end

     0   :  { %s513_s18 = smov 0   ;;  %s593_s0 = inlined_call_operand.vmem [shape: f32[2,24,32], index: 0, kind: input, shape index: {}]   ;;  %s594_s1 = inlined_call_operand.vmem [shape: f32[7,32], index: 1, kind: input, shape index: {}]   ;;  %s595_s2 = inlined_call_operand.vmem [shape: f32[1,32], index: 2, kind: input, shape index: {}]   ;;  %s596_s3 = inlined_call_operand.vmem [shape: f32[2,16,32], index: 3, kind: output, shape index: {0}]   ;;  %s597_s4 = inlined_call_operand.vmem [shape: f32[2,1,32], index: 4, kind: output, shape index: {1}]   ;;  %s598_s5 = inlined_call_operand.vmem [shape: f32[2,1,32], index: 5, kind: output, shape index: {2}]  }
   0x1 LB: > { %s454_s19 = sadd.s32 4294967295, %s481_s18   ;;  %p458_p0 = scmp.ge.s32.totalorder %s481_s18, 1  ;;  %s481_s18 = sphi %s513_s18, %s16_s18  }
   0x2   : > { %p192_p1 = scmp.lt.s32.totalorder %s481_s18, 3 }
   0x4   : > { %p193_p2 = pnand %p458_p0, %p192_p1 }
   0x5   : > { %p226_p3 = scmp.lt.s32.totalorder (!%p193_p2), %s454_s19, 1 }
   0x6   : > { %196 = sbr.rel (%p193_p2) target bundleno = 59 (0x3b), region = 32 }
   0xb   : > { %v252_v0 = vlaneseq  ;;  %v524_v1 = vld [vmem:[%s594_s1] sm:$0x7f]  ;;  %s600_s19 = smov (!%p226_p3, %s454_s19), 1  ;;  %vm323_vm6 = vcmask 261120   ;;  %vm335_vm7 = vcmask 253952  }
   0xc   : > { %s465_s22 = smul.u32 24, %s600_s19  ;;  %v246_v3 = vperm.slane %v524_v1, 0  ;;  %v257_v4 = vperm.slane %v524_v1, 1  ;;  %v268_v5 = vperm.slane %v524_v1, 2  ;;  %v279_v6 = vperm.slane %v524_v1, 3  ;;  %s464_s26 = sshll.u32 %s600_s19, 4 }
   0xd   : > { %v528_v2 = vshrl.u32 %v252_v0, 7  ;;  %v290_v7 = vperm.slane %v524_v1, 4  ;;  %v301_v8 = vperm.slane %v524_v1, 5  ;;  %v312_v30 = vperm.slane %v524_v1, 6  ;;  %v474_v59 = vld [vmem:[%s595_s2] ss:$0 sm:$0xff]  ;;  %s235_s6 = scalar_lea.vmem %s596_s3, %s464_s26  ;;  %s238_s9 = scalar_lea.vmem %s597_s4, %s600_s19 }
   0xe   : > { %s230_s25 = scalar_lea.vmem %s593_s0, %s465_s22  ;;  %s241_s12 = scalar_lea.vmem %s598_s5, %s600_s19 }
   0xf   : > { %vm254_vm0 = vcmp.lt.s32.totalorder %v528_v2, 7  ;;  %v242_v9 = vld [vmem:[%s230_s25] sm:$0xff]  ;;  %v243_v10 = vld [vmem:[%s230_s25 + $0x8] sm:$0xff]  ;;  %vm265_vm1 = vcmp.lt.s32.totalorder %v528_v2, 6  ;;  %vm276_vm2 = vcmp.lt.s32.totalorder %v528_v2, 5  ;;  %vm287_vm3 = vcmp.lt.s32.totalorder %v528_v2, 4 }
  0x10   : > { %vm298_vm4 = vcmp.lt.s32.totalorder %v528_v2, 3  ;;  %v247_v11 = vmul.f32 %v246_v3, %v242_v9  ;;  %v249_v12 = vrot.slane %v242_v9, 1  ;;  %v250_v13 = vrot.slane %v243_v10, 1  ;;  %v244_v23 = vld [vmem:[%s230_s25 + $0x10] sm:$0xff] }
  0x11   : > { %v262_v14 = vrot.slane %v242_v9, 2  ;;  %v263_v15 = vrot.slane %v243_v10, 2  ;;  %v273_v16 = vrot.slane %v242_v9, 3  ;;  %v274_v17 = vrot.slane %v243_v10, 3 }
  0x12   : > { %v284_v18 = vrot.slane %v242_v9, 4  ;;  %v256_v19 = vsel %vm254_vm0, %v249_v12, %v250_v13  ;;  %v285_v20 = vrot.slane %v243_v10, 4  ;;  %v295_v21 = vrot.slane %v242_v9, 5 }
  0x13   : > { %v296_v22 = vrot.slane %v243_v10, 5  ;;  %v258_v24 = vmul.f32 %v257_v4, %v256_v19  ;;  %v267_v25 = vsel %vm265_vm1, %v262_v14, %v263_v15  ;;  %v278_v26 = vsel %vm276_vm2, %v273_v16, %v274_v17 }
  0x14   : > { %v306_v27 = vrot.slane %v242_v9, 6  ;;  %v269_v28 = vmul.f32 %v268_v5, %v267_v25  ;;  %v289_v29 = vsel %vm287_vm3, %v284_v18, %v285_v20  ;;  %vm309_vm5 = vcmp.lt.s32.totalorder %v528_v2, 2 }
  0x15   : > { %v260_v31 = vadd.f32 %v258_v24, %v247_v11  ;;  %v280_v32 = vmul.f32 %v279_v6, %v278_v26  ;;  %v300_v33 = vsel %vm298_vm4, %v295_v21, %v296_v22  ;;  %v307_v34 = vrot.slane %v243_v10, 6 }
  0x16   : > { %v291_v35 = vmul.f32 %v290_v7, %v289_v29  ;;  %v251_v36 = vrot.slane %v244_v23, 1  ;;  %v264_v37 = vrot.slane %v244_v23, 2  ;;  %v275_v38 = vrot.slane %v244_v23, 3 }
  0x17   : > { %v271_v39 = vadd.f32 %v269_v28, %v260_v31  ;;  %v311_v40 = vsel %vm309_vm5, %v306_v27, %v307_v34  ;;  %v248_v41 = vmul.f32 %v246_v3, %v243_v10  ;;  %v286_v42 = vrot.slane %v244_v23, 4 }
  0x18   : > { %v255_v43 = vsel %vm254_vm0, %v250_v13, %v251_v36  ;;  %v266_v44 = vsel %vm265_vm1, %v263_v15, %v264_v37  ;;  %v277_v45 = vsel %vm276_vm2, %v274_v17, %v275_v38  ;;  %v297_v46 = vrot.slane %v244_v23, 5 }
  0x19   : > { %v282_v47 = vadd.f32 %v280_v32, %v271_v39  ;;  %v302_v48 = vmul.f32 %v301_v8, %v300_v33  ;;  %v259_v49 = vmul.f32 %v257_v4, %v255_v43  ;;  %v270_v50 = vmul.f32 %v268_v5, %v266_v44 }
  0x1a   : > { %v288_v51 = vsel %vm287_vm3, %v285_v20, %v286_v42  ;;  %v308_v52 = vrot.slane %v244_v23, 6  ;;  %v313_v54 = vmul.f32 %v312_v30, %v311_v40  ;;  %v281_v56 = vmul.f32 %v279_v6, %v277_v45 }
  0x1b   : > { %v293_v53 = vadd.f32 %v291_v35, %v282_v47  ;;  %v261_v55 = vadd.f32 %v259_v49, %v248_v41  ;;  %v299_v57 = vsel %vm298_vm4, %v296_v22, %v297_v46  ;;  %v292_v61 = vmul.f32 %v290_v7, %v288_v51 }
  0x1c   : > { %v310_v62 = vsel %vm309_vm5, %v307_v34, %v308_v52  ;;  %v303_v3 = vmul.f32 %v301_v8, %v299_v57 }
  0x1d   : > { %v304_v58 = vadd.f32 %v302_v48, %v293_v53  ;;  %v272_v60 = vadd.f32 %v270_v50, %v261_v55  ;;  %v314_v6 = vmul.f32 %v312_v30, %v310_v62 }
  0x1f   : > { %v315_v63 = vadd.f32 %v313_v54, %v304_v58  ;;  %v283_v0 = vadd.f32 %v281_v56, %v272_v60 }
  0x21   : > { %v321_v4 = vadd.f32 %v474_v59, %v315_v63  ;;  %v294_v5 = vadd.f32 %v292_v61, %v283_v0 }
  0x23   : > { %324 = vst.msk [vmem:[%s235_s6] sm:$0xff] %vm323_vm6, %v321_v4  ;;  %v305_v9 = vadd.f32 %v303_v3, %v294_v5  ;;  %v337_v10 = vmul.f32 %v321_v4, %v321_v4  ;;  %v326_v11 = vsel %vm323_vm6, %v321_v4, 0.0 }
  0x25   : > { %v316_v7 = vadd.f32 %v314_v6, %v305_v9  ;;  %v339_v12 = vsel %vm323_vm6, %v337_v10, 0.0 }
  0x27   : > { %v322_v2 = vadd.f32 %v474_v59, %v316_v7 }
  0x29   : > { %325 = vst.msk [vmem:[%s235_s6 + $0x8] sm:$0xff] %vm323_vm6, %v322_v2  ;;  %v327_v13 = vsel %vm323_vm6, %v322_v2, 0.0  ;;  %v338_v1 = vmul.f32 %v322_v2, %v322_v2 }
  0x2a   : > { %v328_v8 = vadd.f32 %v327_v13, %v326_v11 }
  0x2b   : > { %v340_v14 = vsel %vm323_vm6, %v338_v1, 0.0 }
  0x2c   : > { %v329_v15 = vrot.slane %v328_v8, 4  ;;  %v341_v16 = vadd.f32 %v340_v14, %v339_v12 }
  0x2e   : > { %v330_v17 = vadd.f32 %v329_v15, %v328_v8  ;;  %v342_v18 = vrot.slane %v341_v16, 4 }
  0x30   : > { %v331_v19 = vrot.slane %v330_v17, 2  ;;  %v343_v20 = vadd.f32 %v342_v18, %v341_v16 }
  0x32   : > { %v332_v21 = vadd.f32 %v331_v19, %v330_v17  ;;  %v344_v22 = vrot.slane %v343_v20, 2 }
  0x34   : > { %v333_v23 = vrot.slane %v332_v21, 1  ;;  %v345_v24 = vadd.f32 %v344_v22, %v343_v20 }
  0x36   : > { %v334_v25 = vadd.f32 %v333_v23, %v332_v21  ;;  %v346_v26 = vrot.slane %v345_v24, 1 }
  0x38   : > { %336 = vst.msk [vmem:[%s238_s9] sm:$0x1] %vm335_vm7, %v334_v25  ;;  %v347_v27 = vadd.f32 %v346_v26, %v345_v24 }
  0x3a   : > { %348 = vst.msk [vmem:[%s241_s12] sm:$0x1] %vm335_vm7, %v347_v27 }
  0x3b PF: > { %s16_s18 = sadd.s32 1, %s481_s18  }
  0x3c   : > { %p13_p4 = scmp.ge.s32.totalorder %s16_s18, 4  }
  0x3e   :  { %15 = sbr.rel (!%p13_p4) target bundleno = 1 (0x1), region = 86 }

// kernel: denceformer_forward.25
= control target key start
LH: loop header
LB: loop body
LE: loop exit
PB: predicated region body
PF: predicated region fallthrough
CT: control target
= control target key end

     0   :  { %s920_s30 = smov 0   ;;  %s922_s10 = smov 0   ;;  %s1027_s0 = inlined_call_operand.vmem [shape: f32[32,32], index: 0, kind: input, shape index: {}]   ;;  %s1028_s1 = inlined_call_operand.vmem [shape: f32[1,32], index: 1, kind: input, shape index: {}]   ;;  %s1029_s2 = inlined_call_operand.vmem [shape: f32[1,32], index: 2, kind: input, shape index: {}]   ;;  %s1030_s3 = inlined_call_operand.vmem [shape: bf16[32,128], index: 3, kind: input, shape index: {}]   ;;  %s1031_s4 = inlined_call_operand.vmem [shape: f32[1,128], index: 4, kind: input, shape index: {}]   ;;  %s1032_s5 = inlined_call_operand.vmem [shape: bf16[128,32], index: 5, kind: input, shape index: {}]   ;;  %s1033_s6 = inlined_call_operand.vmem [shape: f32[1,32], index: 6, kind: input, shape index: {}]   ;;  %s1034_s7 = inlined_call_operand.vmem [shape: f32[1,32], index: 7, kind: input, shape index: {}]   ;;  %s1035_s8 = inlined_call_operand.vmem [shape: f32[1,32], index: 8, kind: input, shape index: {}]   ;;  %s1036_s9 = inlined_call_operand.vmem [shape: f32[32,32], index: 9, kind: output, shape index: {}]  }
   0x1   :  { %s924_s11 = smov 0  }
   0x2 LB: > { %s31_s12 = sadd.s32 1, %s862_s10  ;;  %p745_p0 = scmp.ge.s32.totalorder %s866_s11, 1  ;;  %s866_s11 = sphi %s924_s11, %s19_s11   ;;  %s862_s10 = sphi %s922_s10, %s1038_s10   ;;  %s858_s30 = sphi %s920_s30, %s1037_s30  }
   0x3   : > { %p33_p1 = scmp.ge.s32.totalorder %s31_s12, 4  ;;  %p326_p2 = scmp.lt.s32.totalorder %s866_s11, 5 }
   0x5   : > { %s1040_s12 = smov (%p33_p1, %s31_s12), 0  ;;  %p327_p3 = pnand %p745_p0, %p326_p2 }
   0x6   : > { %p372_p4 = scmp.lt.s32.totalorder (!%p327_p3), %s858_s30, 3 }
   0x7   : > { %330 = sbr.rel (%p327_p3) target bundleno = 865 (0x361), region = 56 }
   0xc   : > { %s1042_s30 = smov (!%p372_p4, %s858_s30), 3  ;;  %vm401_vm0 = vcmask 261120   ;;  %v868_v2 = vmov 32.0   ;;  %v793_v14 = vld [vmem:[%s1030_s3 + $0x8] sm:$0xff]  ;;  %v792_v16 = vld [vmem:[%s1030_s3] sm:$0xff]  ;;  %vm440_vm5 = vcmask 257024  }
   0xd   : > { %s746_s13 = sshll.u32 %s1042_s30, 3  ;;  %834 = vrcp.f32 %v868_v2  ;;  %474 = vmatpush.bf16.msra.mxu0 %v793_v14  ;;  %v828_v25 = vld [vmem:[%s1028_s1] ss:$0 sm:$0xff]  ;;  %v801_v33 = vld [vmem:[%s1032_s5 + $0x38] sm:$0xff]  ;;  %v800_v34 = vld [vmem:[%s1032_s5 + $0x30] sm:$0xff]  ;;  %v869_v45 = vmov 0.0  }
   0xe   : > { %s375_s16 = scalar_lea.vmem %s1027_s0, %s746_s13  ;;  %v829_v27 = vld [vmem:[%s1029_s2] ss:$0 sm:$0xff]  ;;  %567 = vmatpush.bf16.msra.mxu1 %v801_v33  ;;  %v799_v35 = vld [vmem:[%s1032_s5 + $0x28] sm:$0xff]  ;;  %v797_v37 = vld [vmem:[%s1032_s5 + $0x18] sm:$0xff]  ;;  %442 = vst.msk [vmem:[#allocation3] sm:$0xff] %vm401_vm0, %v869_v45  ;;  %s392_s19 = scalar_lea.vmem %s1036_s9, %s746_s13 }
   0xf   : > { %v946_v0 = vld [vmem:[%s375_s16] sm:$0xff]  ;;  %v796_v38 = vld [vmem:[%s1032_s5 + $0x10] sm:$0xff]  ;;  %v795_v39 = vld [vmem:[%s1032_s5 + $0x8] sm:$0xff] }
  0x10   : > { %v402_v1 = vsel %vm401_vm0, %v946_v0, 0.0  ;;  %v798_v36 = vld [vmem:[%s1032_s5 + $0x20] sm:$0xff] }
  0x11   : > { %403 = vadd.xlane.f32.xlu0 %v402_v1  ;;  %475 = vmatpush.bf16.msra.mxu0 %v792_v16  ;;  %v794_v40 = vld [vmem:[%s1032_s5] sm:$0xff] }
  0x12   : > { %568 = vmatpush.bf16.msra.mxu1 %v800_v34  ;;  %v830_v41 = vld [vmem:[%s1031_s4] ss:$0 sm:$0xff] }
  0x13   : > { %v835_v3 = vpop.eup %834  ;;  %v831_v1 = vld [vmem:[%s1033_s6] ss:$0 sm:$0xff] }
  0x14   : > { %v406_v4 = vmul.f32 32.0, %v835_v3  ;;  %vm410_vm1 = vweird.f32 %v835_v3 }
  0x15   : > { %v501_v61 = vld [vmem:[#allocation3] sm:$0xff] }
  0x16   : > { %v407_v5 = vsub.f32 1.0, %v406_v4  ;;  %569 = vmatpush.bf16.msra.mxu1 %v799_v35 }
  0x18   : > { %v408_v6 = vmul.f32 %v835_v3, %v407_v5 }
  0x1a   : > { %v409_v7 = vadd.f32 %v835_v3, %v408_v6  ;;  %570 = vmatpush.bf16.msra.mxu1 %v798_v36 }
  0x1c   : > { %v950_v8 = vsel %vm410_vm1, %v835_v3, %v409_v7 }
  0x1e   : > { %571 = vmatpush.bf16.msra.mxu1 %v797_v37 }
  0x22   : > { %572 = vmatpush.bf16.msra.mxu1 %v796_v38 }
  0x26   : > { %573 = vmatpush.bf16.msra.mxu1 %v795_v39 }
  0x2a   : > { %574 = vmatpush.bf16.msra.mxu1 %v794_v40 }
  0x84   : > { %v404_v9 = vpop.xlane.xlu0 %403 }
  0x85   : > { %v412_v10 = vmul.f32 %v950_v8, %v404_v9 }
  0x87   : > { %v413_v11 = vsub.f32 %v946_v0, %v412_v10 }
  0x89   : > { %v414_v12 = vmul.f32 %v413_v11, %v413_v11 }
  0x8b   : > { %v415_v13 = vsel %vm401_vm0, %v414_v12, 0.0 }
  0x8c   : > { %416 = vadd.xlane.f32.xlu0 %v415_v13 }
  0xff   : > { %v417_v15 = vpop.xlane.xlu0 %416 }
 0x100   : > { %v418_v17 = vmul.f32 %v417_v15, %v950_v8 }
 0x102   : > { %v419_v18 = vadd.f32 1e-05, %v418_v17 }
 0x104   : > { %836 = vrsqrt.f32 %v419_v18  ;;  %vm426_vm3 = vweird.f32 %v419_v18 }
 0x10a   : > { %v837_v19 = vpop.eup %836 }
 0x10b   : > { %v421_v20 = vmul.f32 %v837_v19, %v419_v18  ;;  %vm427_vm2 = vweird.f32 %v837_v19 }
 0x10c   : > { %vm428_vm4 = vmor %vm426_vm3, %vm427_vm2 }
 0x10d   : > { %v422_v21 = vmul.f32 %v837_v19, %v421_v20 }
 0x10f   : > { %v423_v22 = vmul.f32 0.5, %v422_v21 }
 0x111   : > { %v424_v23 = vsub.f32 1.5, %v423_v22  ;;  %v832_v22 = vld [vmem:[%s1034_s7] ss:$0 sm:$0xff] }
 0x113   : > { %v425_v24 = vmul.f32 %v837_v19, %v424_v23 }
 0x115   : > { %v429_v26 = vsel %vm428_vm4, %v837_v19, %v425_v24 }
 0x116   : > { %v430_v28 = vmul.f32 %v429_v26, %v413_v11 }
 0x118   : > { %v434_v29 = vmul.f32 %v828_v25, %v430_v28 }
 0x11a   : > { %v438_v30 = vadd.f32 %v829_v27, %v434_v29 }
 0x11c   : > { %v439_v31 = vpack.c.bf16 %v438_v30, %v438_v30 }
 0x11e   : > { %441 = vst.msk [vmem:[#allocation2] sm:$0xf] %vm440_vm5, %v439_v31 }
 0x125   : > { %v443_v32 = vld [vmem:[#allocation2] sm:$0xf] }
 0x126   : > { %756 = vmatmul.msk.bf16.vlgmr.msra.gmra.mxu0 %vm401_vm0, %v443_v32 }
 0x1a3   : > { %v477_v42 = vpop.f32.mrf.mxu0 }
 0x1a4   : > { %v478_v43 = vadd.f32 %v830_v41, %v477_v42 }
 0x1a6   : > { %v757_v44 = vmul.f32 -1.442695, %v478_v43 }
 0x1a8   : > { %838 = vpow2.f32 %v757_v44 }
 0x1ab   : > { %v479_v46 = vpop.f32.mrf.mxu0 }
 0x1ae   : > { %v839_v47 = vpop.eup %838 }
 0x1af   : > { %v484_v48 = vadd.f32 1.0, %v839_v47 }
 0x1b1   : > { %840 = vrcp.f32 %v484_v48  ;;  %v496_v52 = vand.u32 2147483648, %v484_v48  ;;  %v494_v54 = vand.u32 2147483647, %v484_v48  ;;  %vm490_vm7 = vweird.f32 %v484_v48 }
 0x1b3   : > { %v497_v56 = vor.u32 1.1754944e-38, %v496_v52  ;;  %vm495_vm9 = vcmp.eq.f32.partialorder %v494_v54, 8.507059e+37 }
 0x1b7   : > { %v841_v49 = vpop.eup %840 }
 0x1b8   : > { %v486_v50 = vmul.f32 %v841_v49, %v484_v48  ;;  %vm491_vm6 = vweird.f32 %v841_v49 }
 0x1b9   : > { %vm492_vm8 = vmor %vm490_vm7, %vm491_vm6 }
 0x1ba   : > { %v487_v51 = vsub.f32 1.0, %v486_v50 }
 0x1bc   : > { %v488_v53 = vmul.f32 %v841_v49, %v487_v51 }
 0x1be   : > { %v489_v55 = vadd.f32 %v841_v49, %v488_v53 }
 0x1c0   : > { %v493_v57 = vsel %vm492_vm8, %v841_v49, %v489_v55 }
 0x1c1   : > { %v498_v58 = vsel %vm495_vm9, %v497_v56, %v493_v57 }
 0x1c2   : > { %v500_v59 = vmul.f32 %v498_v58, %v478_v43 }
 0x1c4   : > { %v502_v60 = vpack.c.bf16 %v500_v59, %v500_v59 }
 0x1c6   : > { %575 = vmatmul.bf16.vlgmr.msra.gmra.mxu1 %v502_v60 }
 0x243   : > { %v576_v62 = vpop.f32.mrf.mxu1 }
 0x244   : > { %v580_v63 = vadd.f32 %v576_v62, %v501_v61 }
 0x246   : > { %581 = vst.msk [vmem:[#allocation3] sm:$0xff] %vm401_vm0, %v580_v63 }
 0x24b   : > { %v578_v2 = vpop.f32.mrf.mxu1 }
 0x24d   : > { %v586_v3 = vld [vmem:[#allocation3] sm:$0xff] }
 0x24e   : > { %v591_v4 = vadd.f32 %v831_v1, %v586_v3 }
 0x250   : > { %v592_v5 = vmul.f32 0.5, %v591_v4 }
 0x252   : > { %v593_v6 = vadd.f32 %v592_v5, %v946_v0 }
 0x254   : > { %v596_v7 = vsel %vm401_vm0, %v593_v6, 0.0 }
 0x255   : > { %597 = vadd.xlane.f32.xlu1 %v596_v7 }
 0x2c8   : > { %v598_v9 = vpop.xlane.xlu1 %597 }
 0x2c9   : > { %v606_v10 = vmul.f32 %v598_v9, %v950_v8 }
 0x2cb   : > { %v607_v11 = vsub.f32 %v593_v6, %v606_v10 }
 0x2cd   : > { %v608_v12 = vmul.f32 %v607_v11, %v607_v11 }
 0x2cf   : > { %v609_v13 = vsel %vm401_vm0, %v608_v12, 0.0 }
 0x2d0   : > { %610 = vadd.xlane.f32.xlu1 %v609_v13 }
 0x343   : > { %v611_v14 = vpop.xlane.xlu1 %610 }
 0x344   : > { %v612_v15 = vmul.f32 %v611_v14, %v950_v8  ;;  %v833_v8 = vld [vmem:[%s1035_s8] ss:$0 sm:$0xff] }
 0x346   : > { %v613_v16 = vadd.f32 1e-05, %v612_v15 }
 0x348   : > { %842 = vrsqrt.f32 %v613_v16  ;;  %vm620_vm11 = vweird.f32 %v613_v16 }
 0x34e   : > { %v843_v17 = vpop.eup %842 }
 0x34f   : > { %v615_v18 = vmul.f32 %v843_v17, %v613_v16  ;;  %vm621_vm10 = vweird.f32 %v843_v17 }
 0x350   : > { %vm622_vm12 = vmor %vm620_vm11, %vm621_vm10 }
 0x351   : > { %v616_v0 = vmul.f32 %v843_v17, %v615_v18 }
 0x353   : > { %v617_v19 = vmul.f32 0.5, %v616_v0 }
 0x355   : > { %v618_v20 = vsub.f32 1.5, %v617_v19 }
 0x357   : > { %v619_v21 = vmul.f32 %v843_v17, %v618_v20 }
 0x359   : > { %v623_v23 = vsel %vm622_vm12, %v843_v17, %v619_v21 }
 0x35a   : > { %v624_v24 = vmul.f32 %v623_v23, %v607_v11 }
 0x35c   : > { %v628_v25 = vmul.f32 %v832_v22, %v624_v24 }
 0x35e   : > { %v632_v26 = vadd.f32 %v833_v8, %v628_v25 }
 0x360   : > { %633 = vst.msk [vmem:[%s392_s19] sm:$0xff] %vm401_vm0, %v632_v26 }
 0x361 PF: > { %s19_s11 = sadd.s32 1, %s866_s11   ;;  %s1037_s30 = smov %s862_s10 }
 0x362   : > { %p16_p5 = scmp.ge.s32.totalorder %s19_s11, 6   ;;  %s1038_s10 = smov %s1040_s12 }
 0x364   :  { %18 = sbr.rel (!%p16_p5) target bundleno = 2 (0x2), region = 103 }

// kernel: denceformer_forward.26
= control target key start
LH: loop header
LB: loop body
LE: loop exit
PB: predicated region body
PF: predicated region fallthrough
CT: control target
= control target key end

     0   :  { %s317_s12 = smov 0   ;;  %s337_s0 = inlined_call_operand.vmem [shape: f32[32,32], index: 0, kind: input, shape index: {}]   ;;  %s338_s1 = inlined_call_operand.vmem [shape: bf16[32,128], index: 1, kind: input, shape index: {}]   ;;  %s339_s2 = inlined_call_operand.vmem [shape: f32[1,128], index: 2, kind: input, shape index: {}]   ;;  %s340_s3 = inlined_call_operand.vmem [shape: f32[32,128], index: 3, kind: output, shape index: {}]  }
   0x1 LB: > { %s260_s13 = sadd.s32 4294967295, %s295_s12   ;;  %p264_p0 = scmp.ge.s32.totalorder %s295_s12, 1  ;;  %s295_s12 = sphi %s317_s12, %s13_s12  }
   0x2   : > { %p136_p1 = scmp.lt.s32.totalorder %s295_s12, 5 }
   0x4   : > { %p137_p2 = pnand %p264_p0, %p136_p1 }
   0x5   : > { %p158_p3 = scmp.lt.s32.totalorder (!%p137_p2), %s260_s13, 3 }
   0x6   : > { %140 = sbr.rel (%p137_p2) target bundleno = 153 (0x99), region = 32 }
   0xb   : > { %v279_v0 = vld [vmem:[%s338_s1 + $0x8] sm:$0xff]  ;;  %v278_v1 = vld [vmem:[%s338_s1] sm:$0xff]  ;;  %s342_s13 = smov (!%p158_p3, %s260_s13), 3  ;;  %vm189_vm0 = vcmask 261120  }
   0xc   : > { %199 = vmatpush.bf16.msra.mxu0 %v279_v0  ;;  %s265_s18 = sshll.u32 %s342_s13, 3  ;;  %v288_v4 = vld [vmem:[%s339_s2] ss:$0 sm:$0xff] }
   0xd   : > { %s161_s21 = scalar_lea.vmem %s337_s0, %s265_s18  ;;  %s165_s26 = scalar_lea.vmem %s340_s3, %s265_s18 }
   0xe   : > { %v167_v2 = vld [vmem:[%s161_s21] sm:$0xff] }
   0xf   : > { %v168_v3 = vpack.c.bf16 %v167_v2, %v167_v2 }
  0x10   : > { %200 = vmatpush.bf16.msra.mxu0 %v278_v1 }
  0x13   : > { %275 = vmatmul.msk.bf16.vlgmr.msra.gmra.mxu0 %vm189_vm0, %v168_v3 }
  0x90   : > { %v202_v5 = vpop.f32.mrf.mxu0 }
  0x91   : > { %v203_v6 = vadd.f32 %v288_v4, %v202_v5 }
  0x93   : > { %206 = vst [vmem:[%s165_s26] sm:$0xff] %v203_v6 }
  0x98   : > { %v204_v7 = vpop.f32.mrf.mxu0 }
  0x99 PF: > { %s13_s12 = sadd.s32 1, %s295_s12  }
  0x9a   : > { %p10_p4 = scmp.ge.s32.totalorder %s13_s12, 6  }
  0x9c   :  { %12 = sbr.rel (!%p10_p4) target bundleno = 1 (0x1), region = 62 }

// kernel: denceformer_forward.35
= control target key start
LH: loop header
LB: loop body
LE: loop exit
PB: predicated region body
PF: predicated region fallthrough
CT: control target
= control target key end

     0   :  { %8 = vsyncpa [#allocation3], 0  ;;  %s518_s0 = inlined_call_operand.vmem [shape: f32[32,32], index: 0, kind: input, shape index: {}]   ;;  %s519_s1 = inlined_call_operand.vmem [shape: f32[1,32], index: 1, kind: input, shape index: {}]   ;;  %s520_s2 = inlined_call_operand.vmem [shape: f32[1,32], index: 2, kind: input, shape index: {}]   ;;  %s521_s3 = inlined_call_operand.hbm [shape: f32[32,32], index: 3, kind: output, shape index: {}]  }
   0x1   :  { %10 = vsyncpa [#allocation3 + $0x1], 0  ;;  %s424_s12 = smov 0   ;;  %s426_s13 = smov 0  }
   0x2   :  { %s428_s14 = smov 0   ;;  %s430_s15 = smov 0  }
   0x3 LB: > { %s445_s16 = sadd.s32 4294967295, %s401_s15   ;;  %s283_s17 = sadd.s32 4294967294, %s401_s15   ;;  %s401_s15 = sphi %s430_s15, %s527_s15   ;;  %s397_s14 = sphi %s428_s14, %s526_s14   ;;  %s393_s13 = sphi %s426_s13, %s525_s13   ;;  %s389_s12 = sphi %s424_s12, %s524_s12  }
   0x4   : > { %s449_s18 = sadd.s32 1, %s401_s15   ;;  %s91_s19 = sadd.s32 1, %s397_s14 }
   0x5   : > { %s88_s20 = ssub.s32 %s401_s15, %s449_s18  ;;  %p101_p0 = scmp.ne.s32.totalorder %s397_s14, %s393_s13 }
   0x6   : > { %p89_p1 = scmp.eq.s32.totalorder %s88_s20, 0  ;;  %p102_p2 = scmp.eq.s32.totalorder %s445_s16, 3 }
   0x7   : > { %p107_p3 = scmp.ne.s32.totalorder %s393_s13, %s389_s12  ;;  %p108_p4 = scmp.eq.s32.totalorder %s283_s17, 3 }
   0x8   : > { %s460_s21 = scalar_select %p89_p1, %s397_s14, %s91_s19  }
   0x9   : > { %p462_p5 = por %p102_p2, %p101_p0  ;;  %p466_p6 = por %p108_p4, %p107_p3 }
   0xa   : > { %p286_p7 = scmp.ge.s32.totalorder %s401_s15, 1  ;;  %p139_p8 = scmp.lt.s32.totalorder %s401_s15, 5 }
   0xc   : > { %p140_p9 = pnand %p286_p7, %p139_p8 }
   0xd   : > { %p162_p10 = scmp.lt.s32.totalorder (!%p140_p9), %s445_s16, 3  ;;  %s159_s29 = sand.u32 (!%p140_p9), 1, %s393_s13  }
   0xe   : > { %143 = sbr.rel (%p140_p9) target bundleno = 295 (0x127), region = 32  ;;  %s287_s30 = sshll.u32 (!%p140_p9), %s159_s29, 3 }
   0xf   : > { %s290_s4 = sshll.u32 (!%p140_p9), %s445_s16, 3  ;;  %s161_s17 = scalar_lea.vmem (!%p140_p9), [#allocation2], %s287_s30 }
  0x10   : > { %s219_s9 = scalar_lea.hbm (!%p140_p9), %s521_s3, %s290_s4  ;;  %s209_s20 = scalar_lea.sflag (!%p140_p9), [#allocation3], %s159_s29 }
  0x11   : > { %s223_s19 = sshll.u32 (!%p140_p9), %s219_s9, 4  ;;  %s224_s19 = int_to_ptr.hbm [resolvable:$true] %s223_s19 }
  0x13   : > { %s163_s24 = scalar_select %p162_p10, %s445_s16, 3  ;;  %vm169_vm0 = vcmask 261120   ;;  %v403_v2 = vmov 32.0   ;;  %v333_v23 = vld [vmem:[%s519_s1] ss:$0 sm:$0xff] }
  0x14   : > { %335 = vrcp.f32 %v403_v2  ;;  %v334_v26 = vld [vmem:[%s520_s2] ss:$0 sm:$0xff]  ;;  %s221_s16 = sshll.u32 %s161_s17, 4  ;;  %s222_s16 = int_to_ptr.vmem [resolvable:$true] %s221_s16 }
  0x15   : > { %s288_s25 = sshll.u32 %s163_s24, 3  ;;  %s353_s24 = sshra.s32 %s224_s19, 4  ;;  %s354_s24 = int_to_ptr.hbm [resolvable:$true] %s353_s24 }
  0x16   : > { %s165_s28 = scalar_lea.vmem %s518_s0, %s288_s25  ;;  %s355_s25 = scalar_lea.hbm %s354_s24, 8 }
  0x17   : > { %v166_v0 = vld [vmem:[%s165_s28] sm:$0xff]  ;;  %p356_p11 = scmp.ne.s32.totalorder %s354_s24, %s355_s25  ;;  %s359_s28 = scalar_lea.hbm %s521_s3, 32 }
  0x18   : > { %v170_v1 = vsel %vm169_vm0, %v166_v0, 0.0  ;;  %p360_p0 = scmp.lt.s32.totalorder %s354_s24, %s521_s3  ;;  %p361_p1 = scmp.lt.s32.totalorder %s359_s28, %s355_s25 }
  0x19   : > { %171 = vadd.xlane.f32.xlu0 %v170_v1  ;;  %p357_p12 = pnand %p356_p11, %p462_p5 }
  0x1a   : > { %v336_v3 = vpop.eup %335  ;;  %p362_p2 = por %p361_p1, %p360_p0 }
  0x1b   : > { %v174_v4 = vmul.f32 32.0, %v336_v3  ;;  %vm178_vm1 = vweird.f32 %v336_v3  ;;  %p358_p13 = pneg %p357_p12 }
  0x1d   : > { %v175_v5 = vsub.f32 1.0, %v174_v4  ;;  %p363_p3 = pnand %p362_p2, %p358_p13 }
  0x1f   : > { %v176_v6 = vmul.f32 %v336_v3, %v175_v5 }
  0x21   : > { %v177_v7 = vadd.f32 %v336_v3, %v176_v6 }
  0x23   : > { %v179_v8 = vsel %vm178_vm1, %v336_v3, %v177_v7 }
  0x8c   : > { %v172_v9 = vpop.xlane.xlu0 %171 }
  0x8d   : > { %v180_v10 = vmul.f32 %v179_v8, %v172_v9 }
  0x8f   : > { %v181_v11 = vsub.f32 %v166_v0, %v180_v10 }
  0x91   : > { %v182_v12 = vmul.f32 %v181_v11, %v181_v11 }
  0x93   : > { %v183_v13 = vsel %vm169_vm0, %v182_v12, 0.0 }
  0x94   : > { %184 = vadd.xlane.f32.xlu0 %v183_v13 }
 0x107   : > { %v185_v14 = vpop.xlane.xlu0 %184 }
 0x108   : > { %v186_v15 = vmul.f32 %v185_v14, %v179_v8 }
 0x10a   : > { %v187_v16 = vadd.f32 1e-05, %v186_v15 }
 0x10c   : > { %337 = vrsqrt.f32 %v187_v16  ;;  %vm194_vm3 = vweird.f32 %v187_v16 }
 0x112   : > { %v338_v17 = vpop.eup %337 }
 0x113   : > { %v189_v18 = vmul.f32 %v338_v17, %v187_v16  ;;  %vm195_vm2 = vweird.f32 %v338_v17 }
 0x114   : > { %vm196_vm4 = vmor %vm194_vm3, %vm195_vm2 }
 0x115   : > { %v190_v19 = vmul.f32 %v338_v17, %v189_v18 }
 0x117   : > { %v191_v20 = vmul.f32 0.5, %v190_v19 }
 0x119   : > { %v192_v21 = vsub.f32 1.5, %v191_v20 }
 0x11b   : > { %v193_v22 = vmul.f32 %v338_v17, %v192_v21 }
 0x11d   : > { %v197_v24 = vsel %vm196_vm4, %v338_v17, %v193_v22 }
 0x11e   : > { %v198_v25 = vmul.f32 %v197_v24, %v181_v11 }
 0x120   : > { %v202_v27 = vmul.f32 %v333_v23, %v198_v25 }
 0x122   : > { %v206_v28 = vadd.f32 %v334_v26, %v202_v27 }
 0x124   : > { %207 = vst.msk [vmem:[%s161_s17] sm:$0xff] %vm169_vm0, %v206_v28 }
 0x125   : > { %366 = shalt.err (!%p363_p3)
}
 0x126   : > { %293 = dma.vmem_to_hbm [thread:$0]  (%p462_p5), %s222_s16, 128, %s224_s19, %s209_s20  }
 0x127 PF: > { %p299_p4 = scmp.ge.s32.totalorder %s401_s15, 2  ;;  %s235_s29 = sand.u32 1, %s389_s12  }
 0x128   : > { %s236_s5 = scalar_lea.sflag [#allocation3], %s235_s29 }
 0x129   : > { %p296_p7 = pnand %p299_p4, %p466_p6 }
 0x12b   : > { %p297_p8 = pneg %p296_p7 }
 0x12d   : > { %384 = dma.done.wait (%p297_p8), %s236_s5, 128  }
 0x12e   : > { %386 = vsyncadd (%p297_p8), %s236_s5, 4294967168  ;;  %p13_p9 = scmp.ge.s32.totalorder %s449_s18, 6   ;;  %s524_s12 = smov %s393_s13 }
 0x12f   : > { %s525_s13 = smov %s397_s14  ;;  %s526_s14 = smov %s460_s21 }
 0x130   : > { %s527_s15 = smov %s449_s18  ;;  %15 = sbr.rel (!%p13_p9) target bundleno = 3 (0x3), region = 67 }
 0x135   :  { %242 = vsyncpa [#allocation3], 1 }
 0x136   :  { %244 = vsyncpa [#allocation3 + $0x1], 1 }

</bundles_post_ra>
